<compile_context>
chip_gen: v7x
topology: tpu7x:2x2x1
jax: 0.10.0
libtpu: 0.0.40
codegen_flags: <defaults>
</compile_context>

<pallas_src>
import math
import jax
import jax.numpy as jnp
from jax.experimental import pallas as pl
from jax.experimental.pallas import tpu as pltpu

# ----------------------------- model config ---------------------------------
VOCAB = 16
EMBED = 32
HEADS = 4
FF = 64
LAYERS = 2
SEQ = 8
BATCH = 2
HEAD_DIM = EMBED // HEADS

VPAD = 128            # lane-dense padded vocab width for the output store
NEG_INF = -1e30       # additive mask value (exp underflows to 0, same as -inf)
LN_EPS = 1e-5         # torch.nn.LayerNorm default eps


# ----------------------------- shared math -----------------------------------
def _layernorm(x, gamma, beta):
    mu = jnp.mean(x, axis=-1, keepdims=True)
    var = jnp.mean((x - mu) ** 2, axis=-1, keepdims=True)
    return (x - mu) * jax.lax.rsqrt(var + LN_EPS) * gamma + beta


# ----------------------------- Pallas kernel ---------------------------------
def decoder_kernel(x_ref, mask_ref,
                   wq_ref, bq_ref, wk_ref, bk_ref, wv_ref, bv_ref,
                   wo_ref, bo_ref,
                   ln1g_ref, ln1b_ref,
                   w1_ref, b1_ref, w2_ref, b2_ref,
                   ln2g_ref, ln2b_ref,
                   wout_ref, bout_ref,
                   out_ref):
    x = x_ref[...]                    # (B*S, E) — whole batch folded into sublanes
    mask = mask_ref[...]              # (B*S, B*S) block-diagonal causal mask

    scale = 1.0 / math.sqrt(HEAD_DIM)
    # contract last dims of q and k (q @ k^T) without materializing a transpose
    qk_dims = (((1,), (1,)), ((), ()))

    for l in range(LAYERS):           # static unrolled loop over decoder blocks
        # ---- multi-head self attention (eval mode: no dropout) ----
        attn = None
        for h in range(HEADS):        # static; all weight indexing is leading-dim (free)
            qh = jnp.dot(x, wq_ref[l, h], preferred_element_type=jnp.float32) + bq_ref[l, h]
            kh = jnp.dot(x, wk_ref[l, h], preferred_element_type=jnp.float32) + bk_ref[l, h]
            vh = jnp.dot(x, wv_ref[l, h], preferred_element_type=jnp.float32) + bv_ref[l, h]

            s = jax.lax.dot_general(qh * scale, kh, qk_dims,
                                    preferred_element_type=jnp.float32) + mask
            s = s - jnp.max(s, axis=-1, keepdims=True)              # XLU reduce (free slot)
            p = jnp.exp(s)                                          # EUP
            p = p * pl.reciprocal(jnp.sum(p, axis=-1, keepdims=True), approx=True)

            ctx = jnp.dot(p, vh, preferred_element_type=jnp.float32)    # (B*S, HEAD_DIM)
            # fold this head through its slice of W_o and accumulate:
            # sum_h ctx_h @ Wo_h == concat(heads) @ W_o  (no lane concat needed)
            contrib = jnp.dot(ctx, wo_ref[l, h], preferred_element_type=jnp.float32)
            attn = contrib if attn is None else attn + contrib
        attn = attn + bo_ref[l]

        # residual + LayerNorm 1
        x = _layernorm(x + attn, ln1g_ref[l], ln1b_ref[l])

        # ---- position-wise feed forward ----
        h1 = jnp.dot(x, w1_ref[l], preferred_element_type=jnp.float32) + b1_ref[l]
        h1 = jnp.maximum(h1, 0.0)
        ff = jnp.dot(h1, w2_ref[l], preferred_element_type=jnp.float32) + b2_ref[l]

        # residual + LayerNorm 2
        x = _layernorm(x + ff, ln2g_ref[l], ln2b_ref[l])

    # ---- output projection + softmax over (padded) vocab; lane-dense store ----
    logits = jnp.dot(x, wout_ref[...], preferred_element_type=jnp.float32) + bout_ref[...]
    logits = logits - jnp.max(logits, axis=-1, keepdims=True)
    e = jnp.exp(logits)
    out_ref[...] = e * pl.reciprocal(jnp.sum(e, axis=-1, keepdims=True), approx=True)


# ----------------------------- wrapper ---------------------------------------
def run_decoder(x_bse, params):
    B, S, E = x_bse.shape
    BS = B * S
    V = params["wout"].shape[1]
    assert V <= VPAD

    x_flat = x_bse.reshape(BS, E).astype(jnp.float32)

    # block-diagonal causal mask: within-sequence causal, cross-sequence blocked
    idx = jnp.arange(BS)
    b_of = idx // S
    pos = idx % S
    allow = (b_of[:, None] == b_of[None, :]) & (pos[None, :] <= pos[:, None])
    mask = jnp.where(allow, 0.0, NEG_INF).astype(jnp.float32)

    # pad the vocab projection to 128 lanes so the output store is lane-dense;
    # padded columns get weight 0 and bias -inf -> softmax prob ~0 there.
    wout_p = jnp.zeros((E, VPAD), jnp.float32).at[:, :V].set(params["wout"])
    bout_p = jnp.full((1, VPAD), NEG_INF, jnp.float32).at[:, :V].set(params["bout"])

    # Single grid step (no grid): every operand is tiny and fits VMEM whole,
    # so all arrays are passed as full blocks — zero extra pipeline overhead.
    out_p = pl.pallas_call(
        decoder_kernel,
        out_shape=jax.ShapeDtypeStruct((BS, VPAD), jnp.float32),
    )(x_flat, mask,
      params["wq"], params["bq"], params["wk"], params["bk"],
      params["wv"], params["bv"], params["wo"], params["bo"],
      params["ln1g"], params["ln1b"],
      params["w1"], params["b1"], params["w2"], params["b2"],
      params["ln2g"], params["ln2b"],
      wout_p, bout_p)

    return out_p[:, :V].reshape(B, S, V)


# ----------------------------- params & glue ---------------------------------
def init_params(key):
    ks = jax.random.split(key, 15)
    s = 0.05
    n = lambda k, shp: jax.random.normal(k, shp, jnp.float32) * s
    p = {
        "embedding": n(ks[0], (VOCAB, EMBED)),
        # per-head weights on leading axes -> free leading-dim indexing in-kernel
        "wq": n(ks[1], (LAYERS, HEADS, EMBED, HEAD_DIM)),
        "bq": n(ks[2], (LAYERS, HEADS, 1, HEAD_DIM)),
        "wk": n(ks[3], (LAYERS, HEADS, EMBED, HEAD_DIM)),
        "bk": n(ks[4], (LAYERS, HEADS, 1, HEAD_DIM)),
        "wv": n(ks[5], (LAYERS, HEADS, EMBED, HEAD_DIM)),
        "bv": n(ks[6], (LAYERS, HEADS, 1, HEAD_DIM)),
        "wo": n(ks[7], (LAYERS, HEADS, HEAD_DIM, EMBED)),
        "bo": n(ks[8], (LAYERS, 1, EMBED)),
        "ln1g": jnp.ones((LAYERS, 1, EMBED), jnp.float32),
        "ln1b": jnp.zeros((LAYERS, 1, EMBED), jnp.float32),
        "w1": n(ks[9], (LAYERS, EMBED, FF)),
        "b1": n(ks[10], (LAYERS, 1, FF)),
        "w2": n(ks[11], (LAYERS, FF, EMBED)),
        "b2": n(ks[12], (LAYERS, 1, EMBED)),
        "ln2g": jnp.ones((LAYERS, 1, EMBED), jnp.float32),
        "ln2b": jnp.zeros((LAYERS, 1, EMBED), jnp.float32),
        "wout": n(ks[13], (EMBED, VOCAB)),
        "bout": n(ks[14], (1, VOCAB)),
    }
    return p


def positional_encoding(max_len, d_model):
    position = jnp.arange(max_len, dtype=jnp.float32)[:, None]
    div_term = jnp.exp(
        jnp.arange(0, d_model, 2, dtype=jnp.float32) * (-math.log(10000.0) / d_model)
    )
    pe = jnp.zeros((max_len, d_model), jnp.float32)
    pe = pe.at[:, 0::2].set(jnp.sin(position * div_term))
    pe = pe.at[:, 1::2].set(jnp.cos(position * div_term))
    return pe


# ----------------------------- pure-JAX reference ----------------------------
def _block_reference(x, params):
    S = x.shape[0]
    row = jnp.arange(S)[:, None]
    col = jnp.arange(S)[None, :]
    mask = jnp.where(col <= row, 0.0, NEG_INF).astype(jnp.float32)
    scale = 1.0 / math.sqrt(HEAD_DIM)
    for l in range(LAYERS):
        attn = jnp.zeros((S, EMBED), jnp.float32)
        for h in range(HEADS):
            qh = x @ params["wq"][l, h] + params["bq"][l, h][0]
            kh = x @ params["wk"][l, h] + params["bk"][l, h][0]
            vh = x @ params["wv"][l, h] + params["bv"][l, h][0]
            s = (qh * scale) @ kh.T + mask
            p = jax.nn.softmax(s, axis=-1)
            attn = attn + (p @ vh) @ params["wo"][l, h]
        attn = attn + params["bo"][l][0]
        x = _layernorm(x + attn, params["ln1g"][l][0], params["ln1b"][l][0])
        h1 = jnp.maximum(x @ params["w1"][l] + params["b1"][l][0], 0.0)
        ff = h1 @ params["w2"][l] + params["b2"][l][0]
        x = _layernorm(x + ff, params["ln2g"][l][0], params["ln2b"][l][0])
    logits = x @ params["wout"] + params["bout"][0]
    return jax.nn.softmax(logits, axis=-1)


def reference_forward(x_bse, params):
    return jax.vmap(lambda xb: _block_reference(xb, params))(x_bse)


# ----------------------------- main -------------------------------------------
if __name__ == "__main__":
    key = jax.random.PRNGKey(0)
    k_tok, k_par = jax.random.split(key)

    # token ids, PyTorch layout (S, B)
    tokens = jax.random.randint(k_tok, (SEQ, BATCH), 0, VOCAB, dtype=jnp.int32)
    params = init_params(k_par)

    # glue: embedding lookup + positional encoding (dropout = identity in eval)
    emb = params["embedding"][tokens]                                 # (S, B, E)
    pe = positional_encoding(5000, EMBED)
    x_sbe = emb + pe[:SEQ][:, None, :]                                # (S, B, E)
    x_bse = jnp.transpose(x_sbe, (1, 0, 2)).astype(jnp.float32)       # (B, S, E)

    out_bsv = run_decoder(x_bse, params)                              # (B, S, V)
    out_sbv = jnp.transpose(out_bsv, (1, 0, 2))                       # (S, B, V) like PyTorch
    out_sbv = jax.block_until_ready(out_sbv)

    # correctness checks vs. pure-JAX reference
    ref_bsv = reference_forward(x_bse, params)
    max_err = float(jnp.max(jnp.abs(out_bsv - ref_bsv)))
    assert max_err < 5e-3, f"mismatch vs reference: {max_err}"
    assert bool(jnp.all(jnp.isfinite(out_sbv)))
    assert bool(jnp.allclose(jnp.sum(out_sbv, -1), 1.0, atol=3e-3))

    print("KERNEL_OK")
</pallas_src>

<mosaic_0001>
module attributes {stable_mosaic.version = 11 : i64} {
  func.func @decoder_kernel(%arg0: memref<16x32xf32, #tpu.memory_space<vmem>>, %arg1: memref<16x16xf32, #tpu.memory_space<vmem>>, %arg2: memref<2x4x32x8xf32, #tpu.memory_space<vmem>>, %arg3: memref<2x4x1x8xf32, #tpu.memory_space<vmem>>, %arg4: memref<2x4x32x8xf32, #tpu.memory_space<vmem>>, %arg5: memref<2x4x1x8xf32, #tpu.memory_space<vmem>>, %arg6: memref<2x4x32x8xf32, #tpu.memory_space<vmem>>, %arg7: memref<2x4x1x8xf32, #tpu.memory_space<vmem>>, %arg8: memref<2x4x8x32xf32, #tpu.memory_space<vmem>>, %arg9: memref<2x1x32xf32, #tpu.memory_space<vmem>>, %arg10: memref<2x1x32xf32, #tpu.memory_space<vmem>>, %arg11: memref<2x1x32xf32, #tpu.memory_space<vmem>>, %arg12: memref<2x32x64xf32, #tpu.memory_space<vmem>>, %arg13: memref<2x1x64xf32, #tpu.memory_space<vmem>>, %arg14: memref<2x64x32xf32, #tpu.memory_space<vmem>>, %arg15: memref<2x1x32xf32, #tpu.memory_space<vmem>>, %arg16: memref<2x1x32xf32, #tpu.memory_space<vmem>>, %arg17: memref<2x1x32xf32, #tpu.memory_space<vmem>>, %arg18: memref<32x128xf32, #tpu.memory_space<vmem>>, %arg19: memref<1x128xf32, #tpu.memory_space<vmem>>, %arg20: memref<16x128xf32, #tpu.memory_space<vmem>>) attributes {dimension_semantics = [], scalar_prefetch = 0 : i64, scratch_operands = 0 : i64, tpu.core_type = #tpu.core_type<tc>} {
    %c0 = arith.constant 0 : index
    %c0_0 = arith.constant 0 : index
    %0 = vector.load %arg0[%c0, %c0_0] : memref<16x32xf32, #tpu.memory_space<vmem>>, vector<16x32xf32>
    %c0_1 = arith.constant 0 : index
    %c0_2 = arith.constant 0 : index
    %1 = vector.load %arg1[%c0_1, %c0_2] : memref<16x16xf32, #tpu.memory_space<vmem>>, vector<16x16xf32>
    %c0_3 = arith.constant 0 : index
    %c0_4 = arith.constant 0 : index
    %c0_5 = arith.constant 0 : index
    %c0_6 = arith.constant 0 : index
    %2 = vector.load %arg2[%c0_3, %c0_4, %c0_5, %c0_6] : memref<2x4x32x8xf32, #tpu.memory_space<vmem>>, vector<1x1x32x8xf32>
    %3 = vector.shape_cast %2 : vector<1x1x32x8xf32> to vector<32x8xf32>
    %cst = arith.constant dense<0.000000e+00> : vector<16x8xf32>
    %4 = tpu.matmul %0, %3, %cst {dimension_numbers = #tpu.dot_dimension_numbers<[1], [0], [0], [1], [0, 0, 1, 1], [], []>} : vector<16x32xf32>, vector<32x8xf32>, vector<16x8xf32> -> vector<16x8xf32>
    %c0_7 = arith.constant 0 : index
    %c0_8 = arith.constant 0 : index
    %c0_9 = arith.constant 0 : index
    %c0_10 = arith.constant 0 : index
    %5 = vector.load %arg3[%c0_7, %c0_8, %c0_9, %c0_10] : memref<2x4x1x8xf32, #tpu.memory_space<vmem>>, vector<1x1x1x8xf32>
    %6 = vector.shape_cast %5 : vector<1x1x1x8xf32> to vector<1x8xf32>
    %7 = vector.broadcast %6 : vector<1x8xf32> to vector<16x8xf32>
    %8 = arith.addf %4, %7 : vector<16x8xf32>
    %c0_11 = arith.constant 0 : index
    %c0_12 = arith.constant 0 : index
    %c0_13 = arith.constant 0 : index
    %c0_14 = arith.constant 0 : index
    %9 = vector.load %arg4[%c0_11, %c0_12, %c0_13, %c0_14] : memref<2x4x32x8xf32, #tpu.memory_space<vmem>>, vector<1x1x32x8xf32>
    %10 = vector.shape_cast %9 : vector<1x1x32x8xf32> to vector<32x8xf32>
    %cst_15 = arith.constant dense<0.000000e+00> : vector<16x8xf32>
    %11 = tpu.matmul %0, %10, %cst_15 {dimension_numbers = #tpu.dot_dimension_numbers<[1], [0], [0], [1], [0, 0, 1, 1], [], []>} : vector<16x32xf32>, vector<32x8xf32>, vector<16x8xf32> -> vector<16x8xf32>
    %c0_16 = arith.constant 0 : index
    %c0_17 = arith.constant 0 : index
    %c0_18 = arith.constant 0 : index
    %c0_19 = arith.constant 0 : index
    %12 = vector.load %arg5[%c0_16, %c0_17, %c0_18, %c0_19] : memref<2x4x1x8xf32, #tpu.memory_space<vmem>>, vector<1x1x1x8xf32>
    %13 = vector.shape_cast %12 : vector<1x1x1x8xf32> to vector<1x8xf32>
    %14 = vector.broadcast %13 : vector<1x8xf32> to vector<16x8xf32>
    %15 = arith.addf %11, %14 : vector<16x8xf32>
    %c0_20 = arith.constant 0 : index
    %c0_21 = arith.constant 0 : index
    %c0_22 = arith.constant 0 : index
    %c0_23 = arith.constant 0 : index
    %16 = vector.load %arg6[%c0_20, %c0_21, %c0_22, %c0_23] : memref<2x4x32x8xf32, #tpu.memory_space<vmem>>, vector<1x1x32x8xf32>
    %17 = vector.shape_cast %16 : vector<1x1x32x8xf32> to vector<32x8xf32>
    %cst_24 = arith.constant dense<0.000000e+00> : vector<16x8xf32>
    %18 = tpu.matmul %0, %17, %cst_24 {dimension_numbers = #tpu.dot_dimension_numbers<[1], [0], [0], [1], [0, 0, 1, 1], [], []>} : vector<16x32xf32>, vector<32x8xf32>, vector<16x8xf32> -> vector<16x8xf32>
    %c0_25 = arith.constant 0 : index
    %c0_26 = arith.constant 0 : index
    %c0_27 = arith.constant 0 : index
    %c0_28 = arith.constant 0 : index
    %19 = vector.load %arg7[%c0_25, %c0_26, %c0_27, %c0_28] : memref<2x4x1x8xf32, #tpu.memory_space<vmem>>, vector<1x1x1x8xf32>
    %20 = vector.shape_cast %19 : vector<1x1x1x8xf32> to vector<1x8xf32>
    %21 = vector.broadcast %20 : vector<1x8xf32> to vector<16x8xf32>
    %22 = arith.addf %18, %21 : vector<16x8xf32>
    %cst_29 = arith.constant 0.353553385 : f32
    %23 = vector.broadcast %cst_29 : f32 to vector<16x8xf32>
    %24 = arith.mulf %8, %23 : vector<16x8xf32>
    %cst_30 = arith.constant dense<0.000000e+00> : vector<16x16xf32>
    %25 = tpu.matmul %24, %15, %cst_30 {dimension_numbers = #tpu.dot_dimension_numbers<[1], [1], [0], [0], [0, 0, 1, 0], [], []>} : vector<16x8xf32>, vector<16x8xf32>, vector<16x16xf32> -> vector<16x16xf32>
    %26 = arith.addf %25, %1 : vector<16x16xf32>
    %cst_31 = arith.constant dense<0xFF800000> : vector<16xf32>
    %27 = vector.multi_reduction <maximumf>, %26, %cst_31 [1] : vector<16x16xf32> to vector<16xf32>
    %28 = vector.shape_cast %27 : vector<16xf32> to vector<16x1xf32>
    %29 = vector.broadcast %28 : vector<16x1xf32> to vector<16x16xf32>
    %30 = arith.subf %26, %29 : vector<16x16xf32>
    %31 = math.exp %30 : vector<16x16xf32>
    %cst_32 = arith.constant dense<0.000000e+00> : vector<16xf32>
    %32 = vector.multi_reduction <add>, %31, %cst_32 [1] : vector<16x16xf32> to vector<16xf32>
    %33 = vector.shape_cast %32 : vector<16xf32> to vector<16x1xf32>
    %34 = tpu.reciprocal %33 {approx = true} : vector<16x1xf32> -> vector<16x1xf32>
    %35 = vector.broadcast %34 : vector<16x1xf32> to vector<16x16xf32>
    %36 = arith.mulf %31, %35 : vector<16x16xf32>
    %cst_33 = arith.constant dense<0.000000e+00> : vector<16x8xf32>
    %37 = tpu.matmul %36, %22, %cst_33 {dimension_numbers = #tpu.dot_dimension_numbers<[1], [0], [0], [1], [0, 0, 1, 1], [], []>} : vector<16x16xf32>, vector<16x8xf32>, vector<16x8xf32> -> vector<16x8xf32>
    %c0_34 = arith.constant 0 : index
    %c0_35 = arith.constant 0 : index
    %c0_36 = arith.constant 0 : index
    %c0_37 = arith.constant 0 : index
    %38 = vector.load %arg8[%c0_34, %c0_35, %c0_36, %c0_37] : memref<2x4x8x32xf32, #tpu.memory_space<vmem>>, vector<1x1x8x32xf32>
    %39 = vector.shape_cast %38 : vector<1x1x8x32xf32> to vector<8x32xf32>
    %cst_38 = arith.constant dense<0.000000e+00> : vector<16x32xf32>
    %40 = tpu.matmul %37, %39, %cst_38 {dimension_numbers = #tpu.dot_dimension_numbers<[1], [0], [0], [1], [0, 0, 1, 1], [], []>} : vector<16x8xf32>, vector<8x32xf32>, vector<16x32xf32> -> vector<16x32xf32>
    %c0_39 = arith.constant 0 : index
    %c1 = arith.constant 1 : index
    %c0_40 = arith.constant 0 : index
    %c0_41 = arith.constant 0 : index
    %41 = vector.load %arg2[%c0_39, %c1, %c0_40, %c0_41] : memref<2x4x32x8xf32, #tpu.memory_space<vmem>>, vector<1x1x32x8xf32>
    %42 = vector.shape_cast %41 : vector<1x1x32x8xf32> to vector<32x8xf32>
    %cst_42 = arith.constant dense<0.000000e+00> : vector<16x8xf32>
    %43 = tpu.matmul %0, %42, %cst_42 {dimension_numbers = #tpu.dot_dimension_numbers<[1], [0], [0], [1], [0, 0, 1, 1], [], []>} : vector<16x32xf32>, vector<32x8xf32>, vector<16x8xf32> -> vector<16x8xf32>
    %c0_43 = arith.constant 0 : index
    %c1_44 = arith.constant 1 : index
    %c0_45 = arith.constant 0 : index
    %c0_46 = arith.constant 0 : index
    %44 = vector.load %arg3[%c0_43, %c1_44, %c0_45, %c0_46] : memref<2x4x1x8xf32, #tpu.memory_space<vmem>>, vector<1x1x1x8xf32>
    %45 = vector.shape_cast %44 : vector<1x1x1x8xf32> to vector<1x8xf32>
    %46 = vector.broadcast %45 : vector<1x8xf32> to vector<16x8xf32>
    %47 = arith.addf %43, %46 : vector<16x8xf32>
    %c0_47 = arith.constant 0 : index
    %c1_48 = arith.constant 1 : index
    %c0_49 = arith.constant 0 : index
    %c0_50 = arith.constant 0 : index
    %48 = vector.load %arg4[%c0_47, %c1_48, %c0_49, %c0_50] : memref<2x4x32x8xf32, #tpu.memory_space<vmem>>, vector<1x1x32x8xf32>
    %49 = vector.shape_cast %48 : vector<1x1x32x8xf32> to vector<32x8xf32>
    %cst_51 = arith.constant dense<0.000000e+00> : vector<16x8xf32>
    %50 = tpu.matmul %0, %49, %cst_51 {dimension_numbers = #tpu.dot_dimension_numbers<[1], [0], [0], [1], [0, 0, 1, 1], [], []>} : vector<16x32xf32>, vector<32x8xf32>, vector<16x8xf32> -> vector<16x8xf32>
    %c0_52 = arith.constant 0 : index
    %c1_53 = arith.constant 1 : index
    %c0_54 = arith.constant 0 : index
    %c0_55 = arith.constant 0 : index
    %51 = vector.load %arg5[%c0_52, %c1_53, %c0_54, %c0_55] : memref<2x4x1x8xf32, #tpu.memory_space<vmem>>, vector<1x1x1x8xf32>
    %52 = vector.shape_cast %51 : vector<1x1x1x8xf32> to vector<1x8xf32>
    %53 = vector.broadcast %52 : vector<1x8xf32> to vector<16x8xf32>
    %54 = arith.addf %50, %53 : vector<16x8xf32>
    %c0_56 = arith.constant 0 : index
    %c1_57 = arith.constant 1 : index
    %c0_58 = arith.constant 0 : index
    %c0_59 = arith.constant 0 : index
    %55 = vector.load %arg6[%c0_56, %c1_57, %c0_58, %c0_59] : memref<2x4x32x8xf32, #tpu.memory_space<vmem>>, vector<1x1x32x8xf32>
    %56 = vector.shape_cast %55 : vector<1x1x32x8xf32> to vector<32x8xf32>
    %cst_60 = arith.constant dense<0.000000e+00> : vector<16x8xf32>
    %57 = tpu.matmul %0, %56, %cst_60 {dimension_numbers = #tpu.dot_dimension_numbers<[1], [0], [0], [1], [0, 0, 1, 1], [], []>} : vector<16x32xf32>, vector<32x8xf32>, vector<16x8xf32> -> vector<16x8xf32>
    %c0_61 = arith.constant 0 : index
    %c1_62 = arith.constant 1 : index
    %c0_63 = arith.constant 0 : index
    %c0_64 = arith.constant 0 : index
    %58 = vector.load %arg7[%c0_61, %c1_62, %c0_63, %c0_64] : memref<2x4x1x8xf32, #tpu.memory_space<vmem>>, vector<1x1x1x8xf32>
    %59 = vector.shape_cast %58 : vector<1x1x1x8xf32> to vector<1x8xf32>
    %60 = vector.broadcast %59 : vector<1x8xf32> to vector<16x8xf32>
    %61 = arith.addf %57, %60 : vector<16x8xf32>
    %cst_65 = arith.constant 0.353553385 : f32
    %62 = vector.broadcast %cst_65 : f32 to vector<16x8xf32>
    %63 = arith.mulf %47, %62 : vector<16x8xf32>
    %cst_66 = arith.constant dense<0.000000e+00> : vector<16x16xf32>
    %64 = tpu.matmul %63, %54, %cst_66 {dimension_numbers = #tpu.dot_dimension_numbers<[1], [1], [0], [0], [0, 0, 1, 0], [], []>} : vector<16x8xf32>, vector<16x8xf32>, vector<16x16xf32> -> vector<16x16xf32>
    %65 = arith.addf %64, %1 : vector<16x16xf32>
    %cst_67 = arith.constant dense<0xFF800000> : vector<16xf32>
    %66 = vector.multi_reduction <maximumf>, %65, %cst_67 [1] : vector<16x16xf32> to vector<16xf32>
    %67 = vector.shape_cast %66 : vector<16xf32> to vector<16x1xf32>
    %68 = vector.broadcast %67 : vector<16x1xf32> to vector<16x16xf32>
    %69 = arith.subf %65, %68 : vector<16x16xf32>
    %70 = math.exp %69 : vector<16x16xf32>
    %cst_68 = arith.constant dense<0.000000e+00> : vector<16xf32>
    %71 = vector.multi_reduction <add>, %70, %cst_68 [1] : vector<16x16xf32> to vector<16xf32>
    %72 = vector.shape_cast %71 : vector<16xf32> to vector<16x1xf32>
    %73 = tpu.reciprocal %72 {approx = true} : vector<16x1xf32> -> vector<16x1xf32>
    %74 = vector.broadcast %73 : vector<16x1xf32> to vector<16x16xf32>
    %75 = arith.mulf %70, %74 : vector<16x16xf32>
    %cst_69 = arith.constant dense<0.000000e+00> : vector<16x8xf32>
    %76 = tpu.matmul %75, %61, %cst_69 {dimension_numbers = #tpu.dot_dimension_numbers<[1], [0], [0], [1], [0, 0, 1, 1], [], []>} : vector<16x16xf32>, vector<16x8xf32>, vector<16x8xf32> -> vector<16x8xf32>
    %c0_70 = arith.constant 0 : index
    %c1_71 = arith.constant 1 : index
    %c0_72 = arith.constant 0 : index
    %c0_73 = arith.constant 0 : index
    %77 = vector.load %arg8[%c0_70, %c1_71, %c0_72, %c0_73] : memref<2x4x8x32xf32, #tpu.memory_space<vmem>>, vector<1x1x8x32xf32>
    %78 = vector.shape_cast %77 : vector<1x1x8x32xf32> to vector<8x32xf32>
    %cst_74 = arith.constant dense<0.000000e+00> : vector<16x32xf32>
    %79 = tpu.matmul %76, %78, %cst_74 {dimension_numbers = #tpu.dot_dimension_numbers<[1], [0], [0], [1], [0, 0, 1, 1], [], []>} : vector<16x8xf32>, vector<8x32xf32>, vector<16x32xf32> -> vector<16x32xf32>
    %80 = arith.addf %40, %79 : vector<16x32xf32>
    %c0_75 = arith.constant 0 : index
    %c2 = arith.constant 2 : index
    %c0_76 = arith.constant 0 : index
    %c0_77 = arith.constant 0 : index
    %81 = vector.load %arg2[%c0_75, %c2, %c0_76, %c0_77] : memref<2x4x32x8xf32, #tpu.memory_space<vmem>>, vector<1x1x32x8xf32>
    %82 = vector.shape_cast %81 : vector<1x1x32x8xf32> to vector<32x8xf32>
    %cst_78 = arith.constant dense<0.000000e+00> : vector<16x8xf32>
    %83 = tpu.matmul %0, %82, %cst_78 {dimension_numbers = #tpu.dot_dimension_numbers<[1], [0], [0], [1], [0, 0, 1, 1], [], []>} : vector<16x32xf32>, vector<32x8xf32>, vector<16x8xf32> -> vector<16x8xf32>
    %c0_79 = arith.constant 0 : index
    %c2_80 = arith.constant 2 : index
    %c0_81 = arith.constant 0 : index
    %c0_82 = arith.constant 0 : index
    %84 = vector.load %arg3[%c0_79, %c2_80, %c0_81, %c0_82] : memref<2x4x1x8xf32, #tpu.memory_space<vmem>>, vector<1x1x1x8xf32>
    %85 = vector.shape_cast %84 : vector<1x1x1x8xf32> to vector<1x8xf32>
    %86 = vector.broadcast %85 : vector<1x8xf32> to vector<16x8xf32>
    %87 = arith.addf %83, %86 : vector<16x8xf32>
    %c0_83 = arith.constant 0 : index
    %c2_84 = arith.constant 2 : index
    %c0_85 = arith.constant 0 : index
    %c0_86 = arith.constant 0 : index
    %88 = vector.load %arg4[%c0_83, %c2_84, %c0_85, %c0_86] : memref<2x4x32x8xf32, #tpu.memory_space<vmem>>, vector<1x1x32x8xf32>
    %89 = vector.shape_cast %88 : vector<1x1x32x8xf32> to vector<32x8xf32>
    %cst_87 = arith.constant dense<0.000000e+00> : vector<16x8xf32>
    %90 = tpu.matmul %0, %89, %cst_87 {dimension_numbers = #tpu.dot_dimension_numbers<[1], [0], [0], [1], [0, 0, 1, 1], [], []>} : vector<16x32xf32>, vector<32x8xf32>, vector<16x8xf32> -> vector<16x8xf32>
    %c0_88 = arith.constant 0 : index
    %c2_89 = arith.constant 2 : index
    %c0_90 = arith.constant 0 : index
    %c0_91 = arith.constant 0 : index
    %91 = vector.load %arg5[%c0_88, %c2_89, %c0_90, %c0_91] : memref<2x4x1x8xf32, #tpu.memory_space<vmem>>, vector<1x1x1x8xf32>
    %92 = vector.shape_cast %91 : vector<1x1x1x8xf32> to vector<1x8xf32>
    %93 = vector.broadcast %92 : vector<1x8xf32> to vector<16x8xf32>
    %94 = arith.addf %90, %93 : vector<16x8xf32>
    %c0_92 = arith.constant 0 : index
    %c2_93 = arith.constant 2 : index
    %c0_94 = arith.constant 0 : index
    %c0_95 = arith.constant 0 : index
    %95 = vector.load %arg6[%c0_92, %c2_93, %c0_94, %c0_95] : memref<2x4x32x8xf32, #tpu.memory_space<vmem>>, vector<1x1x32x8xf32>
    %96 = vector.shape_cast %95 : vector<1x1x32x8xf32> to vector<32x8xf32>
    %cst_96 = arith.constant dense<0.000000e+00> : vector<16x8xf32>
    %97 = tpu.matmul %0, %96, %cst_96 {dimension_numbers = #tpu.dot_dimension_numbers<[1], [0], [0], [1], [0, 0, 1, 1], [], []>} : vector<16x32xf32>, vector<32x8xf32>, vector<16x8xf32> -> vector<16x8xf32>
    %c0_97 = arith.constant 0 : index
    %c2_98 = arith.constant 2 : index
    %c0_99 = arith.constant 0 : index
    %c0_100 = arith.constant 0 : index
    %98 = vector.load %arg7[%c0_97, %c2_98, %c0_99, %c0_100] : memref<2x4x1x8xf32, #tpu.memory_space<vmem>>, vector<1x1x1x8xf32>
    %99 = vector.shape_cast %98 : vector<1x1x1x8xf32> to vector<1x8xf32>
    %100 = vector.broadcast %99 : vector<1x8xf32> to vector<16x8xf32>
    %101 = arith.addf %97, %100 : vector<16x8xf32>
    %cst_101 = arith.constant 0.353553385 : f32
    %102 = vector.broadcast %cst_101 : f32 to vector<16x8xf32>
    %103 = arith.mulf %87, %102 : vector<16x8xf32>
    %cst_102 = arith.constant dense<0.000000e+00> : vector<16x16xf32>
    %104 = tpu.matmul %103, %94, %cst_102 {dimension_numbers = #tpu.dot_dimension_numbers<[1], [1], [0], [0], [0, 0, 1, 0], [], []>} : vector<16x8xf32>, vector<16x8xf32>, vector<16x16xf32> -> vector<16x16xf32>
    %105 = arith.addf %104, %1 : vector<16x16xf32>
    %cst_103 = arith.constant dense<0xFF800000> : vector<16xf32>
    %106 = vector.multi_reduction <maximumf>, %105, %cst_103 [1] : vector<16x16xf32> to vector<16xf32>
    %107 = vector.shape_cast %106 : vector<16xf32> to vector<16x1xf32>
    %108 = vector.broadcast %107 : vector<16x1xf32> to vector<16x16xf32>
    %109 = arith.subf %105, %108 : vector<16x16xf32>
    %110 = math.exp %109 : vector<16x16xf32>
    %cst_104 = arith.constant dense<0.000000e+00> : vector<16xf32>
    %111 = vector.multi_reduction <add>, %110, %cst_104 [1] : vector<16x16xf32> to vector<16xf32>
    %112 = vector.shape_cast %111 : vector<16xf32> to vector<16x1xf32>
    %113 = tpu.reciprocal %112 {approx = true} : vector<16x1xf32> -> vector<16x1xf32>
    %114 = vector.broadcast %113 : vector<16x1xf32> to vector<16x16xf32>
    %115 = arith.mulf %110, %114 : vector<16x16xf32>
    %cst_105 = arith.constant dense<0.000000e+00> : vector<16x8xf32>
    %116 = tpu.matmul %115, %101, %cst_105 {dimension_numbers = #tpu.dot_dimension_numbers<[1], [0], [0], [1], [0, 0, 1, 1], [], []>} : vector<16x16xf32>, vector<16x8xf32>, vector<16x8xf32> -> vector<16x8xf32>
    %c0_106 = arith.constant 0 : index
    %c2_107 = arith.constant 2 : index
    %c0_108 = arith.constant 0 : index
    %c0_109 = arith.constant 0 : index
    %117 = vector.load %arg8[%c0_106, %c2_107, %c0_108, %c0_109] : memref<2x4x8x32xf32, #tpu.memory_space<vmem>>, vector<1x1x8x32xf32>
    %118 = vector.shape_cast %117 : vector<1x1x8x32xf32> to vector<8x32xf32>
    %cst_110 = arith.constant dense<0.000000e+00> : vector<16x32xf32>
    %119 = tpu.matmul %116, %118, %cst_110 {dimension_numbers = #tpu.dot_dimension_numbers<[1], [0], [0], [1], [0, 0, 1, 1], [], []>} : vector<16x8xf32>, vector<8x32xf32>, vector<16x32xf32> -> vector<16x32xf32>
    %120 = arith.addf %80, %119 : vector<16x32xf32>
    %c0_111 = arith.constant 0 : index
    %c3 = arith.constant 3 : index
    %c0_112 = arith.constant 0 : index
    %c0_113 = arith.constant 0 : index
    %121 = vector.load %arg2[%c0_111, %c3, %c0_112, %c0_113] : memref<2x4x32x8xf32, #tpu.memory_space<vmem>>, vector<1x1x32x8xf32>
    %122 = vector.shape_cast %121 : vector<1x1x32x8xf32> to vector<32x8xf32>
    %cst_114 = arith.constant dense<0.000000e+00> : vector<16x8xf32>
    %123 = tpu.matmul %0, %122, %cst_114 {dimension_numbers = #tpu.dot_dimension_numbers<[1], [0], [0], [1], [0, 0, 1, 1], [], []>} : vector<16x32xf32>, vector<32x8xf32>, vector<16x8xf32> -> vector<16x8xf32>
    %c0_115 = arith.constant 0 : index
    %c3_116 = arith.constant 3 : index
    %c0_117 = arith.constant 0 : index
    %c0_118 = arith.constant 0 : index
    %124 = vector.load %arg3[%c0_115, %c3_116, %c0_117, %c0_118] : memref<2x4x1x8xf32, #tpu.memory_space<vmem>>, vector<1x1x1x8xf32>
    %125 = vector.shape_cast %124 : vector<1x1x1x8xf32> to vector<1x8xf32>
    %126 = vector.broadcast %125 : vector<1x8xf32> to vector<16x8xf32>
    %127 = arith.addf %123, %126 : vector<16x8xf32>
    %c0_119 = arith.constant 0 : index
    %c3_120 = arith.constant 3 : index
    %c0_121 = arith.constant 0 : index
    %c0_122 = arith.constant 0 : index
    %128 = vector.load %arg4[%c0_119, %c3_120, %c0_121, %c0_122] : memref<2x4x32x8xf32, #tpu.memory_space<vmem>>, vector<1x1x32x8xf32>
    %129 = vector.shape_cast %128 : vector<1x1x32x8xf32> to vector<32x8xf32>
    %cst_123 = arith.constant dense<0.000000e+00> : vector<16x8xf32>
    %130 = tpu.matmul %0, %129, %cst_123 {dimension_numbers = #tpu.dot_dimension_numbers<[1], [0], [0], [1], [0, 0, 1, 1], [], []>} : vector<16x32xf32>, vector<32x8xf32>, vector<16x8xf32> -> vector<16x8xf32>
    %c0_124 = arith.constant 0 : index
    %c3_125 = arith.constant 3 : index
    %c0_126 = arith.constant 0 : index
    %c0_127 = arith.constant 0 : index
    %131 = vector.load %arg5[%c0_124, %c3_125, %c0_126, %c0_127] : memref<2x4x1x8xf32, #tpu.memory_space<vmem>>, vector<1x1x1x8xf32>
    %132 = vector.shape_cast %131 : vector<1x1x1x8xf32> to vector<1x8xf32>
    %133 = vector.broadcast %132 : vector<1x8xf32> to vector<16x8xf32>
    %134 = arith.addf %130, %133 : vector<16x8xf32>
    %c0_128 = arith.constant 0 : index
    %c3_129 = arith.constant 3 : index
    %c0_130 = arith.constant 0 : index
    %c0_131 = arith.constant 0 : index
    %135 = vector.load %arg6[%c0_128, %c3_129, %c0_130, %c0_131] : memref<2x4x32x8xf32, #tpu.memory_space<vmem>>, vector<1x1x32x8xf32>
    %136 = vector.shape_cast %135 : vector<1x1x32x8xf32> to vector<32x8xf32>
    %cst_132 = arith.constant dense<0.000000e+00> : vector<16x8xf32>
    %137 = tpu.matmul %0, %136, %cst_132 {dimension_numbers = #tpu.dot_dimension_numbers<[1], [0], [0], [1], [0, 0, 1, 1], [], []>} : vector<16x32xf32>, vector<32x8xf32>, vector<16x8xf32> -> vector<16x8xf32>
    %c0_133 = arith.constant 0 : index
    %c3_134 = arith.constant 3 : index
    %c0_135 = arith.constant 0 : index
    %c0_136 = arith.constant 0 : index
    %138 = vector.load %arg7[%c0_133, %c3_134, %c0_135, %c0_136] : memref<2x4x1x8xf32, #tpu.memory_space<vmem>>, vector<1x1x1x8xf32>
    %139 = vector.shape_cast %138 : vector<1x1x1x8xf32> to vector<1x8xf32>
    %140 = vector.broadcast %139 : vector<1x8xf32> to vector<16x8xf32>
    %141 = arith.addf %137, %140 : vector<16x8xf32>
    %cst_137 = arith.constant 0.353553385 : f32
    %142 = vector.broadcast %cst_137 : f32 to vector<16x8xf32>
    %143 = arith.mulf %127, %142 : vector<16x8xf32>
    %cst_138 = arith.constant dense<0.000000e+00> : vector<16x16xf32>
    %144 = tpu.matmul %143, %134, %cst_138 {dimension_numbers = #tpu.dot_dimension_numbers<[1], [1], [0], [0], [0, 0, 1, 0], [], []>} : vector<16x8xf32>, vector<16x8xf32>, vector<16x16xf32> -> vector<16x16xf32>
    %145 = arith.addf %144, %1 : vector<16x16xf32>
    %cst_139 = arith.constant dense<0xFF800000> : vector<16xf32>
    %146 = vector.multi_reduction <maximumf>, %145, %cst_139 [1] : vector<16x16xf32> to vector<16xf32>
    %147 = vector.shape_cast %146 : vector<16xf32> to vector<16x1xf32>
    %148 = vector.broadcast %147 : vector<16x1xf32> to vector<16x16xf32>
    %149 = arith.subf %145, %148 : vector<16x16xf32>
    %150 = math.exp %149 : vector<16x16xf32>
    %cst_140 = arith.constant dense<0.000000e+00> : vector<16xf32>
    %151 = vector.multi_reduction <add>, %150, %cst_140 [1] : vector<16x16xf32> to vector<16xf32>
    %152 = vector.shape_cast %151 : vector<16xf32> to vector<16x1xf32>
    %153 = tpu.reciprocal %152 {approx = true} : vector<16x1xf32> -> vector<16x1xf32>
    %154 = vector.broadcast %153 : vector<16x1xf32> to vector<16x16xf32>
    %155 = arith.mulf %150, %154 : vector<16x16xf32>
    %cst_141 = arith.constant dense<0.000000e+00> : vector<16x8xf32>
    %156 = tpu.matmul %155, %141, %cst_141 {dimension_numbers = #tpu.dot_dimension_numbers<[1], [0], [0], [1], [0, 0, 1, 1], [], []>} : vector<16x16xf32>, vector<16x8xf32>, vector<16x8xf32> -> vector<16x8xf32>
    %c0_142 = arith.constant 0 : index
    %c3_143 = arith.constant 3 : index
    %c0_144 = arith.constant 0 : index
    %c0_145 = arith.constant 0 : index
    %157 = vector.load %arg8[%c0_142, %c3_143, %c0_144, %c0_145] : memref<2x4x8x32xf32, #tpu.memory_space<vmem>>, vector<1x1x8x32xf32>
    %158 = vector.shape_cast %157 : vector<1x1x8x32xf32> to vector<8x32xf32>
    %cst_146 = arith.constant dense<0.000000e+00> : vector<16x32xf32>
    %159 = tpu.matmul %156, %158, %cst_146 {dimension_numbers = #tpu.dot_dimension_numbers<[1], [0], [0], [1], [0, 0, 1, 1], [], []>} : vector<16x8xf32>, vector<8x32xf32>, vector<16x32xf32> -> vector<16x32xf32>
    %160 = arith.addf %120, %159 : vector<16x32xf32>
    %c0_147 = arith.constant 0 : index
    %c0_148 = arith.constant 0 : index
    %c0_149 = arith.constant 0 : index
    %161 = vector.load %arg9[%c0_147, %c0_148, %c0_149] : memref<2x1x32xf32, #tpu.memory_space<vmem>>, vector<1x1x32xf32>
    %162 = vector.shape_cast %161 : vector<1x1x32xf32> to vector<1x32xf32>
    %163 = vector.broadcast %162 : vector<1x32xf32> to vector<16x32xf32>
    %164 = arith.addf %160, %163 : vector<16x32xf32>
    %165 = arith.addf %0, %164 : vector<16x32xf32>
    %c0_150 = arith.constant 0 : index
    %c0_151 = arith.constant 0 : index
    %c0_152 = arith.constant 0 : index
    %166 = vector.load %arg10[%c0_150, %c0_151, %c0_152] : memref<2x1x32xf32, #tpu.memory_space<vmem>>, vector<1x1x32xf32>
    %167 = vector.shape_cast %166 : vector<1x1x32xf32> to vector<1x32xf32>
    %c0_153 = arith.constant 0 : index
    %c0_154 = arith.constant 0 : index
    %c0_155 = arith.constant 0 : index
    %168 = vector.load %arg11[%c0_153, %c0_154, %c0_155] : memref<2x1x32xf32, #tpu.memory_space<vmem>>, vector<1x1x32xf32>
    %169 = vector.shape_cast %168 : vector<1x1x32xf32> to vector<1x32xf32>
    %cst_156 = arith.constant dense<0.000000e+00> : vector<16xf32>
    %170 = vector.multi_reduction <add>, %165, %cst_156 [1] : vector<16x32xf32> to vector<16xf32>
    %171 = vector.shape_cast %170 : vector<16xf32> to vector<16x1xf32>
    %cst_157 = arith.constant 3.200000e+01 : f32
    %172 = vector.broadcast %cst_157 : f32 to vector<16x1xf32>
    %173 = arith.divf %171, %172 : vector<16x1xf32>
    %174 = vector.broadcast %173 : vector<16x1xf32> to vector<16x32xf32>
    %175 = arith.subf %165, %174 : vector<16x32xf32>
    %176 = arith.mulf %175, %175 : vector<16x32xf32>
    %cst_158 = arith.constant dense<0.000000e+00> : vector<16xf32>
    %177 = vector.multi_reduction <add>, %176, %cst_158 [1] : vector<16x32xf32> to vector<16xf32>
    %178 = vector.shape_cast %177 : vector<16xf32> to vector<16x1xf32>
    %cst_159 = arith.constant 3.200000e+01 : f32
    %179 = vector.broadcast %cst_159 : f32 to vector<16x1xf32>
    %180 = arith.divf %178, %179 : vector<16x1xf32>
    %181 = vector.broadcast %173 : vector<16x1xf32> to vector<16x32xf32>
    %182 = arith.subf %165, %181 : vector<16x32xf32>
    %cst_160 = arith.constant 9.99999974E-6 : f32
    %183 = vector.broadcast %cst_160 : f32 to vector<16x1xf32>
    %184 = arith.addf %180, %183 : vector<16x1xf32>
    %185 = math.rsqrt %184 : vector<16x1xf32>
    %186 = vector.broadcast %185 : vector<16x1xf32> to vector<16x32xf32>
    %187 = arith.mulf %182, %186 : vector<16x32xf32>
    %188 = vector.broadcast %167 : vector<1x32xf32> to vector<16x32xf32>
    %189 = arith.mulf %187, %188 : vector<16x32xf32>
    %190 = vector.broadcast %169 : vector<1x32xf32> to vector<16x32xf32>
    %191 = arith.addf %189, %190 : vector<16x32xf32>
    %c0_161 = arith.constant 0 : index
    %c0_162 = arith.constant 0 : index
    %c0_163 = arith.constant 0 : index
    %192 = vector.load %arg12[%c0_161, %c0_162, %c0_163] : memref<2x32x64xf32, #tpu.memory_space<vmem>>, vector<1x32x64xf32>
    %193 = vector.shape_cast %192 : vector<1x32x64xf32> to vector<32x64xf32>
    %cst_164 = arith.constant dense<0.000000e+00> : vector<16x64xf32>
    %194 = tpu.matmul %191, %193, %cst_164 {dimension_numbers = #tpu.dot_dimension_numbers<[1], [0], [0], [1], [0, 0, 1, 1], [], []>} : vector<16x32xf32>, vector<32x64xf32>, vector<16x64xf32> -> vector<16x64xf32>
    %c0_165 = arith.constant 0 : index
    %c0_166 = arith.constant 0 : index
    %c0_167 = arith.constant 0 : index
    %195 = vector.load %arg13[%c0_165, %c0_166, %c0_167] : memref<2x1x64xf32, #tpu.memory_space<vmem>>, vector<1x1x64xf32>
    %196 = vector.shape_cast %195 : vector<1x1x64xf32> to vector<1x64xf32>
    %197 = vector.broadcast %196 : vector<1x64xf32> to vector<16x64xf32>
    %198 = arith.addf %194, %197 : vector<16x64xf32>
    %cst_168 = arith.constant 0.000000e+00 : f32
    %199 = vector.broadcast %cst_168 : f32 to vector<16x64xf32>
    %200 = arith.maximumf %198, %199 : vector<16x64xf32>
    %c0_169 = arith.constant 0 : index
    %c0_170 = arith.constant 0 : index
    %c0_171 = arith.constant 0 : index
    %201 = vector.load %arg14[%c0_169, %c0_170, %c0_171] : memref<2x64x32xf32, #tpu.memory_space<vmem>>, vector<1x64x32xf32>
    %202 = vector.shape_cast %201 : vector<1x64x32xf32> to vector<64x32xf32>
    %cst_172 = arith.constant dense<0.000000e+00> : vector<16x32xf32>
    %203 = tpu.matmul %200, %202, %cst_172 {dimension_numbers = #tpu.dot_dimension_numbers<[1], [0], [0], [1], [0, 0, 1, 1], [], []>} : vector<16x64xf32>, vector<64x32xf32>, vector<16x32xf32> -> vector<16x32xf32>
    %c0_173 = arith.constant 0 : index
    %c0_174 = arith.constant 0 : index
    %c0_175 = arith.constant 0 : index
    %204 = vector.load %arg15[%c0_173, %c0_174, %c0_175] : memref<2x1x32xf32, #tpu.memory_space<vmem>>, vector<1x1x32xf32>
    %205 = vector.shape_cast %204 : vector<1x1x32xf32> to vector<1x32xf32>
    %206 = vector.broadcast %205 : vector<1x32xf32> to vector<16x32xf32>
    %207 = arith.addf %203, %206 : vector<16x32xf32>
    %208 = arith.addf %191, %207 : vector<16x32xf32>
    %c0_176 = arith.constant 0 : index
    %c0_177 = arith.constant 0 : index
    %c0_178 = arith.constant 0 : index
    %209 = vector.load %arg16[%c0_176, %c0_177, %c0_178] : memref<2x1x32xf32, #tpu.memory_space<vmem>>, vector<1x1x32xf32>
    %210 = vector.shape_cast %209 : vector<1x1x32xf32> to vector<1x32xf32>
    %c0_179 = arith.constant 0 : index
    %c0_180 = arith.constant 0 : index
    %c0_181 = arith.constant 0 : index
    %211 = vector.load %arg17[%c0_179, %c0_180, %c0_181] : memref<2x1x32xf32, #tpu.memory_space<vmem>>, vector<1x1x32xf32>
    %212 = vector.shape_cast %211 : vector<1x1x32xf32> to vector<1x32xf32>
    %cst_182 = arith.constant dense<0.000000e+00> : vector<16xf32>
    %213 = vector.multi_reduction <add>, %208, %cst_182 [1] : vector<16x32xf32> to vector<16xf32>
    %214 = vector.shape_cast %213 : vector<16xf32> to vector<16x1xf32>
    %cst_183 = arith.constant 3.200000e+01 : f32
    %215 = vector.broadcast %cst_183 : f32 to vector<16x1xf32>
    %216 = arith.divf %214, %215 : vector<16x1xf32>
    %217 = vector.broadcast %216 : vector<16x1xf32> to vector<16x32xf32>
    %218 = arith.subf %208, %217 : vector<16x32xf32>
    %219 = arith.mulf %218, %218 : vector<16x32xf32>
    %cst_184 = arith.constant dense<0.000000e+00> : vector<16xf32>
    %220 = vector.multi_reduction <add>, %219, %cst_184 [1] : vector<16x32xf32> to vector<16xf32>
    %221 = vector.shape_cast %220 : vector<16xf32> to vector<16x1xf32>
    %cst_185 = arith.constant 3.200000e+01 : f32
    %222 = vector.broadcast %cst_185 : f32 to vector<16x1xf32>
    %223 = arith.divf %221, %222 : vector<16x1xf32>
    %224 = vector.broadcast %216 : vector<16x1xf32> to vector<16x32xf32>
    %225 = arith.subf %208, %224 : vector<16x32xf32>
    %cst_186 = arith.constant 9.99999974E-6 : f32
    %226 = vector.broadcast %cst_186 : f32 to vector<16x1xf32>
    %227 = arith.addf %223, %226 : vector<16x1xf32>
    %228 = math.rsqrt %227 : vector<16x1xf32>
    %229 = vector.broadcast %228 : vector<16x1xf32> to vector<16x32xf32>
    %230 = arith.mulf %225, %229 : vector<16x32xf32>
    %231 = vector.broadcast %210 : vector<1x32xf32> to vector<16x32xf32>
    %232 = arith.mulf %230, %231 : vector<16x32xf32>
    %233 = vector.broadcast %212 : vector<1x32xf32> to vector<16x32xf32>
    %234 = arith.addf %232, %233 : vector<16x32xf32>
    %c1_187 = arith.constant 1 : index
    %c0_188 = arith.constant 0 : index
    %c0_189 = arith.constant 0 : index
    %c0_190 = arith.constant 0 : index
    %235 = vector.load %arg2[%c1_187, %c0_188, %c0_189, %c0_190] : memref<2x4x32x8xf32, #tpu.memory_space<vmem>>, vector<1x1x32x8xf32>
    %236 = vector.shape_cast %235 : vector<1x1x32x8xf32> to vector<32x8xf32>
    %cst_191 = arith.constant dense<0.000000e+00> : vector<16x8xf32>
    %237 = tpu.matmul %234, %236, %cst_191 {dimension_numbers = #tpu.dot_dimension_numbers<[1], [0], [0], [1], [0, 0, 1, 1], [], []>} : vector<16x32xf32>, vector<32x8xf32>, vector<16x8xf32> -> vector<16x8xf32>
    %c1_192 = arith.constant 1 : index
    %c0_193 = arith.constant 0 : index
    %c0_194 = arith.constant 0 : index
    %c0_195 = arith.constant 0 : index
    %238 = vector.load %arg3[%c1_192, %c0_193, %c0_194, %c0_195] : memref<2x4x1x8xf32, #tpu.memory_space<vmem>>, vector<1x1x1x8xf32>
    %239 = vector.shape_cast %238 : vector<1x1x1x8xf32> to vector<1x8xf32>
    %240 = vector.broadcast %239 : vector<1x8xf32> to vector<16x8xf32>
    %241 = arith.addf %237, %240 : vector<16x8xf32>
    %c1_196 = arith.constant 1 : index
    %c0_197 = arith.constant 0 : index
    %c0_198 = arith.constant 0 : index
    %c0_199 = arith.constant 0 : index
    %242 = vector.load %arg4[%c1_196, %c0_197, %c0_198, %c0_199] : memref<2x4x32x8xf32, #tpu.memory_space<vmem>>, vector<1x1x32x8xf32>
    %243 = vector.shape_cast %242 : vector<1x1x32x8xf32> to vector<32x8xf32>
    %cst_200 = arith.constant dense<0.000000e+00> : vector<16x8xf32>
    %244 = tpu.matmul %234, %243, %cst_200 {dimension_numbers = #tpu.dot_dimension_numbers<[1], [0], [0], [1], [0, 0, 1, 1], [], []>} : vector<16x32xf32>, vector<32x8xf32>, vector<16x8xf32> -> vector<16x8xf32>
    %c1_201 = arith.constant 1 : index
    %c0_202 = arith.constant 0 : index
    %c0_203 = arith.constant 0 : index
    %c0_204 = arith.constant 0 : index
    %245 = vector.load %arg5[%c1_201, %c0_202, %c0_203, %c0_204] : memref<2x4x1x8xf32, #tpu.memory_space<vmem>>, vector<1x1x1x8xf32>
    %246 = vector.shape_cast %245 : vector<1x1x1x8xf32> to vector<1x8xf32>
    %247 = vector.broadcast %246 : vector<1x8xf32> to vector<16x8xf32>
    %248 = arith.addf %244, %247 : vector<16x8xf32>
    %c1_205 = arith.constant 1 : index
    %c0_206 = arith.constant 0 : index
    %c0_207 = arith.constant 0 : index
    %c0_208 = arith.constant 0 : index
    %249 = vector.load %arg6[%c1_205, %c0_206, %c0_207, %c0_208] : memref<2x4x32x8xf32, #tpu.memory_space<vmem>>, vector<1x1x32x8xf32>
    %250 = vector.shape_cast %249 : vector<1x1x32x8xf32> to vector<32x8xf32>
    %cst_209 = arith.constant dense<0.000000e+00> : vector<16x8xf32>
    %251 = tpu.matmul %234, %250, %cst_209 {dimension_numbers = #tpu.dot_dimension_numbers<[1], [0], [0], [1], [0, 0, 1, 1], [], []>} : vector<16x32xf32>, vector<32x8xf32>, vector<16x8xf32> -> vector<16x8xf32>
    %c1_210 = arith.constant 1 : index
    %c0_211 = arith.constant 0 : index
    %c0_212 = arith.constant 0 : index
    %c0_213 = arith.constant 0 : index
    %252 = vector.load %arg7[%c1_210, %c0_211, %c0_212, %c0_213] : memref<2x4x1x8xf32, #tpu.memory_space<vmem>>, vector<1x1x1x8xf32>
    %253 = vector.shape_cast %252 : vector<1x1x1x8xf32> to vector<1x8xf32>
    %254 = vector.broadcast %253 : vector<1x8xf32> to vector<16x8xf32>
    %255 = arith.addf %251, %254 : vector<16x8xf32>
    %cst_214 = arith.constant 0.353553385 : f32
    %256 = vector.broadcast %cst_214 : f32 to vector<16x8xf32>
    %257 = arith.mulf %241, %256 : vector<16x8xf32>
    %cst_215 = arith.constant dense<0.000000e+00> : vector<16x16xf32>
    %258 = tpu.matmul %257, %248, %cst_215 {dimension_numbers = #tpu.dot_dimension_numbers<[1], [1], [0], [0], [0, 0, 1, 0], [], []>} : vector<16x8xf32>, vector<16x8xf32>, vector<16x16xf32> -> vector<16x16xf32>
    %259 = arith.addf %258, %1 : vector<16x16xf32>
    %cst_216 = arith.constant dense<0xFF800000> : vector<16xf32>
    %260 = vector.multi_reduction <maximumf>, %259, %cst_216 [1] : vector<16x16xf32> to vector<16xf32>
    %261 = vector.shape_cast %260 : vector<16xf32> to vector<16x1xf32>
    %262 = vector.broadcast %261 : vector<16x1xf32> to vector<16x16xf32>
    %263 = arith.subf %259, %262 : vector<16x16xf32>
    %264 = math.exp %263 : vector<16x16xf32>
    %cst_217 = arith.constant dense<0.000000e+00> : vector<16xf32>
    %265 = vector.multi_reduction <add>, %264, %cst_217 [1] : vector<16x16xf32> to vector<16xf32>
    %266 = vector.shape_cast %265 : vector<16xf32> to vector<16x1xf32>
    %267 = tpu.reciprocal %266 {approx = true} : vector<16x1xf32> -> vector<16x1xf32>
    %268 = vector.broadcast %267 : vector<16x1xf32> to vector<16x16xf32>
    %269 = arith.mulf %264, %268 : vector<16x16xf32>
    %cst_218 = arith.constant dense<0.000000e+00> : vector<16x8xf32>
    %270 = tpu.matmul %269, %255, %cst_218 {dimension_numbers = #tpu.dot_dimension_numbers<[1], [0], [0], [1], [0, 0, 1, 1], [], []>} : vector<16x16xf32>, vector<16x8xf32>, vector<16x8xf32> -> vector<16x8xf32>
    %c1_219 = arith.constant 1 : index
    %c0_220 = arith.constant 0 : index
    %c0_221 = arith.constant 0 : index
    %c0_222 = arith.constant 0 : index
    %271 = vector.load %arg8[%c1_219, %c0_220, %c0_221, %c0_222] : memref<2x4x8x32xf32, #tpu.memory_space<vmem>>, vector<1x1x8x32xf32>
    %272 = vector.shape_cast %271 : vector<1x1x8x32xf32> to vector<8x32xf32>
    %cst_223 = arith.constant dense<0.000000e+00> : vector<16x32xf32>
    %273 = tpu.matmul %270, %272, %cst_223 {dimension_numbers = #tpu.dot_dimension_numbers<[1], [0], [0], [1], [0, 0, 1, 1], [], []>} : vector<16x8xf32>, vector<8x32xf32>, vector<16x32xf32> -> vector<16x32xf32>
    %c1_224 = arith.constant 1 : index
    %c1_225 = arith.constant 1 : index
    %c0_226 = arith.constant 0 : index
    %c0_227 = arith.constant 0 : index
    %274 = vector.load %arg2[%c1_224, %c1_225, %c0_226, %c0_227] : memref<2x4x32x8xf32, #tpu.memory_space<vmem>>, vector<1x1x32x8xf32>
    %275 = vector.shape_cast %274 : vector<1x1x32x8xf32> to vector<32x8xf32>
    %cst_228 = arith.constant dense<0.000000e+00> : vector<16x8xf32>
    %276 = tpu.matmul %234, %275, %cst_228 {dimension_numbers = #tpu.dot_dimension_numbers<[1], [0], [0], [1], [0, 0, 1, 1], [], []>} : vector<16x32xf32>, vector<32x8xf32>, vector<16x8xf32> -> vector<16x8xf32>
    %c1_229 = arith.constant 1 : index
    %c1_230 = arith.constant 1 : index
    %c0_231 = arith.constant 0 : index
    %c0_232 = arith.constant 0 : index
    %277 = vector.load %arg3[%c1_229, %c1_230, %c0_231, %c0_232] : memref<2x4x1x8xf32, #tpu.memory_space<vmem>>, vector<1x1x1x8xf32>
    %278 = vector.shape_cast %277 : vector<1x1x1x8xf32> to vector<1x8xf32>
    %279 = vector.broadcast %278 : vector<1x8xf32> to vector<16x8xf32>
    %280 = arith.addf %276, %279 : vector<16x8xf32>
    %c1_233 = arith.constant 1 : index
    %c1_234 = arith.constant 1 : index
    %c0_235 = arith.constant 0 : index
    %c0_236 = arith.constant 0 : index
    %281 = vector.load %arg4[%c1_233, %c1_234, %c0_235, %c0_236] : memref<2x4x32x8xf32, #tpu.memory_space<vmem>>, vector<1x1x32x8xf32>
    %282 = vector.shape_cast %281 : vector<1x1x32x8xf32> to vector<32x8xf32>
    %cst_237 = arith.constant dense<0.000000e+00> : vector<16x8xf32>
    %283 = tpu.matmul %234, %282, %cst_237 {dimension_numbers = #tpu.dot_dimension_numbers<[1], [0], [0], [1], [0, 0, 1, 1], [], []>} : vector<16x32xf32>, vector<32x8xf32>, vector<16x8xf32> -> vector<16x8xf32>
    %c1_238 = arith.constant 1 : index
    %c1_239 = arith.constant 1 : index
    %c0_240 = arith.constant 0 : index
    %c0_241 = arith.constant 0 : index
    %284 = vector.load %arg5[%c1_238, %c1_239, %c0_240, %c0_241] : memref<2x4x1x8xf32, #tpu.memory_space<vmem>>, vector<1x1x1x8xf32>
    %285 = vector.shape_cast %284 : vector<1x1x1x8xf32> to vector<1x8xf32>
    %286 = vector.broadcast %285 : vector<1x8xf32> to vector<16x8xf32>
    %287 = arith.addf %283, %286 : vector<16x8xf32>
    %c1_242 = arith.constant 1 : index
    %c1_243 = arith.constant 1 : index
    %c0_244 = arith.constant 0 : index
    %c0_245 = arith.constant 0 : index
    %288 = vector.load %arg6[%c1_242, %c1_243, %c0_244, %c0_245] : memref<2x4x32x8xf32, #tpu.memory_space<vmem>>, vector<1x1x32x8xf32>
    %289 = vector.shape_cast %288 : vector<1x1x32x8xf32> to vector<32x8xf32>
    %cst_246 = arith.constant dense<0.000000e+00> : vector<16x8xf32>
    %290 = tpu.matmul %234, %289, %cst_246 {dimension_numbers = #tpu.dot_dimension_numbers<[1], [0], [0], [1], [0, 0, 1, 1], [], []>} : vector<16x32xf32>, vector<32x8xf32>, vector<16x8xf32> -> vector<16x8xf32>
    %c1_247 = arith.constant 1 : index
    %c1_248 = arith.constant 1 : index
    %c0_249 = arith.constant 0 : index
    %c0_250 = arith.constant 0 : index
    %291 = vector.load %arg7[%c1_247, %c1_248, %c0_249, %c0_250] : memref<2x4x1x8xf32, #tpu.memory_space<vmem>>, vector<1x1x1x8xf32>
    %292 = vector.shape_cast %291 : vector<1x1x1x8xf32> to vector<1x8xf32>
    %293 = vector.broadcast %292 : vector<1x8xf32> to vector<16x8xf32>
    %294 = arith.addf %290, %293 : vector<16x8xf32>
    %cst_251 = arith.constant 0.353553385 : f32
    %295 = vector.broadcast %cst_251 : f32 to vector<16x8xf32>
    %296 = arith.mulf %280, %295 : vector<16x8xf32>
    %cst_252 = arith.constant dense<0.000000e+00> : vector<16x16xf32>
    %297 = tpu.matmul %296, %287, %cst_252 {dimension_numbers = #tpu.dot_dimension_numbers<[1], [1], [0], [0], [0, 0, 1, 0], [], []>} : vector<16x8xf32>, vector<16x8xf32>, vector<16x16xf32> -> vector<16x16xf32>
    %298 = arith.addf %297, %1 : vector<16x16xf32>
    %cst_253 = arith.constant dense<0xFF800000> : vector<16xf32>
    %299 = vector.multi_reduction <maximumf>, %298, %cst_253 [1] : vector<16x16xf32> to vector<16xf32>
    %300 = vector.shape_cast %299 : vector<16xf32> to vector<16x1xf32>
    %301 = vector.broadcast %300 : vector<16x1xf32> to vector<16x16xf32>
    %302 = arith.subf %298, %301 : vector<16x16xf32>
    %303 = math.exp %302 : vector<16x16xf32>
    %cst_254 = arith.constant dense<0.000000e+00> : vector<16xf32>
    %304 = vector.multi_reduction <add>, %303, %cst_254 [1] : vector<16x16xf32> to vector<16xf32>
    %305 = vector.shape_cast %304 : vector<16xf32> to vector<16x1xf32>
    %306 = tpu.reciprocal %305 {approx = true} : vector<16x1xf32> -> vector<16x1xf32>
    %307 = vector.broadcast %306 : vector<16x1xf32> to vector<16x16xf32>
    %308 = arith.mulf %303, %307 : vector<16x16xf32>
    %cst_255 = arith.constant dense<0.000000e+00> : vector<16x8xf32>
    %309 = tpu.matmul %308, %294, %cst_255 {dimension_numbers = #tpu.dot_dimension_numbers<[1], [0], [0], [1], [0, 0, 1, 1], [], []>} : vector<16x16xf32>, vector<16x8xf32>, vector<16x8xf32> -> vector<16x8xf32>
    %c1_256 = arith.constant 1 : index
    %c1_257 = arith.constant 1 : index
    %c0_258 = arith.constant 0 : index
    %c0_259 = arith.constant 0 : index
    %310 = vector.load %arg8[%c1_256, %c1_257, %c0_258, %c0_259] : memref<2x4x8x32xf32, #tpu.memory_space<vmem>>, vector<1x1x8x32xf32>
    %311 = vector.shape_cast %310 : vector<1x1x8x32xf32> to vector<8x32xf32>
    %cst_260 = arith.constant dense<0.000000e+00> : vector<16x32xf32>
    %312 = tpu.matmul %309, %311, %cst_260 {dimension_numbers = #tpu.dot_dimension_numbers<[1], [0], [0], [1], [0, 0, 1, 1], [], []>} : vector<16x8xf32>, vector<8x32xf32>, vector<16x32xf32> -> vector<16x32xf32>
    %313 = arith.addf %273, %312 : vector<16x32xf32>
    %c1_261 = arith.constant 1 : index
    %c2_262 = arith.constant 2 : index
    %c0_263 = arith.constant 0 : index
    %c0_264 = arith.constant 0 : index
    %314 = vector.load %arg2[%c1_261, %c2_262, %c0_263, %c0_264] : memref<2x4x32x8xf32, #tpu.memory_space<vmem>>, vector<1x1x32x8xf32>
    %315 = vector.shape_cast %314 : vector<1x1x32x8xf32> to vector<32x8xf32>
    %cst_265 = arith.constant dense<0.000000e+00> : vector<16x8xf32>
    %316 = tpu.matmul %234, %315, %cst_265 {dimension_numbers = #tpu.dot_dimension_numbers<[1], [0], [0], [1], [0, 0, 1, 1], [], []>} : vector<16x32xf32>, vector<32x8xf32>, vector<16x8xf32> -> vector<16x8xf32>
    %c1_266 = arith.constant 1 : index
    %c2_267 = arith.constant 2 : index
    %c0_268 = arith.constant 0 : index
    %c0_269 = arith.constant 0 : index
    %317 = vector.load %arg3[%c1_266, %c2_267, %c0_268, %c0_269] : memref<2x4x1x8xf32, #tpu.memory_space<vmem>>, vector<1x1x1x8xf32>
    %318 = vector.shape_cast %317 : vector<1x1x1x8xf32> to vector<1x8xf32>
    %319 = vector.broadcast %318 : vector<1x8xf32> to vector<16x8xf32>
    %320 = arith.addf %316, %319 : vector<16x8xf32>
    %c1_270 = arith.constant 1 : index
    %c2_271 = arith.constant 2 : index
    %c0_272 = arith.constant 0 : index
    %c0_273 = arith.constant 0 : index
    %321 = vector.load %arg4[%c1_270, %c2_271, %c0_272, %c0_273] : memref<2x4x32x8xf32, #tpu.memory_space<vmem>>, vector<1x1x32x8xf32>
    %322 = vector.shape_cast %321 : vector<1x1x32x8xf32> to vector<32x8xf32>
    %cst_274 = arith.constant dense<0.000000e+00> : vector<16x8xf32>
    %323 = tpu.matmul %234, %322, %cst_274 {dimension_numbers = #tpu.dot_dimension_numbers<[1], [0], [0], [1], [0, 0, 1, 1], [], []>} : vector<16x32xf32>, vector<32x8xf32>, vector<16x8xf32> -> vector<16x8xf32>
    %c1_275 = arith.constant 1 : index
    %c2_276 = arith.constant 2 : index
    %c0_277 = arith.constant 0 : index
    %c0_278 = arith.constant 0 : index
    %324 = vector.load %arg5[%c1_275, %c2_276, %c0_277, %c0_278] : memref<2x4x1x8xf32, #tpu.memory_space<vmem>>, vector<1x1x1x8xf32>
    %325 = vector.shape_cast %324 : vector<1x1x1x8xf32> to vector<1x8xf32>
    %326 = vector.broadcast %325 : vector<1x8xf32> to vector<16x8xf32>
    %327 = arith.addf %323, %326 : vector<16x8xf32>
    %c1_279 = arith.constant 1 : index
    %c2_280 = arith.constant 2 : index
    %c0_281 = arith.constant 0 : index
    %c0_282 = arith.constant 0 : index
    %328 = vector.load %arg6[%c1_279, %c2_280, %c0_281, %c0_282] : memref<2x4x32x8xf32, #tpu.memory_space<vmem>>, vector<1x1x32x8xf32>
    %329 = vector.shape_cast %328 : vector<1x1x32x8xf32> to vector<32x8xf32>
    %cst_283 = arith.constant dense<0.000000e+00> : vector<16x8xf32>
    %330 = tpu.matmul %234, %329, %cst_283 {dimension_numbers = #tpu.dot_dimension_numbers<[1], [0], [0], [1], [0, 0, 1, 1], [], []>} : vector<16x32xf32>, vector<32x8xf32>, vector<16x8xf32> -> vector<16x8xf32>
    %c1_284 = arith.constant 1 : index
    %c2_285 = arith.constant 2 : index
    %c0_286 = arith.constant 0 : index
    %c0_287 = arith.constant 0 : index
    %331 = vector.load %arg7[%c1_284, %c2_285, %c0_286, %c0_287] : memref<2x4x1x8xf32, #tpu.memory_space<vmem>>, vector<1x1x1x8xf32>
    %332 = vector.shape_cast %331 : vector<1x1x1x8xf32> to vector<1x8xf32>
    %333 = vector.broadcast %332 : vector<1x8xf32> to vector<16x8xf32>
    %334 = arith.addf %330, %333 : vector<16x8xf32>
    %cst_288 = arith.constant 0.353553385 : f32
    %335 = vector.broadcast %cst_288 : f32 to vector<16x8xf32>
    %336 = arith.mulf %320, %335 : vector<16x8xf32>
    %cst_289 = arith.constant dense<0.000000e+00> : vector<16x16xf32>
    %337 = tpu.matmul %336, %327, %cst_289 {dimension_numbers = #tpu.dot_dimension_numbers<[1], [1], [0], [0], [0, 0, 1, 0], [], []>} : vector<16x8xf32>, vector<16x8xf32>, vector<16x16xf32> -> vector<16x16xf32>
    %338 = arith.addf %337, %1 : vector<16x16xf32>
    %cst_290 = arith.constant dense<0xFF800000> : vector<16xf32>
    %339 = vector.multi_reduction <maximumf>, %338, %cst_290 [1] : vector<16x16xf32> to vector<16xf32>
    %340 = vector.shape_cast %339 : vector<16xf32> to vector<16x1xf32>
    %341 = vector.broadcast %340 : vector<16x1xf32> to vector<16x16xf32>
    %342 = arith.subf %338, %341 : vector<16x16xf32>
    %343 = math.exp %342 : vector<16x16xf32>
    %cst_291 = arith.constant dense<0.000000e+00> : vector<16xf32>
    %344 = vector.multi_reduction <add>, %343, %cst_291 [1] : vector<16x16xf32> to vector<16xf32>
    %345 = vector.shape_cast %344 : vector<16xf32> to vector<16x1xf32>
    %346 = tpu.reciprocal %345 {approx = true} : vector<16x1xf32> -> vector<16x1xf32>
    %347 = vector.broadcast %346 : vector<16x1xf32> to vector<16x16xf32>
    %348 = arith.mulf %343, %347 : vector<16x16xf32>
    %cst_292 = arith.constant dense<0.000000e+00> : vector<16x8xf32>
    %349 = tpu.matmul %348, %334, %cst_292 {dimension_numbers = #tpu.dot_dimension_numbers<[1], [0], [0], [1], [0, 0, 1, 1], [], []>} : vector<16x16xf32>, vector<16x8xf32>, vector<16x8xf32> -> vector<16x8xf32>
    %c1_293 = arith.constant 1 : index
    %c2_294 = arith.constant 2 : index
    %c0_295 = arith.constant 0 : index
    %c0_296 = arith.constant 0 : index
    %350 = vector.load %arg8[%c1_293, %c2_294, %c0_295, %c0_296] : memref<2x4x8x32xf32, #tpu.memory_space<vmem>>, vector<1x1x8x32xf32>
    %351 = vector.shape_cast %350 : vector<1x1x8x32xf32> to vector<8x32xf32>
    %cst_297 = arith.constant dense<0.000000e+00> : vector<16x32xf32>
    %352 = tpu.matmul %349, %351, %cst_297 {dimension_numbers = #tpu.dot_dimension_numbers<[1], [0], [0], [1], [0, 0, 1, 1], [], []>} : vector<16x8xf32>, vector<8x32xf32>, vector<16x32xf32> -> vector<16x32xf32>
    %353 = arith.addf %313, %352 : vector<16x32xf32>
    %c1_298 = arith.constant 1 : index
    %c3_299 = arith.constant 3 : index
    %c0_300 = arith.constant 0 : index
    %c0_301 = arith.constant 0 : index
    %354 = vector.load %arg2[%c1_298, %c3_299, %c0_300, %c0_301] : memref<2x4x32x8xf32, #tpu.memory_space<vmem>>, vector<1x1x32x8xf32>
    %355 = vector.shape_cast %354 : vector<1x1x32x8xf32> to vector<32x8xf32>
    %cst_302 = arith.constant dense<0.000000e+00> : vector<16x8xf32>
    %356 = tpu.matmul %234, %355, %cst_302 {dimension_numbers = #tpu.dot_dimension_numbers<[1], [0], [0], [1], [0, 0, 1, 1], [], []>} : vector<16x32xf32>, vector<32x8xf32>, vector<16x8xf32> -> vector<16x8xf32>
    %c1_303 = arith.constant 1 : index
    %c3_304 = arith.constant 3 : index
    %c0_305 = arith.constant 0 : index
    %c0_306 = arith.constant 0 : index
    %357 = vector.load %arg3[%c1_303, %c3_304, %c0_305, %c0_306] : memref<2x4x1x8xf32, #tpu.memory_space<vmem>>, vector<1x1x1x8xf32>
    %358 = vector.shape_cast %357 : vector<1x1x1x8xf32> to vector<1x8xf32>
    %359 = vector.broadcast %358 : vector<1x8xf32> to vector<16x8xf32>
    %360 = arith.addf %356, %359 : vector<16x8xf32>
    %c1_307 = arith.constant 1 : index
    %c3_308 = arith.constant 3 : index
    %c0_309 = arith.constant 0 : index
    %c0_310 = arith.constant 0 : index
    %361 = vector.load %arg4[%c1_307, %c3_308, %c0_309, %c0_310] : memref<2x4x32x8xf32, #tpu.memory_space<vmem>>, vector<1x1x32x8xf32>
    %362 = vector.shape_cast %361 : vector<1x1x32x8xf32> to vector<32x8xf32>
    %cst_311 = arith.constant dense<0.000000e+00> : vector<16x8xf32>
    %363 = tpu.matmul %234, %362, %cst_311 {dimension_numbers = #tpu.dot_dimension_numbers<[1], [0], [0], [1], [0, 0, 1, 1], [], []>} : vector<16x32xf32>, vector<32x8xf32>, vector<16x8xf32> -> vector<16x8xf32>
    %c1_312 = arith.constant 1 : index
    %c3_313 = arith.constant 3 : index
    %c0_314 = arith.constant 0 : index
    %c0_315 = arith.constant 0 : index
    %364 = vector.load %arg5[%c1_312, %c3_313, %c0_314, %c0_315] : memref<2x4x1x8xf32, #tpu.memory_space<vmem>>, vector<1x1x1x8xf32>
    %365 = vector.shape_cast %364 : vector<1x1x1x8xf32> to vector<1x8xf32>
    %366 = vector.broadcast %365 : vector<1x8xf32> to vector<16x8xf32>
    %367 = arith.addf %363, %366 : vector<16x8xf32>
    %c1_316 = arith.constant 1 : index
    %c3_317 = arith.constant 3 : index
    %c0_318 = arith.constant 0 : index
    %c0_319 = arith.constant 0 : index
    %368 = vector.load %arg6[%c1_316, %c3_317, %c0_318, %c0_319] : memref<2x4x32x8xf32, #tpu.memory_space<vmem>>, vector<1x1x32x8xf32>
    %369 = vector.shape_cast %368 : vector<1x1x32x8xf32> to vector<32x8xf32>
    %cst_320 = arith.constant dense<0.000000e+00> : vector<16x8xf32>
    %370 = tpu.matmul %234, %369, %cst_320 {dimension_numbers = #tpu.dot_dimension_numbers<[1], [0], [0], [1], [0, 0, 1, 1], [], []>} : vector<16x32xf32>, vector<32x8xf32>, vector<16x8xf32> -> vector<16x8xf32>
    %c1_321 = arith.constant 1 : index
    %c3_322 = arith.constant 3 : index
    %c0_323 = arith.constant 0 : index
    %c0_324 = arith.constant 0 : index
    %371 = vector.load %arg7[%c1_321, %c3_322, %c0_323, %c0_324] : memref<2x4x1x8xf32, #tpu.memory_space<vmem>>, vector<1x1x1x8xf32>
    %372 = vector.shape_cast %371 : vector<1x1x1x8xf32> to vector<1x8xf32>
    %373 = vector.broadcast %372 : vector<1x8xf32> to vector<16x8xf32>
    %374 = arith.addf %370, %373 : vector<16x8xf32>
    %cst_325 = arith.constant 0.353553385 : f32
    %375 = vector.broadcast %cst_325 : f32 to vector<16x8xf32>
    %376 = arith.mulf %360, %375 : vector<16x8xf32>
    %cst_326 = arith.constant dense<0.000000e+00> : vector<16x16xf32>
    %377 = tpu.matmul %376, %367, %cst_326 {dimension_numbers = #tpu.dot_dimension_numbers<[1], [1], [0], [0], [0, 0, 1, 0], [], []>} : vector<16x8xf32>, vector<16x8xf32>, vector<16x16xf32> -> vector<16x16xf32>
    %378 = arith.addf %377, %1 : vector<16x16xf32>
    %cst_327 = arith.constant dense<0xFF800000> : vector<16xf32>
    %379 = vector.multi_reduction <maximumf>, %378, %cst_327 [1] : vector<16x16xf32> to vector<16xf32>
    %380 = vector.shape_cast %379 : vector<16xf32> to vector<16x1xf32>
    %381 = vector.broadcast %380 : vector<16x1xf32> to vector<16x16xf32>
    %382 = arith.subf %378, %381 : vector<16x16xf32>
    %383 = math.exp %382 : vector<16x16xf32>
    %cst_328 = arith.constant dense<0.000000e+00> : vector<16xf32>
    %384 = vector.multi_reduction <add>, %383, %cst_328 [1] : vector<16x16xf32> to vector<16xf32>
    %385 = vector.shape_cast %384 : vector<16xf32> to vector<16x1xf32>
    %386 = tpu.reciprocal %385 {approx = true} : vector<16x1xf32> -> vector<16x1xf32>
    %387 = vector.broadcast %386 : vector<16x1xf32> to vector<16x16xf32>
    %388 = arith.mulf %383, %387 : vector<16x16xf32>
    %cst_329 = arith.constant dense<0.000000e+00> : vector<16x8xf32>
    %389 = tpu.matmul %388, %374, %cst_329 {dimension_numbers = #tpu.dot_dimension_numbers<[1], [0], [0], [1], [0, 0, 1, 1], [], []>} : vector<16x16xf32>, vector<16x8xf32>, vector<16x8xf32> -> vector<16x8xf32>
    %c1_330 = arith.constant 1 : index
    %c3_331 = arith.constant 3 : index
    %c0_332 = arith.constant 0 : index
    %c0_333 = arith.constant 0 : index
    %390 = vector.load %arg8[%c1_330, %c3_331, %c0_332, %c0_333] : memref<2x4x8x32xf32, #tpu.memory_space<vmem>>, vector<1x1x8x32xf32>
    %391 = vector.shape_cast %390 : vector<1x1x8x32xf32> to vector<8x32xf32>
    %cst_334 = arith.constant dense<0.000000e+00> : vector<16x32xf32>
    %392 = tpu.matmul %389, %391, %cst_334 {dimension_numbers = #tpu.dot_dimension_numbers<[1], [0], [0], [1], [0, 0, 1, 1], [], []>} : vector<16x8xf32>, vector<8x32xf32>, vector<16x32xf32> -> vector<16x32xf32>
    %393 = arith.addf %353, %392 : vector<16x32xf32>
    %c1_335 = arith.constant 1 : index
    %c0_336 = arith.constant 0 : index
    %c0_337 = arith.constant 0 : index
    %394 = vector.load %arg9[%c1_335, %c0_336, %c0_337] : memref<2x1x32xf32, #tpu.memory_space<vmem>>, vector<1x1x32xf32>
    %395 = vector.shape_cast %394 : vector<1x1x32xf32> to vector<1x32xf32>
    %396 = vector.broadcast %395 : vector<1x32xf32> to vector<16x32xf32>
    %397 = arith.addf %393, %396 : vector<16x32xf32>
    %398 = arith.addf %234, %397 : vector<16x32xf32>
    %c1_338 = arith.constant 1 : index
    %c0_339 = arith.constant 0 : index
    %c0_340 = arith.constant 0 : index
    %399 = vector.load %arg10[%c1_338, %c0_339, %c0_340] : memref<2x1x32xf32, #tpu.memory_space<vmem>>, vector<1x1x32xf32>
    %400 = vector.shape_cast %399 : vector<1x1x32xf32> to vector<1x32xf32>
    %c1_341 = arith.constant 1 : index
    %c0_342 = arith.constant 0 : index
    %c0_343 = arith.constant 0 : index
    %401 = vector.load %arg11[%c1_341, %c0_342, %c0_343] : memref<2x1x32xf32, #tpu.memory_space<vmem>>, vector<1x1x32xf32>
    %402 = vector.shape_cast %401 : vector<1x1x32xf32> to vector<1x32xf32>
    %cst_344 = arith.constant dense<0.000000e+00> : vector<16xf32>
    %403 = vector.multi_reduction <add>, %398, %cst_344 [1] : vector<16x32xf32> to vector<16xf32>
    %404 = vector.shape_cast %403 : vector<16xf32> to vector<16x1xf32>
    %cst_345 = arith.constant 3.200000e+01 : f32
    %405 = vector.broadcast %cst_345 : f32 to vector<16x1xf32>
    %406 = arith.divf %404, %405 : vector<16x1xf32>
    %407 = vector.broadcast %406 : vector<16x1xf32> to vector<16x32xf32>
    %408 = arith.subf %398, %407 : vector<16x32xf32>
    %409 = arith.mulf %408, %408 : vector<16x32xf32>
    %cst_346 = arith.constant dense<0.000000e+00> : vector<16xf32>
    %410 = vector.multi_reduction <add>, %409, %cst_346 [1] : vector<16x32xf32> to vector<16xf32>
    %411 = vector.shape_cast %410 : vector<16xf32> to vector<16x1xf32>
    %cst_347 = arith.constant 3.200000e+01 : f32
    %412 = vector.broadcast %cst_347 : f32 to vector<16x1xf32>
    %413 = arith.divf %411, %412 : vector<16x1xf32>
    %414 = vector.broadcast %406 : vector<16x1xf32> to vector<16x32xf32>
    %415 = arith.subf %398, %414 : vector<16x32xf32>
    %cst_348 = arith.constant 9.99999974E-6 : f32
    %416 = vector.broadcast %cst_348 : f32 to vector<16x1xf32>
    %417 = arith.addf %413, %416 : vector<16x1xf32>
    %418 = math.rsqrt %417 : vector<16x1xf32>
    %419 = vector.broadcast %418 : vector<16x1xf32> to vector<16x32xf32>
    %420 = arith.mulf %415, %419 : vector<16x32xf32>
    %421 = vector.broadcast %400 : vector<1x32xf32> to vector<16x32xf32>
    %422 = arith.mulf %420, %421 : vector<16x32xf32>
    %423 = vector.broadcast %402 : vector<1x32xf32> to vector<16x32xf32>
    %424 = arith.addf %422, %423 : vector<16x32xf32>
    %c1_349 = arith.constant 1 : index
    %c0_350 = arith.constant 0 : index
    %c0_351 = arith.constant 0 : index
    %425 = vector.load %arg12[%c1_349, %c0_350, %c0_351] : memref<2x32x64xf32, #tpu.memory_space<vmem>>, vector<1x32x64xf32>
    %426 = vector.shape_cast %425 : vector<1x32x64xf32> to vector<32x64xf32>
    %cst_352 = arith.constant dense<0.000000e+00> : vector<16x64xf32>
    %427 = tpu.matmul %424, %426, %cst_352 {dimension_numbers = #tpu.dot_dimension_numbers<[1], [0], [0], [1], [0, 0, 1, 1], [], []>} : vector<16x32xf32>, vector<32x64xf32>, vector<16x64xf32> -> vector<16x64xf32>
    %c1_353 = arith.constant 1 : index
    %c0_354 = arith.constant 0 : index
    %c0_355 = arith.constant 0 : index
    %428 = vector.load %arg13[%c1_353, %c0_354, %c0_355] : memref<2x1x64xf32, #tpu.memory_space<vmem>>, vector<1x1x64xf32>
    %429 = vector.shape_cast %428 : vector<1x1x64xf32> to vector<1x64xf32>
    %430 = vector.broadcast %429 : vector<1x64xf32> to vector<16x64xf32>
    %431 = arith.addf %427, %430 : vector<16x64xf32>
    %cst_356 = arith.constant 0.000000e+00 : f32
    %432 = vector.broadcast %cst_356 : f32 to vector<16x64xf32>
    %433 = arith.maximumf %431, %432 : vector<16x64xf32>
    %c1_357 = arith.constant 1 : index
    %c0_358 = arith.constant 0 : index
    %c0_359 = arith.constant 0 : index
    %434 = vector.load %arg14[%c1_357, %c0_358, %c0_359] : memref<2x64x32xf32, #tpu.memory_space<vmem>>, vector<1x64x32xf32>
    %435 = vector.shape_cast %434 : vector<1x64x32xf32> to vector<64x32xf32>
    %cst_360 = arith.constant dense<0.000000e+00> : vector<16x32xf32>
    %436 = tpu.matmul %433, %435, %cst_360 {dimension_numbers = #tpu.dot_dimension_numbers<[1], [0], [0], [1], [0, 0, 1, 1], [], []>} : vector<16x64xf32>, vector<64x32xf32>, vector<16x32xf32> -> vector<16x32xf32>
    %c1_361 = arith.constant 1 : index
    %c0_362 = arith.constant 0 : index
    %c0_363 = arith.constant 0 : index
    %437 = vector.load %arg15[%c1_361, %c0_362, %c0_363] : memref<2x1x32xf32, #tpu.memory_space<vmem>>, vector<1x1x32xf32>
    %438 = vector.shape_cast %437 : vector<1x1x32xf32> to vector<1x32xf32>
    %439 = vector.broadcast %438 : vector<1x32xf32> to vector<16x32xf32>
    %440 = arith.addf %436, %439 : vector<16x32xf32>
    %441 = arith.addf %424, %440 : vector<16x32xf32>
    %c1_364 = arith.constant 1 : index
    %c0_365 = arith.constant 0 : index
    %c0_366 = arith.constant 0 : index
    %442 = vector.load %arg16[%c1_364, %c0_365, %c0_366] : memref<2x1x32xf32, #tpu.memory_space<vmem>>, vector<1x1x32xf32>
    %443 = vector.shape_cast %442 : vector<1x1x32xf32> to vector<1x32xf32>
    %c1_367 = arith.constant 1 : index
    %c0_368 = arith.constant 0 : index
    %c0_369 = arith.constant 0 : index
    %444 = vector.load %arg17[%c1_367, %c0_368, %c0_369] : memref<2x1x32xf32, #tpu.memory_space<vmem>>, vector<1x1x32xf32>
    %445 = vector.shape_cast %444 : vector<1x1x32xf32> to vector<1x32xf32>
    %cst_370 = arith.constant dense<0.000000e+00> : vector<16xf32>
    %446 = vector.multi_reduction <add>, %441, %cst_370 [1] : vector<16x32xf32> to vector<16xf32>
    %447 = vector.shape_cast %446 : vector<16xf32> to vector<16x1xf32>
    %cst_371 = arith.constant 3.200000e+01 : f32
    %448 = vector.broadcast %cst_371 : f32 to vector<16x1xf32>
    %449 = arith.divf %447, %448 : vector<16x1xf32>
    %450 = vector.broadcast %449 : vector<16x1xf32> to vector<16x32xf32>
    %451 = arith.subf %441, %450 : vector<16x32xf32>
    %452 = arith.mulf %451, %451 : vector<16x32xf32>
    %cst_372 = arith.constant dense<0.000000e+00> : vector<16xf32>
    %453 = vector.multi_reduction <add>, %452, %cst_372 [1] : vector<16x32xf32> to vector<16xf32>
    %454 = vector.shape_cast %453 : vector<16xf32> to vector<16x1xf32>
    %cst_373 = arith.constant 3.200000e+01 : f32
    %455 = vector.broadcast %cst_373 : f32 to vector<16x1xf32>
    %456 = arith.divf %454, %455 : vector<16x1xf32>
    %457 = vector.broadcast %449 : vector<16x1xf32> to vector<16x32xf32>
    %458 = arith.subf %441, %457 : vector<16x32xf32>
    %cst_374 = arith.constant 9.99999974E-6 : f32
    %459 = vector.broadcast %cst_374 : f32 to vector<16x1xf32>
    %460 = arith.addf %456, %459 : vector<16x1xf32>
    %461 = math.rsqrt %460 : vector<16x1xf32>
    %462 = vector.broadcast %461 : vector<16x1xf32> to vector<16x32xf32>
    %463 = arith.mulf %458, %462 : vector<16x32xf32>
    %464 = vector.broadcast %443 : vector<1x32xf32> to vector<16x32xf32>
    %465 = arith.mulf %463, %464 : vector<16x32xf32>
    %466 = vector.broadcast %445 : vector<1x32xf32> to vector<16x32xf32>
    %467 = arith.addf %465, %466 : vector<16x32xf32>
    %c0_375 = arith.constant 0 : index
    %c0_376 = arith.constant 0 : index
    %468 = vector.load %arg18[%c0_375, %c0_376] : memref<32x128xf32, #tpu.memory_space<vmem>>, vector<32x128xf32>
    %cst_377 = arith.constant dense<0.000000e+00> : vector<16x128xf32>
    %469 = tpu.matmul %467, %468, %cst_377 {dimension_numbers = #tpu.dot_dimension_numbers<[1], [0], [0], [1], [0, 0, 1, 1], [], []>} : vector<16x32xf32>, vector<32x128xf32>, vector<16x128xf32> -> vector<16x128xf32>
    %c0_378 = arith.constant 0 : index
    %c0_379 = arith.constant 0 : index
    %470 = vector.load %arg19[%c0_378, %c0_379] : memref<1x128xf32, #tpu.memory_space<vmem>>, vector<1x128xf32>
    %471 = vector.broadcast %470 : vector<1x128xf32> to vector<16x128xf32>
    %472 = arith.addf %469, %471 : vector<16x128xf32>
    %cst_380 = arith.constant dense<0xFF800000> : vector<16xf32>
    %473 = vector.multi_reduction <maximumf>, %472, %cst_380 [1] : vector<16x128xf32> to vector<16xf32>
    %474 = vector.shape_cast %473 : vector<16xf32> to vector<16x1xf32>
    %475 = vector.broadcast %474 : vector<16x1xf32> to vector<16x128xf32>
    %476 = arith.subf %472, %475 : vector<16x128xf32>
    %477 = math.exp %476 : vector<16x128xf32>
    %cst_381 = arith.constant dense<0.000000e+00> : vector<16xf32>
    %478 = vector.multi_reduction <add>, %477, %cst_381 [1] : vector<16x128xf32> to vector<16xf32>
    %479 = vector.shape_cast %478 : vector<16xf32> to vector<16x1xf32>
    %480 = tpu.reciprocal %479 {approx = true} : vector<16x1xf32> -> vector<16x1xf32>
    %481 = vector.broadcast %480 : vector<16x1xf32> to vector<16x128xf32>
    %482 = arith.mulf %477, %481 : vector<16x128xf32>
    %c0_382 = arith.constant 0 : index
    %c0_383 = arith.constant 0 : index
    %483 = vector.load %arg20[%c0_382, %c0_383] : memref<16x128xf32, #tpu.memory_space<vmem>>, vector<16x128xf32>
    tpu.vector_store %arg20[%c0_382, %c0_383], %482 {strides = array<i32>} : memref<16x128xf32, #tpu.memory_space<vmem>>, vector<16x128xf32>,
    return
  }
}

</mosaic_0001>

<bundles_post_ra>
// kernel: tpu_custom_call.1
= control target key start
LH: loop header
LB: loop body
LE: loop exit
PB: predicated region body
PF: predicated region fallthrough
CT: control target
= control target key end

     0   :  { %s7564_s0 = inlined_call_operand.vmem [shape: f32[16,32], index: 0, kind: input, shape index: {}]   ;;  %s7565_s1 = inlined_call_operand.vmem [shape: f32[16,16], index: 1, kind: input, shape index: {}]   ;;  %s7566_s2 = inlined_call_operand.vmem [shape: f32[2,4,32,8], index: 2, kind: input, shape index: {}]   ;;  %s7567_s3 = inlined_call_operand.vmem [shape: f32[2,4,1,8], index: 3, kind: input, shape index: {}]   ;;  %s7568_s4 = inlined_call_operand.vmem [shape: f32[2,4,32,8], index: 4, kind: input, shape index: {}]   ;;  %s7569_s5 = inlined_call_operand.vmem [shape: f32[2,4,1,8], index: 5, kind: input, shape index: {}]   ;;  %s7570_s6 = inlined_call_operand.vmem [shape: f32[2,4,32,8], index: 6, kind: input, shape index: {}]   ;;  %s7571_s7 = inlined_call_operand.vmem [shape: f32[2,4,1,8], index: 7, kind: input, shape index: {}]   ;;  %s7572_s8 = inlined_call_operand.vmem [shape: f32[2,4,8,32], index: 8, kind: input, shape index: {}]   ;;  %s7573_s9 = inlined_call_operand.vmem [shape: f32[2,1,32], index: 9, kind: input, shape index: {}]   ;;  %s7574_s10 = inlined_call_operand.vmem [shape: f32[2,1,32], index: 10, kind: input, shape index: {}]   ;;  %s7575_s11 = inlined_call_operand.vmem [shape: f32[2,1,32], index: 11, kind: input, shape index: {}]   ;;  %s7576_s12 = inlined_call_operand.vmem [shape: f32[2,32,64], index: 12, kind: input, shape index: {}]   ;;  %s7577_s13 = inlined_call_operand.vmem [shape: f32[2,1,64], index: 13, kind: input, shape index: {}]   ;;  %s7578_s14 = inlined_call_operand.vmem [shape: f32[2,64,32], index: 14, kind: input, shape index: {}]   ;;  %s7579_s15 = inlined_call_operand.vmem [shape: f32[2,1,32], index: 15, kind: input, shape index: {}]   ;;  %s7580_s16 = inlined_call_operand.vmem [shape: f32[2,1,32], index: 16, kind: input, shape index: {}]   ;;  %s7581_s17 = inlined_call_operand.vmem [shape: f32[2,1,32], index: 17, kind: input, shape index: {}]   ;;  %s7582_s18 = inlined_call_operand.vmem [shape: f32[32,128], index: 18, kind: input, shape index: {}]   ;;  %s7583_s19 = inlined_call_operand.vmem [shape: f32[1,128], index: 19, kind: input, shape index: {}]   ;;  %s7584_s20 = inlined_call_operand.hbm [shape: f32[16,128], index: 20, kind: output, shape index: {}]  }
   0x1   :  { %7590 = sst [smem:[#allocation5_spill]] %s7564_s0 }
   0x2   :  { %7591 = sst [smem:[#allocation6_spill]] %s7565_s1 }
   0x3   :  { %7592 = sst [smem:[#allocation7_spill]] %s7566_s2 }
   0x4   :  { %7593 = sst [smem:[#allocation8_spill]] %s7567_s3 }
   0x5   :  { %7594 = sst [smem:[#allocation9_spill]] %s7568_s4 }
   0x6   :  { %s7595_s23 = sld [smem:[#allocation9_spill]]  ;;  %vm81_vm0 = vcmask 261120   ;;  %s7596_s29 = sld [smem:[#allocation7_spill]] }
   0x7   :  { %s7597_s22 = sld [smem:[#allocation5_spill]] }
   0xc   :  { %v163_v0 = vld [vmem:[%s7595_s23] sm:$0xff]  ;;  %v164_v1 = vld [vmem:[%s7595_s23 + $0x8] sm:$0xff]  ;;  %v165_v2 = vld [vmem:[%s7595_s23 + $0x10] sm:$0xff] }
   0xd   :  { %v6176_v3 = vpack.c.bf16 %v164_v1, %v163_v0  ;;  %v166_v4 = vld [vmem:[%s7595_s23 + $0x18] sm:$0xff]  ;;  %v70_v5 = vld [vmem:[%s7596_s29] sm:$0xff]  ;;  %v71_v6 = vld [vmem:[%s7596_s29 + $0x8] sm:$0xff] }
   0xe   :  { %v6180_v7 = vpack.c.bf16 %v166_v4, %v165_v2  ;;  %v6168_v8 = vpack.c.bf16 %v71_v6, %v70_v5  ;;  %v6754_v9 = vld [vmem:[%s7597_s22] sm:$0xff]  ;;  %v72_v10 = vld [vmem:[%s7596_s29 + $0x10] sm:$0xff]  ;;  %v73_v11 = vld [vmem:[%s7596_s29 + $0x18] sm:$0xff] }
   0xf   :  { %6177 = vmatprep.subr.bf16.mxu1 %v6176_v3  ;;  %5700 = vmatprep.mubr.msk.f32.mxu1 %vm81_vm0, %v6754_v9 }
  0x10   :  { %25 = vsyncpa [#allocation3], 0  ;;  %6179 = vmatpush3.bf16.msra.mxu1 %v6176_v3  ;;  %6169 = vmatprep.subr.bf16.mxu0 %v6168_v8  ;;  %v6172_v12 = vpack.c.bf16 %v73_v11, %v72_v10  ;;  %v6769_v13 = vld [vmem:[%s7597_s22 + $0x8] sm:$0xff]  ;;  %v5122_v14 = vld [vmem:[%s7569_s5] ss:$0 sm:$0xff]  ;;  %s7598_s21 = sld [smem:[#allocation8_spill]] }
  0x11   :  { %6181 = vmatprep.subr.bf16.mxu1 %v6180_v7  ;;  %6171 = vmatpush3.bf16.msra.mxu0 %v6168_v8  ;;  %vm337_vm1 = vcmask 64512   ;;  %v249_v28 = vld [vmem:[%s7570_s6] sm:$0xff]  ;;  %v250_v29 = vld [vmem:[%s7570_s6 + $0x8] sm:$0xff]  ;;  %v251_v30 = vld [vmem:[%s7570_s6 + $0x10] sm:$0xff]  ;;  %s7601_s30 = sld [smem:[#allocation6_spill]]  ;;  %vm425_vm3 = vcmask 130048  }
  0x12   :  { %6173 = vmatprep.subr.bf16.mxu0 %v6172_v12  ;;  %5689 = vmatprep.mubr.msk.f32.mxu0 %vm81_vm0, %v6754_v9  ;;  %vm6785_vm2 = vmpackc.low %vm337_vm1, %vm337_vm1  ;;  %v6184_v31 = vpack.c.bf16 %v250_v29, %v249_v28  ;;  %v252_v32 = vld [vmem:[%s7570_s6 + $0x18] sm:$0xff]  ;;  %v5142_v53 = vld [vmem:[%s7595_s23 + $0x20] sm:$0xff]  ;;  %vm2397_vm4 = vcmask 523264  }
  0x13   :  { %v6188_v33 = vpack.c.bf16 %v252_v32, %v251_v30  ;;  %v5143_v54 = vld [vmem:[%s7595_s23 + $0x28] sm:$0xff]  ;;  %v5125_v55 = vld [vmem:[%s7571_s7] ss:$0 sm:$0xff]  ;;  %v5144_v61 = vld [vmem:[%s7595_s23 + $0x30] sm:$0xff] }
  0x14   :  { %6183 = vmatpush3.bf16.msra.mxu1 %v6180_v7  ;;  %v6210_v57 = vpack.c.bf16 %v5143_v54, %v5142_v53  ;;  %v5145_v62 = vld [vmem:[%s7595_s23 + $0x38] sm:$0xff]  ;;  %v5134_v0 = vld [vmem:[%s7596_s29 + $0x20] sm:$0xff]  ;;  %v5135_v1 = vld [vmem:[%s7596_s29 + $0x28] sm:$0xff] }
  0x15   :  { %6175 = vmatpush3.bf16.msra.mxu0 %v6172_v12  ;;  %v6214_v63 = vpack.c.bf16 %v5145_v62, %v5144_v61  ;;  %v6202_v2 = vpack.c.bf16 %v5135_v1, %v5134_v0  ;;  %v5136_v7 = vld [vmem:[%s7596_s29 + $0x30] sm:$0xff]  ;;  %v5137_v8 = vld [vmem:[%s7596_s29 + $0x38] sm:$0xff]  ;;  %v5150_v30 = vld [vmem:[%s7570_s6 + $0x20] sm:$0xff] }
  0x16   :  { %v5119_v16 = vld [vmem:[%s7598_s21] ss:$0 sm:$0xff]  ;;  %6185 = vmatprep.subr.bf16.mxu0 %v6184_v31  ;;  %v6206_v12 = vpack.c.bf16 %v5137_v8, %v5136_v7  ;;  %v5152_v32 = vld [vmem:[%s7570_s6 + $0x30] sm:$0xff]  ;;  %v5172_v8 = vld [vmem:[%s7596_s29 + $0x58] sm:$0xff] }
  0x17   :  { %5701 = vmatmul.mubr.msk.f32.vlgmr.msra.gmra.mrb[0].mxu1 %vm81_vm0, %v6769_v13  ;;  %v6814_v34 = vld [vmem:[%s7601_s30] sm:$0xff]  ;;  %v6819_v36 = vld [vmem:[%s7601_s30 + $0x8] sm:$0xff]  ;;  %v5171_v7 = vld [vmem:[%s7596_s29 + $0x50] sm:$0xff] }
  0x18   :  { %5690 = vmatmul.mubr.msk.f32.vlgmr.msra.gmra.mrb[0].mxu0 %vm81_vm0, %v6769_v13 }
  0x19   :  { %5711 = vmatprep.mubr.msk.f32.mxu0 %vm81_vm0, %v6754_v9  ;;  %6187 = vmatpush3.bf16.msra.mxu0 %v6184_v31  ;;  %v5151_v31 = vld [vmem:[%s7570_s6 + $0x28] sm:$0xff] }
  0x1a   :  { %6189 = vmatprep.subr.bf16.mxu0 %v6188_v33 }
  0x1d   :  { %6191 = vmatpush3.bf16.msra.mxu0 %v6188_v33  ;;  %v6218_v33 = vpack.c.bf16 %v5151_v31, %v5150_v30 }
  0x1e   :  { %6211 = vmatprep.subr.bf16.mxu0 %v6210_v57 }
  0x20   :  { %5712 = vmatmul.mubr.msk.f32.vlgmr.msra.gmra.mrb[2].mxu0 %vm81_vm0, %v6769_v13 }
  0x21   :  { %5747 = vmatprep.mubr.msk.f32.mxu0 %vm81_vm0, %v6754_v9  ;;  %6213 = vmatpush3.bf16.msra.mxu0 %v6210_v57 }
  0x22   :  { %6215 = vmatprep.subr.bf16.mxu0 %v6214_v63 }
  0x25   :  { %6217 = vmatpush3.bf16.msra.mxu0 %v6214_v63 }
  0x28   :  { %5748 = vmatmul.mubr.msk.f32.vlgmr.msra.gmra.mrb[4].mxu0 %vm81_vm0, %v6769_v13 }
  0xea   :  { %v5702_v15 = vpop.f32.mrb[0].mxu1 }
  0xeb   :  { %v246_v17 = vadd.f32 %v5702_v15, %v5122_v14  ;;  %v240_v18 = vpop.f32.mrb[1].mxu1  ;;  %v5691_v19 = vpop.f32.mrb[0].mxu0 }
  0xec   :  { %v241_v20 = vadd.f32 %v5122_v14, %v240_v18  ;;  %v154_v21 = vpop.f32.mrb[1].mxu0  ;;  %v160_v26 = vadd.f32 %v5691_v19, %v5119_v16  ;;  %v5147_v14 = vld [vmem:[%s7569_s5 + $0x1] ss:$0 sm:$0xff] }
  0xed   :  { %v155_v23 = vadd.f32 %v5119_v16, %v154_v21 }
  0xee   :  { %v6192_v24 = vpack.c.bf16 %v246_v17, %v241_v20  ;;  %v336_v27 = vmul.f32 0.35355338, %v160_v26 }
  0xef   :  { %v335_v25 = vmul.f32 0.35355338, %v155_v23  ;;  %v5139_v23 = vld [vmem:[%s7598_s21 + $0x1] ss:$0 sm:$0xff] }
  0xf0   :  { %6194 = vmatprep.subr.msk.bf16.mxu1 %vm6785_vm2, %v6192_v24 }
  0xf1   :  { %6197 = vmatpush3.bf16.xpose.msk.msra.mxu1 %vm6785_vm2, %v6192_v24  ;;  %5718 = vmatprep.mubr.msk.f32.mxu1 %vm337_vm1, %v335_v25 }
  0xf3   :  { %v5713_v52 = vpop.f32.mrb[2].mxu0 }
  0xf4   :  { %v326_v56 = vpop.f32.mrb[3].mxu0  ;;  %v332_v58 = vadd.f32 %v5713_v52, %v5125_v55 }
  0xf5   :  { %v327_v59 = vadd.f32 %v5125_v55, %v326_v56  ;;  %v5155_v55 = vld [vmem:[%s7571_s7 + $0x1] ss:$0 sm:$0xff] }
  0xf7   :  { %v6198_v60 = vpack.c.bf16 %v332_v58, %v327_v59 }
  0xf8   :  { %5719 = vmatmul.mubr.msk.f32.vlgmr.msra.gmra.mrb[2].mxu1 %vm337_vm1, %v336_v27 }
  0xf9   :  { %6199 = vmatprep.subr.bf16.mxu1 %v6198_v60 }
  0xfa   :  { %6201 = vmatpush3.bf16.msra.mxu1 %v6198_v60  ;;  %v5164_v60 = vld [vmem:[%s7572_s8 + $0x8] sm:$0xff] }
  0xfb   :  { %6203 = vmatprep.subr.bf16.mxu1 %v6202_v2  ;;  %v5749_v15 = vpop.f32.mrb[4].mxu0 }
  0xfc   :  { %v703_v16 = vadd.f32 %v5749_v15, %v5147_v14  ;;  %v697_v17 = vpop.f32.mrb[5].mxu0 }
  0xfd   :  { %v698_v18 = vadd.f32 %v5147_v14, %v697_v17  ;;  %v5179_v17 = vld [vmem:[%s7595_s23 + $0x50] sm:$0xff] }
  0xff   :  { %v6226_v19 = vpack.c.bf16 %v703_v16, %v698_v18  ;;  %v5180_v18 = vld [vmem:[%s7595_s23 + $0x58] sm:$0xff] }
 0x101   :  { %6228 = vmatprep.subr.msk.bf16.mxu0 %vm6785_vm2, %v6226_v19 }
 0x102   :  { %6231 = vmatpush3.bf16.xpose.msk.msra.mxu0 %vm6785_vm2, %v6226_v19  ;;  %v6248_v19 = vpack.c.bf16 %v5180_v18, %v5179_v17  ;;  %v5212_v18 = vld [vmem:[%s7595_s23 + $0x70] sm:$0xff] }
 0x103   :  { %5775 = vmatprep.subr.mxu0 %v5164_v60 }
 0x1cb   :  { %v5720_v35 = vpop.f32.mrb[2].mxu1 }
 0x1cc   :  { %v416_v37 = vpop.f32.mrb[3].mxu1  ;;  %v422_v39 = vadd.f32 %v5720_v35, %v6819_v36  ;;  %v5153_v35 = vld [vmem:[%s7570_s6 + $0x38] sm:$0xff] }
 0x1cd   :  { %v417_v38 = vadd.f32 %v416_v37, %v6814_v34  ;;  %v6222_v37 = vpack.c.bf16 %v5153_v35, %v5152_v32  ;;  %v5185_v35 = vld [vmem:[%s7570_s6 + $0x40] sm:$0xff] }
 0x1ce   :  { %v429_v41 = vsel %vm425_vm3, %v422_v39, -inf }
 0x1cf   :  { %v426_v40 = vsel %vm425_vm3, %v417_v38, -inf }
 0x1d0   :  { %427 = vmax.xlane.f32.xlu0 %v426_v40 }
 0x1d4   :  { %430 = vmax.xlane.f32.xlu0 %v429_v41 }
 0x25d   :  { %v428_v42 = vpop.xlane.xlu0 %427 }
 0x25e   :  { %v432_v43 = vsub.f32 %v417_v38, %v428_v42 }
 0x260   :  { %v434_v44 = vmul.f32 1.442695, %v432_v43 }
 0x261   :  { %v431_v45 = vpop.xlane.xlu0 %430 }
 0x262   :  { %6511 = vpow2.f32 %v434_v44  ;;  %v433_v46 = vsub.f32 %v422_v39, %v431_v45 }
 0x264   :  { %v436_v47 = vmul.f32 1.442695, %v433_v46 }
 0x266   :  { %6513 = vpow2.f32 %v436_v47 }
 0x26c   :  { %v6512_v48 = vpop.eup %6511 }
 0x26d   :  { %v438_v49 = vsel %vm425_vm3, %v6512_v48, 0.0 }
 0x26e   :  { %439 = vadd.xlane.f32.xlu1 %v438_v49 }
 0x270   :  { %v6514_v50 = vpop.eup %6513 }
 0x271   :  { %v441_v51 = vsel %vm425_vm3, %v6514_v50, 0.0 }
 0x272   :  { %442 = vadd.xlane.f32.xlu1 %v441_v51 }
 0x2fb   :  { %v440_v3 = vpop.xlane.xlu1 %439 }
 0x2fc   :  { %6515 = vrcp.f32 %v440_v3  ;;  %v529_v3 = vld [vmem:[%s7572_s8] sm:$0xff] }
 0x2ff   :  { %v443_v4 = vpop.xlane.xlu1 %442 }
 0x300   :  { %6517 = vrcp.f32 %v443_v4  ;;  %v5169_v4 = vld [vmem:[%s7596_s29 + $0x40] sm:$0xff] }
 0x306   :  { %v6516_v5 = vpop.eup %6515 }
 0x307   :  { %v446_v6 = vmul.f32 %v6516_v5, %v6512_v48  ;;  %v5170_v5 = vld [vmem:[%s7596_s29 + $0x48] sm:$0xff] }
 0x309   :  { %5725 = vmatprep.mubr.msk.f32.mxu1 %vm425_vm3, %v446_v6  ;;  %v6236_v6 = vpack.c.bf16 %v5170_v5, %v5169_v4 }
 0x30a   :  { %v6518_v10 = vpop.eup %6517 }
 0x30b   :  { %v447_v11 = vmul.f32 %v6518_v10, %v6514_v50  ;;  %v6240_v10 = vpack.c.bf16 %v5172_v8, %v5171_v7  ;;  %v5210_v7 = vld [vmem:[%s7595_s23 + $0x60] sm:$0xff]  ;;  %v5211_v8 = vld [vmem:[%s7595_s23 + $0x68] sm:$0xff] }
 0x30d   :  { %5726 = vmatmul.mubr.msk.f32.vlgmr.msra.gmra.mrb[4].mxu1 %vm425_vm3, %v447_v11  ;;  %v5177_v11 = vld [vmem:[%s7595_s23 + $0x40] sm:$0xff] }
 0x30e   :  { %6205 = vmatpush3.bf16.msra.mxu1 %v6202_v2  ;;  %5736 = vmatprep.mubr.msk.f32.mxu1 %vm81_vm0, %v6754_v9 }
 0x30f   :  { %6207 = vmatprep.subr.bf16.mxu1 %v6206_v12 }
 0x312   :  { %6209 = vmatpush3.bf16.msra.mxu1 %v6206_v12  ;;  %v5178_v12 = vld [vmem:[%s7595_s23 + $0x48] sm:$0xff] }
 0x313   :  { %6219 = vmatprep.subr.bf16.mxu1 %v6218_v33  ;;  %v6244_v16 = vpack.c.bf16 %v5178_v12, %v5177_v11  ;;  %v5202_v11 = vld [vmem:[%s7596_s29 + $0x60] sm:$0xff]  ;;  %v5203_v12 = vld [vmem:[%s7596_s29 + $0x68] sm:$0xff] }
 0x315   :  { %5737 = vmatmul.mubr.msk.f32.vlgmr.msra.gmra.mrb[6].mxu1 %vm81_vm0, %v6769_v13 }
 0x316   :  { %5758 = vmatprep.mubr.msk.f32.mxu1 %vm81_vm0, %v6754_v9  ;;  %6221 = vmatpush3.bf16.msra.mxu1 %v6218_v33 }
 0x317   :  { %6223 = vmatprep.subr.bf16.mxu1 %v6222_v37 }
 0x31a   :  { %6225 = vmatpush3.bf16.msra.mxu1 %v6222_v37  ;;  %v5186_v37 = vld [vmem:[%s7570_s6 + $0x48] sm:$0xff] }
 0x31d   :  { %5759 = vmatmul.mubr.msk.f32.vlgmr.msra.gmra.mrb[8].mxu1 %vm81_vm0, %v6769_v13 }
 0x3e0   :  { %v6871_v20 = vpop.f32.mrb[4].mxu1 }
 0x3e1   :  { %v6873_v21 = vpop.f32.mrb[5].mxu1 }
 0x3e8   :  { %v5738_v24 = vpop.f32.mrb[6].mxu1 }
 0x3e9   :  { %v615_v25 = vadd.f32 %v5738_v24, %v5139_v23  ;;  %v609_v26 = vpop.f32.mrb[7].mxu1 }
 0x3ea   :  { %v610_v27 = vadd.f32 %v5139_v23, %v609_v26 }
 0x3eb   :  { %v795_v29 = vmul.f32 0.35355338, %v615_v25 }
 0x3ec   :  { %v794_v28 = vmul.f32 0.35355338, %v610_v27 }
 0x3ee   :  { %5765 = vmatprep.mubr.msk.f32.mxu0 %vm337_vm1, %v794_v28 }
 0x3ef   :  { %5766 = vmatmul.mubr.msk.f32.vlgmr.msra.gmra.mrb[6].mxu0 %vm337_vm1, %v795_v29 }
 0x3f0   :  { %v5760_v54 = vpop.f32.mrb[8].mxu1  ;;  %5776 = vmatpush3.msra.mxu0 %v5164_v60 }
 0x3f1   :  { %v785_v56 = vpop.f32.mrb[9].mxu1  ;;  %v791_v57 = vadd.f32 %v5760_v54, %v5155_v55  ;;  %5780 = vmatprep.subr.mxu0 %v529_v3 }
 0x3f2   :  { %v786_v58 = vadd.f32 %v5155_v55, %v785_v56 }
 0x3f4   :  { %v6232_v59 = vpack.c.bf16 %v791_v57, %v786_v58 }
 0x3f6   :  { %6233 = vmatprep.subr.bf16.mxu1 %v6232_v59 }
 0x3f7   :  { %6235 = vmatpush3.bf16.msra.mxu1 %v6232_v59  ;;  %v5190_v59 = vld [vmem:[%s7571_s7 + $0x2] ss:$0 sm:$0xff] }
 0x3f8   :  { %6237 = vmatprep.subr.bf16.mxu1 %v6236_v6 }
 0x4c2   :  { %v5767_v38 = vpop.f32.mrb[6].mxu0 }
 0x4c3   :  { %v880_v39 = vadd.f32 %v5767_v38, %v6819_v36  ;;  %v874_v40 = vpop.f32.mrb[7].mxu0  ;;  %v5187_v38 = vld [vmem:[%s7570_s6 + $0x50] sm:$0xff] }
 0x4c4   :  { %v875_v41 = vadd.f32 %v874_v40, %v6814_v34  ;;  %v5188_v40 = vld [vmem:[%s7570_s6 + $0x58] sm:$0xff] }
 0x4c5   :  { %v886_v42 = vsel %vm425_vm3, %v880_v39, -inf }
 0x4c6   :  { %887 = vmax.xlane.f32.xlu1 %v886_v42  ;;  %v883_v43 = vsel %vm425_vm3, %v875_v41, -inf }
 0x4c7   :  { %884 = vmax.xlane.f32.xlu0 %v883_v43 }
 0x553   :  { %v888_v44 = vpop.xlane.xlu1 %887 }
 0x554   :  { %v890_v45 = vsub.f32 %v880_v39, %v888_v44  ;;  %v885_v46 = vpop.xlane.xlu0 %884  ;;  %v6252_v39 = vpack.c.bf16 %v5186_v37, %v5185_v35 }
 0x555   :  { %v889_v47 = vsub.f32 %v875_v41, %v885_v46  ;;  %v6256_v41 = vpack.c.bf16 %v5188_v40, %v5187_v38  ;;  %v5219_v40 = vld [vmem:[%s7570_s6 + $0x68] sm:$0xff] }
 0x556   :  { %v893_v48 = vmul.f32 1.442695, %v890_v45 }
 0x557   :  { %v891_v49 = vmul.f32 1.442695, %v889_v47 }
 0x558   :  { %6519 = vpow2.f32 %v893_v48 }
 0x559   :  { %6521 = vpow2.f32 %v891_v49 }
 0x562   :  { %v6520_v50 = vpop.eup %6519 }
 0x563   :  { %v6522_v51 = vpop.eup %6521  ;;  %v898_v52 = vsel %vm425_vm3, %v6520_v50, 0.0 }
 0x564   :  { %899 = vadd.xlane.f32.xlu1 %v898_v52  ;;  %v895_v53 = vsel %vm425_vm3, %v6522_v51, 0.0 }
 0x565   :  { %896 = vadd.xlane.f32.xlu0 %v895_v53 }
 0x5f1   :  { %v900_v61 = vpop.xlane.xlu1 %899 }
 0x5f2   :  { %6523 = vrcp.f32 %v900_v61  ;;  %v897_v62 = vpop.xlane.xlu0 %896 }
 0x5f3   :  { %6525 = vrcp.f32 %v897_v62 }
 0x5fc   :  { %v6524_v63 = vpop.eup %6523 }
 0x5fd   :  { %v6526_v0 = vpop.eup %6525  ;;  %v904_v2 = vmul.f32 %v6524_v63, %v6520_v50 }
 0x5fe   :  { %v903_v1 = vmul.f32 %v6526_v0, %v6522_v51  ;;  %v5199_v0 = vld [vmem:[%s7572_s8 + $0x10] sm:$0xff] }
 0x600   :  { %5772 = vmatprep.mubr.msk.f32.mxu1 %vm425_vm3, %v903_v1 }
 0x601   :  { %5773 = vmatmul.mubr.msk.f32.vlgmr.msra.gmra.mrb[10].mxu1 %vm425_vm3, %v904_v2 }
 0x602   :  { %5793 = vmatprep.mubr.msk.f32.mxu1 %vm81_vm0, %v6754_v9  ;;  %6239 = vmatpush3.bf16.msra.mxu1 %v6236_v6 }
 0x603   :  { %6241 = vmatprep.subr.bf16.mxu1 %v6240_v10 }
 0x606   :  { %6243 = vmatpush3.bf16.msra.mxu1 %v6240_v10  ;;  %v6278_v10 = vpack.c.bf16 %v5211_v8, %v5210_v7 }
 0x607   :  { %6253 = vmatprep.subr.bf16.mxu1 %v6252_v39 }
 0x609   :  { %5794 = vmatmul.mubr.msk.f32.vlgmr.msra.gmra.mrb[12].mxu1 %vm81_vm0, %v6769_v13 }
 0x60a   :  { %5815 = vmatprep.mubr.msk.f32.mxu1 %vm81_vm0, %v6754_v9  ;;  %6255 = vmatpush3.bf16.msra.mxu1 %v6252_v39  ;;  %v5218_v39 = vld [vmem:[%s7570_s6 + $0x60] sm:$0xff] }
 0x60b   :  { %6257 = vmatprep.subr.bf16.mxu1 %v6256_v41 }
 0x60e   :  { %6259 = vmatpush3.bf16.msra.mxu1 %v6256_v41  ;;  %v5220_v41 = vld [vmem:[%s7570_s6 + $0x70] sm:$0xff] }
 0x611   :  { %5816 = vmatmul.mubr.msk.f32.vlgmr.msra.gmra.mrb[14].mxu1 %vm81_vm0, %v6769_v13 }
 0x6d4   :  { %v5774_v14 = vpop.f32.mrb[10].mxu1 }
 0x6d5   :  { %v977_v15 = vpop.f32.mrb[11].mxu1 }
 0x6d6   :  { %5777 = vmatprep.mubr.msk.f32.mxu0 %vm337_vm1, %v977_v15  ;;  %v5204_v15 = vld [vmem:[%s7596_s29 + $0x70] sm:$0xff] }
 0x6d7   :  { %5778 = vmatmul.mubr.msk.f32.vlgmr.msra.gmra.mrb[8].mxu0 %vm337_vm1, %v5774_v14  ;;  %v6270_v14 = vpack.c.bf16 %v5203_v12, %v5202_v11  ;;  %v5235_v11 = vld [vmem:[%s7573_s9] ss:$0 sm:$0xff] }
 0x6d8   :  { %5781 = vmatpush3.msra.mxu0 %v529_v3  ;;  %5782 = vmatprep.mubr.msk.f32.mxu0 %vm337_vm1, %v6873_v21  ;;  %v5174_v21 = vld [vmem:[%s7598_s21 + $0x2] ss:$0 sm:$0xff] }
 0x6d9   :  { %6245 = vmatprep.subr.bf16.mxu0 %v6244_v16 }
 0x6dc   :  { %v5795_v23 = vpop.f32.mrb[12].mxu1 }
 0x6dd   :  { %v1235_v24 = vadd.f32 %v5795_v23, %v5174_v21  ;;  %v1229_v25 = vpop.f32.mrb[13].mxu1 }
 0x6de   :  { %v1230_v26 = vadd.f32 %v5174_v21, %v1229_v25  ;;  %v5207_v25 = vld [vmem:[%s7598_s21 + $0x3] ss:$0 sm:$0xff] }
 0x6df   :  { %5783 = vmatmul.mubr.msk.f32.vlgmr.msra.gmra.mrb[8].mxu0 %vm337_vm1, %v6871_v20  ;;  %v5182_v20 = vld [vmem:[%s7569_s5 + $0x2] ss:$0 sm:$0xff]  ;;  %v1415_v33 = vmul.f32 0.35355338, %v1235_v24 }
 0x6e0   :  { %6247 = vmatpush3.bf16.msra.mxu0 %v6244_v16  ;;  %5804 = vmatprep.mubr.msk.f32.mxu0 %vm81_vm0, %v6754_v9  ;;  %v1414_v27 = vmul.f32 0.35355338, %v1230_v26  ;;  %v5205_v16 = vld [vmem:[%s7596_s29 + $0x78] sm:$0xff] }
 0x6e1   :  { %6249 = vmatprep.subr.bf16.mxu0 %v6248_v19  ;;  %v6274_v17 = vpack.c.bf16 %v5205_v16, %v5204_v15 }
 0x6e4   :  { %6251 = vmatpush3.bf16.msra.mxu0 %v6248_v19  ;;  %v5817_v58 = vpop.f32.mrb[14].mxu1  ;;  %v5213_v19 = vld [vmem:[%s7595_s23 + $0x78] sm:$0xff] }
 0x6e5   :  { %v1405_v60 = vpop.f32.mrb[15].mxu1  ;;  %v1411_v61 = vadd.f32 %v5817_v58, %v5190_v59  ;;  %v6282_v24 = vpack.c.bf16 %v5213_v19, %v5212_v18 }
 0x6e6   :  { %v1406_v62 = vadd.f32 %v5190_v59, %v1405_v60  ;;  %v5223_v60 = vld [vmem:[%s7571_s7 + $0x3] ss:$0 sm:$0xff] }
 0x6e7   :  { %5805 = vmatmul.mubr.msk.f32.vlgmr.msra.gmra.mrb[10].mxu0 %vm81_vm0, %v6769_v13 }
 0x6e8   :  { %5822 = vmatprep.mubr.msk.f32.mxu0 %vm337_vm1, %v1414_v27  ;;  %v6266_v63 = vpack.c.bf16 %v1411_v61, %v1406_v62 }
 0x6ea   :  { %6267 = vmatprep.subr.bf16.mxu1 %v6266_v63 }
 0x6eb   :  { %6269 = vmatpush3.bf16.msra.mxu1 %v6266_v63 }
 0x6ec   :  { %6271 = vmatprep.subr.bf16.mxu1 %v6270_v14 }
 0x7ba   :  { %v5806_v28 = vpop.f32.mrb[10].mxu0 }
 0x7bb   :  { %v1323_v29 = vadd.f32 %v5806_v28, %v5182_v20  ;;  %v1317_v30 = vpop.f32.mrb[11].mxu0 }
 0x7bc   :  { %v1318_v31 = vadd.f32 %v5182_v20, %v1317_v30  ;;  %v5215_v30 = vld [vmem:[%s7569_s5 + $0x3] ss:$0 sm:$0xff] }
 0x7be   :  { %v6260_v32 = vpack.c.bf16 %v1323_v29, %v1318_v31 }
 0x7c0   :  { %6262 = vmatprep.subr.msk.bf16.mxu0 %vm6785_vm2, %v6260_v32 }
 0x7c1   :  { %6265 = vmatpush3.bf16.xpose.msk.msra.mxu0 %vm6785_vm2, %v6260_v32 }
 0x7c2   :  { %5832 = vmatprep.subr.mxu0 %v5199_v0 }
 0x7c8   :  { %5823 = vmatmul.mubr.msk.f32.vlgmr.msra.gmra.mrb[12].mxu0 %vm337_vm1, %v1415_v33 }
 0x7c9   :  { %5833 = vmatpush3.msra.mxu0 %v5199_v0 }
 0x7ca   :  { %6279 = vmatprep.subr.bf16.mxu0 %v6278_v10 }
 0x89b   :  { %v5824_v42 = vpop.f32.mrb[12].mxu0 }
 0x89c   :  { %v1500_v43 = vadd.f32 %v5824_v42, %v6819_v36  ;;  %v1494_v44 = vpop.f32.mrb[13].mxu0  ;;  %v6286_v42 = vpack.c.bf16 %v5219_v40, %v5218_v39  ;;  %v2383_v39 = vld [vmem:[%s7578_s14 + $0x8] sm:$0xff]  ;;  %v2384_v40 = vld [vmem:[%s7578_s14 + $0x10] sm:$0xff] }
 0x89d   :  { %v1495_v45 = vadd.f32 %v1494_v44, %v6814_v34 }
 0x89e   :  { %v1506_v46 = vsel %vm425_vm3, %v1500_v43, -inf }
 0x89f   :  { %1507 = vmax.xlane.f32.xlu1 %v1506_v46  ;;  %v1503_v47 = vsel %vm425_vm3, %v1495_v45, -inf }
 0x8a0   :  { %1504 = vmax.xlane.f32.xlu0 %v1503_v47 }
 0x92c   :  { %v1508_v48 = vpop.xlane.xlu1 %1507 }
 0x92d   :  { %v1510_v49 = vsub.f32 %v1500_v43, %v1508_v48  ;;  %v1505_v50 = vpop.xlane.xlu0 %1504  ;;  %v5221_v43 = vld [vmem:[%s7570_s6 + $0x78] sm:$0xff] }
 0x92e   :  { %v1509_v51 = vsub.f32 %v1495_v45, %v1505_v50  ;;  %v6290_v44 = vpack.c.bf16 %v5221_v43, %v5220_v41 }
 0x92f   :  { %v1513_v52 = vmul.f32 1.442695, %v1510_v49 }
 0x930   :  { %v1511_v53 = vmul.f32 1.442695, %v1509_v51 }
 0x931   :  { %6527 = vpow2.f32 %v1513_v52 }
 0x932   :  { %6529 = vpow2.f32 %v1511_v53 }
 0x93b   :  { %v6528_v54 = vpop.eup %6527 }
 0x93c   :  { %v6530_v55 = vpop.eup %6529  ;;  %v1518_v56 = vsel %vm425_vm3, %v6528_v54, 0.0 }
 0x93d   :  { %1519 = vadd.xlane.f32.xlu1 %v1518_v56  ;;  %v1515_v57 = vsel %vm425_vm3, %v6530_v55, 0.0 }
 0x93e   :  { %1516 = vadd.xlane.f32.xlu0 %v1515_v57 }
 0x9ca   :  { %v1520_v1 = vpop.xlane.xlu1 %1519 }
 0x9cb   :  { %6531 = vrcp.f32 %v1520_v1  ;;  %v1517_v2 = vpop.xlane.xlu0 %1516  ;;  %v5232_v1 = vld [vmem:[%s7572_s8 + $0x18] sm:$0xff] }
 0x9cc   :  { %6533 = vrcp.f32 %v1517_v2 }
 0x9d5   :  { %v6532_v3 = vpop.eup %6531 }
 0x9d6   :  { %v6534_v4 = vpop.eup %6533  ;;  %v1524_v6 = vmul.f32 %v6532_v3, %v6528_v54 }
 0x9d7   :  { %v1523_v5 = vmul.f32 %v6534_v4, %v6530_v55 }
 0x9d9   :  { %5829 = vmatprep.mubr.msk.f32.mxu1 %vm425_vm3, %v1523_v5 }
 0x9da   :  { %5830 = vmatmul.mubr.msk.f32.vlgmr.msra.gmra.mrb[16].mxu1 %vm425_vm3, %v1524_v6 }
 0x9db   :  { %5845 = vmatprep.mubr.msk.f32.mxu1 %vm81_vm0, %v6754_v9  ;;  %6273 = vmatpush3.bf16.msra.mxu1 %v6270_v14 }
 0x9dc   :  { %6275 = vmatprep.subr.bf16.mxu1 %v6274_v17 }
 0x9df   :  { %6277 = vmatpush3.bf16.msra.mxu1 %v6274_v17 }
 0x9e0   :  { %6287 = vmatprep.subr.bf16.mxu1 %v6286_v42 }
 0x9e2   :  { %5846 = vmatmul.mubr.msk.f32.vlgmr.msra.gmra.mrb[18].mxu1 %vm81_vm0, %v6769_v13 }
 0x9e3   :  { %5867 = vmatprep.mubr.msk.f32.mxu1 %vm81_vm0, %v6754_v9  ;;  %6289 = vmatpush3.bf16.msra.mxu1 %v6286_v42  ;;  %v2385_v42 = vld [vmem:[%s7578_s14 + $0x18] sm:$0xff] }
 0x9e4   :  { %6291 = vmatprep.subr.bf16.mxu1 %v6290_v44  ;;  %v6316_v43 = vpack.c.bf16 %v2385_v42, %v2384_v40  ;;  %v5255_v42 = vld [vmem:[%s7595_s23 + $0x88] sm:$0xff] }
 0x9e7   :  { %6293 = vmatpush3.bf16.msra.mxu1 %v6290_v44  ;;  %v2386_v44 = vld [vmem:[%s7578_s14 + $0x20] sm:$0xff] }
 0x9ea   :  { %5868 = vmatmul.mubr.msk.f32.vlgmr.msra.gmra.mrb[20].mxu1 %vm81_vm0, %v6769_v13 }
 0xaad   :  { %v5831_v21 = vpop.f32.mrb[16].mxu1 }
 0xaae   :  { %v1597_v23 = vpop.f32.mrb[17].mxu1 }
 0xaaf   :  { %5834 = vmatprep.mubr.msk.f32.mxu0 %vm337_vm1, %v1597_v23 }
 0xab0   :  { %5835 = vmatmul.mubr.msk.f32.vlgmr.msra.gmra.mrb[8].mxu0 %vm337_vm1, %v5831_v21 }
 0xab1   :  { %6281 = vmatpush3.bf16.msra.mxu0 %v6278_v10  ;;  %5856 = vmatprep.mubr.msk.f32.mxu0 %vm81_vm0, %v6754_v9 }
 0xab2   :  { %6283 = vmatprep.subr.bf16.mxu0 %v6282_v24 }
 0xab5   :  { %6285 = vmatpush3.bf16.msra.mxu0 %v6282_v24  ;;  %v5847_v26 = vpop.f32.mrb[18].mxu1 }
 0xab6   :  { %v1776_v27 = vadd.f32 %v5847_v26, %v5207_v25  ;;  %v1770_v20 = vpop.f32.mrb[19].mxu1 }
 0xab7   :  { %v1771_v28 = vadd.f32 %v5207_v25, %v1770_v20 }
 0xab8   :  { %5857 = vmatmul.mubr.msk.f32.vlgmr.msra.gmra.mrb[14].mxu0 %vm81_vm0, %v6769_v13  ;;  %v1956_v38 = vmul.f32 0.35355338, %v1776_v27 }
 0xab9   :  { %v1955_v29 = vmul.f32 0.35355338, %v1771_v28 }
 0xabb   :  { %5874 = vmatprep.mubr.msk.f32.mxu0 %vm337_vm1, %v1955_v29 }
 0xabd   :  { %v5869_v59 = vpop.f32.mrb[20].mxu1 }
 0xabe   :  { %v1946_v61 = vpop.f32.mrb[21].mxu1  ;;  %v1952_v62 = vadd.f32 %v5869_v59, %v5223_v60 }
 0xabf   :  { %v1947_v63 = vadd.f32 %v5223_v60, %v1946_v61  ;;  %v2388_v61 = vld [vmem:[%s7578_s14 + $0x30] sm:$0xff] }
 0xac1   :  { %v6300_v0 = vpack.c.bf16 %v1952_v62, %v1947_v63  ;;  %v2389_v62 = vld [vmem:[%s7578_s14 + $0x38] sm:$0xff] }
 0xac2   :  { %v6324_v63 = vpack.c.bf16 %v2389_v62, %v2388_v61  ;;  %v5267_v61 = vld [vmem:[%s7571_s7 + $0x4] ss:$0 sm:$0xff] }
 0xac3   :  { %6301 = vmatprep.subr.bf16.mxu1 %v6300_v0  ;;  %v5251_v62 = vld [vmem:[%s7598_s21 + $0x4] ss:$0 sm:$0xff] }
 0xac4   :  { %6303 = vmatpush3.bf16.msra.mxu1 %v6300_v0  ;;  %v5238_v0 = vld [vmem:[%s7577_s13] ss:$0 sm:$0xff] }
 0xb8b   :  { %v5858_v31 = vpop.f32.mrb[14].mxu0 }
 0xb8c   :  { %v1864_v32 = vadd.f32 %v5858_v31, %v5215_v30  ;;  %v1858_v33 = vpop.f32.mrb[15].mxu0  ;;  %v2289_v31 = vld [vmem:[%s7576_s12 + $0x8] sm:$0xff] }
 0xb8d   :  { %v1859_v35 = vadd.f32 %v5215_v30, %v1858_v33  ;;  %v2290_v33 = vld [vmem:[%s7576_s12 + $0x10] sm:$0xff] }
 0xb8f   :  { %v6294_v37 = vpack.c.bf16 %v1864_v32, %v1859_v35  ;;  %v2291_v35 = vld [vmem:[%s7576_s12 + $0x18] sm:$0xff] }
 0xb91   :  { %6296 = vmatprep.subr.msk.bf16.mxu0 %vm6785_vm2, %v6294_v37 }
 0xb92   :  { %6299 = vmatpush3.bf16.xpose.msk.msra.mxu0 %vm6785_vm2, %v6294_v37  ;;  %v6308_v37 = vpack.c.bf16 %v2291_v35, %v2290_v33  ;;  %v5248_v33 = vld [vmem:[%s7596_s29 + $0x90] sm:$0xff]  ;;  %v5249_v35 = vld [vmem:[%s7596_s29 + $0x98] sm:$0xff] }
 0xb93   :  { %5884 = vmatprep.subr.mxu0 %v5232_v1 }
 0xb99   :  { %5875 = vmatmul.mubr.msk.f32.vlgmr.msra.gmra.mrb[16].mxu0 %vm337_vm1, %v1956_v38  ;;  %v2382_v38 = vld [vmem:[%s7578_s14] sm:$0xff] }
 0xb9a   :  { %5885 = vmatpush3.msra.mxu0 %v5232_v1  ;;  %v6312_v41 = vpack.c.bf16 %v2383_v39, %v2382_v38  ;;  %v5264_v38 = vld [vmem:[%s7570_s6 + $0x90] sm:$0xff]  ;;  %v5265_v39 = vld [vmem:[%s7570_s6 + $0x98] sm:$0xff] }
 0xb9b   :  { %v6348_v40 = vpack.c.bf16 %v5265_v39, %v5264_v38  ;;  %v5282_v39 = vld [vmem:[%s7598_s21 + $0x5] ss:$0 sm:$0xff] }
 0xb9c   :  { %6313 = vmatprep.subr.bf16.mxu0 %v6312_v41 }
 0xc6c   :  { %v5876_v45 = vpop.f32.mrb[16].mxu0 }
 0xc6d   :  { %v2041_v46 = vadd.f32 %v5876_v45, %v6819_v36  ;;  %v2035_v47 = vpop.f32.mrb[17].mxu0  ;;  %v2387_v45 = vld [vmem:[%s7578_s14 + $0x28] sm:$0xff] }
 0xc6e   :  { %v2036_v48 = vadd.f32 %v2035_v47, %v6814_v34 }
 0xc6f   :  { %v2047_v49 = vsel %vm425_vm3, %v2041_v46, -inf }
 0xc70   :  { %2048 = vmax.xlane.f32.xlu1 %v2047_v49  ;;  %v2044_v50 = vsel %vm425_vm3, %v2036_v48, -inf }
 0xc71   :  { %2045 = vmax.xlane.f32.xlu0 %v2044_v50 }
 0xcfd   :  { %v2049_v51 = vpop.xlane.xlu1 %2048 }
 0xcfe   :  { %v2051_v52 = vsub.f32 %v2041_v46, %v2049_v51  ;;  %v2046_v53 = vpop.xlane.xlu0 %2045  ;;  %v6320_v46 = vpack.c.bf16 %v2387_v45, %v2386_v44 }
 0xcff   :  { %v2050_v54 = vsub.f32 %v2036_v48, %v2046_v53 }
 0xd00   :  { %v2054_v55 = vmul.f32 1.442695, %v2051_v52 }
 0xd01   :  { %v2052_v56 = vmul.f32 1.442695, %v2050_v54  ;;  %v5236_v54 = vld [vmem:[%s7574_s10] ss:$0 sm:$0xff] }
 0xd02   :  { %6535 = vpow2.f32 %v2054_v55 }
 0xd03   :  { %6537 = vpow2.f32 %v2052_v56 }
 0xd0c   :  { %v6536_v57 = vpop.eup %6535 }
 0xd0d   :  { %v6538_v58 = vpop.eup %6537  ;;  %v2059_v36 = vsel %vm425_vm3, %v6536_v57, 0.0 }
 0xd0e   :  { %2060 = vadd.xlane.f32.xlu1 %v2059_v36  ;;  %v2056_v34 = vsel %vm425_vm3, %v6538_v58, 0.0 }
 0xd0f   :  { %2057 = vadd.xlane.f32.xlu0 %v2056_v34 }
 0xd9b   :  { %v2061_v2 = vpop.xlane.xlu1 %2060 }
 0xd9c   :  { %6539 = vrcp.f32 %v2061_v2  ;;  %v2058_v3 = vpop.xlane.xlu0 %2057 }
 0xd9d   :  { %6541 = vrcp.f32 %v2058_v3 }
 0xda6   :  { %v6540_v4 = vpop.eup %6539 }
 0xda7   :  { %v6542_v5 = vpop.eup %6541  ;;  %v2065_v7 = vmul.f32 %v6540_v4, %v6536_v57 }
 0xda8   :  { %v2064_v6 = vmul.f32 %v6542_v5, %v6538_v58  ;;  %v5237_v58 = vld [vmem:[%s7575_s11] ss:$0 sm:$0xff] }
 0xdaa   :  { %5881 = vmatprep.mubr.msk.f32.mxu1 %vm425_vm3, %v2064_v6 }
 0xdab   :  { %5882 = vmatmul.mubr.msk.f32.vlgmr.msra.gmra.mrb[22].mxu1 %vm425_vm3, %v2065_v7  ;;  %v5241_v7 = vld [vmem:[%s7579_s15] ss:$0 sm:$0xff] }
 0xe7e   :  { %v5883_v8 = vpop.f32.mrb[22].mxu1 }
 0xe7f   :  { %v2138_v10 = vpop.f32.mrb[23].mxu1 }
 0xe80   :  { %5886 = vmatprep.mubr.msk.f32.mxu0 %vm337_vm1, %v2138_v10 }
 0xe81   :  { %5887 = vmatmul.mubr.msk.f32.vlgmr.msra.gmra.mrb[8].mxu0 %vm337_vm1, %v5883_v8 }
 0xe82   :  { %6315 = vmatpush3.bf16.msra.mxu0 %v6312_v41  ;;  %v5254_v41 = vld [vmem:[%s7595_s23 + $0x80] sm:$0xff] }
 0xe83   :  { %6317 = vmatprep.subr.bf16.mxu0 %v6316_v43 }
 0xe86   :  { %6319 = vmatpush3.bf16.msra.mxu0 %v6316_v43  ;;  %v6336_v43 = vpack.c.bf16 %v5255_v42, %v5254_v41 }
 0xe87   :  { %6321 = vmatprep.subr.bf16.mxu0 %v6320_v46 }
 0xe8a   :  { %6323 = vmatpush3.bf16.msra.mxu0 %v6320_v46 }
 0xe8b   :  { %6325 = vmatprep.subr.bf16.mxu0 %v6324_v63 }
 0xe8e   :  { %6327 = vmatpush3.bf16.msra.mxu0 %v6324_v63 }
 0xf54   :  { %v5888_v12 = vpop.f32.mrb[8].mxu0 }
 0xf55   :  { %v2240_v14 = vadd.f32 %v5888_v12, %v5235_v11  ;;  %v2221_v15 = vpop.f32.mrb[9].mxu0 }
 0xf56   :  { %v2239_v16 = vadd.f32 %v5235_v11, %v2221_v15 }
 0xf57   :  { %v2242_v17 = vadd.f32 %v2240_v14, %v6769_v13 }
 0xf58   :  { %v2241_v18 = vadd.f32 %v2239_v16, %v6754_v9  ;;  %v2288_v9 = vld [vmem:[%s7576_s12] sm:$0xff] }
 0xf59   :  { %v2248_v19 = vsel %vm81_vm0, %v2242_v17, 0.0  ;;  %v6304_v32 = vpack.c.bf16 %v2289_v31, %v2288_v9  ;;  %v5262_v9 = vld [vmem:[%s7570_s6 + $0x80] sm:$0xff]  ;;  %v5263_v31 = vld [vmem:[%s7570_s6 + $0x88] sm:$0xff] }
 0xf5a   :  { %2249 = vadd.xlane.f32.xlu1 %v2248_v19  ;;  %v2245_v21 = vsel %vm81_vm0, %v2241_v18, 0.0 }
 0xf5b   :  { %2246 = vadd.xlane.f32.xlu0 %v2245_v21  ;;  %6305 = vmatprep.subr.bf16.mxu1 %v6304_v32 }
 0xf5c   :  { %6307 = vmatpush3.bf16.msra.mxu1 %v6304_v32  ;;  %v6344_v32 = vpack.c.bf16 %v5263_v31, %v5262_v9  ;;  %v7242_v9 = vld [vmem:[%s7601_s30 + $0x8] sm:$0xff] }
 0xf5d   :  { %6309 = vmatprep.subr.bf16.mxu1 %v6308_v37 }
 0xf5e   :  { %6345 = vmatprep.subr.bf16.mxu0 %v6344_v32 }
 0xf60   :  { %6311 = vmatpush3.bf16.msra.mxu1 %v6308_v37  ;;  %v6332_v37 = vpack.c.bf16 %v5249_v35, %v5248_v33  ;;  %v7248_v33 = vld [vmem:[%s7601_s30] sm:$0xff] }
 0xfe7   :  { %v2250_v23 = vpop.xlane.xlu1 %2249 }
 0xfe8   :  { %v2253_v24 = vmul.f32 0.03125, %v2250_v23  ;;  %v2247_v25 = vpop.xlane.xlu0 %2246 }
 0xfe9   :  { %v2252_v26 = vmul.f32 0.03125, %v2247_v25 }
 0xfea   :  { %v2255_v27 = vsub.f32 %v2242_v17, %v2253_v24 }
 0xfeb   :  { %v2254_v20 = vsub.f32 %v2241_v18, %v2252_v26 }
 0xfec   :  { %v2257_v28 = vmul.f32 %v2255_v27, %v2255_v27 }
 0xfed   :  { %v2256_v29 = vmul.f32 %v2254_v20, %v2254_v20 }
 0xfee   :  { %v2261_v30 = vsel %vm81_vm0, %v2257_v28, 0.0 }
 0xfef   :  { %2262 = vadd.xlane.f32.xlu1 %v2261_v30  ;;  %v2258_v13 = vsel %vm81_vm0, %v2256_v29, 0.0  ;;  %v5246_v29 = vld [vmem:[%s7596_s29 + $0x80] sm:$0xff]  ;;  %v5247_v30 = vld [vmem:[%s7596_s29 + $0x88] sm:$0xff] }
 0xff0   :  { %2259 = vadd.xlane.f32.xlu0 %v2258_v13  ;;  %v6328_v13 = vpack.c.bf16 %v5247_v30, %v5246_v29  ;;  %v5296_v29 = vld [vmem:[%s7570_s6 + $0xb8] sm:$0xff] }
 0xff2   :  { %6329 = vmatprep.subr.bf16.mxu1 %v6328_v13 }
0x107c   :  { %v2263_v47 = vpop.xlane.xlu1 %2262 }
0x107d   :  { %v2265_v48 = vmul.f32 0.03125, %v2263_v47  ;;  %v2260_v49 = vpop.xlane.xlu0 %2259 }
0x107e   :  { %v2264_v50 = vmul.f32 0.03125, %v2260_v49 }
0x107f   :  { %v2267_v51 = vadd.f32 1e-05, %v2265_v48 }
0x1080   :  { %v2266_v52 = vadd.f32 1e-05, %v2264_v50 }
0x1081   :  { %6543 = vrsqrt.f32 %v2267_v51  ;;  %v5244_v51 = vld [vmem:[%s7580_s16] ss:$0 sm:$0xff] }
0x1082   :  { %6545 = vrsqrt.f32 %v2266_v52 }
0x108b   :  { %v6544_v53 = vpop.eup %6543 }
0x108c   :  { %v6546_v55 = vpop.eup %6545  ;;  %v2271_v56 = vmul.f32 %v6544_v53, %v2255_v27 }
0x108d   :  { %v2270_v57 = vmul.f32 %v6546_v55, %v2254_v20  ;;  %v5245_v55 = vld [vmem:[%s7581_s17] ss:$0 sm:$0xff] }
0x108e   :  { %v2279_v36 = vmul.f32 %v5236_v54, %v2271_v56 }
0x108f   :  { %v2278_v34 = vmul.f32 %v5236_v54, %v2270_v57 }
0x1090   :  { %v2287_v60 = vadd.f32 %v5237_v58, %v2279_v36  ;;  %v5257_v36 = vld [vmem:[%s7595_s23 + $0x98] sm:$0xff] }
0x1091   :  { %v2286_v59 = vadd.f32 %v5237_v58, %v2278_v34  ;;  %v5256_v58 = vld [vmem:[%s7595_s23 + $0x90] sm:$0xff] }
0x1093   :  { %5897 = vmatprep.mubr.msk.f32.mxu1 %vm81_vm0, %v2286_v59 }
0x1094   :  { %5898 = vmatmul.mubr.msk.f32.vlgmr.msra.gmra.mrb[24].mxu1 %vm81_vm0, %v2287_v60 }
0x1095   :  { %6331 = vmatpush3.bf16.msra.mxu1 %v6328_v13 }
0x1096   :  { %6333 = vmatprep.subr.bf16.mxu1 %v6332_v37 }
0x1099   :  { %6335 = vmatpush3.bf16.msra.mxu1 %v6332_v37 }
0x109a   :  { %6337 = vmatprep.subr.bf16.mxu1 %v6336_v43 }
0x1167   :  { %v5899_v1 = vpop.f32.mrb[24].mxu1 }
0x1168   :  { %v2377_v2 = vadd.f32 %v5899_v1, %v5238_v0  ;;  %v2371_v3 = vpop.f32.mrb[25].mxu1 }
0x1169   :  { %v2372_v4 = vadd.f32 %v5238_v0, %v2371_v3 }
0x116a   :  { %v2381_v6 = vmax.f32 %v2377_v2, 0.0 }
0x116b   :  { %v2380_v5 = vmax.f32 %v2372_v4, 0.0 }
0x116d   :  { %5916 = vmatprep.mubr.msk.f32.mxu0 %vm2397_vm4, %v2380_v5 }
0x116e   :  { %5917 = vmatmul.mubr.msk.f32.vlgmr.msra.gmra.mrb[18].mxu0 %vm2397_vm4, %v2381_v6 }
0x116f   :  { %6347 = vmatpush3.bf16.msra.mxu0 %v6344_v32 }
0x1170   :  { %6349 = vmatprep.subr.bf16.mxu0 %v6348_v40 }
0x1173   :  { %6351 = vmatpush3.bf16.msra.mxu0 %v6348_v40 }
0x1241   :  { %v5918_v8 = vpop.f32.mrb[18].mxu0 }
0x1242   :  { %v2476_v10 = vadd.f32 %v5918_v8, %v5241_v7  ;;  %v2470_v11 = vpop.f32.mrb[19].mxu0  ;;  %v5259_v8 = vld [vmem:[%s7569_s5 + $0x4] ss:$0 sm:$0xff] }
0x1243   :  { %v2471_v12 = vadd.f32 %v5241_v7, %v2470_v11 }
0x1244   :  { %v2480_v14 = vadd.f32 %v2476_v10, %v2287_v60  ;;  %v6340_v60 = vpack.c.bf16 %v5257_v36, %v5256_v58  ;;  %v5285_v36 = vld [vmem:[%s7595_s23 + $0xa0] sm:$0xff] }
0x1245   :  { %v2479_v15 = vadd.f32 %v2471_v12, %v2286_v59 }
0x1246   :  { %v2486_v16 = vsel %vm81_vm0, %v2480_v14, 0.0 }
0x1247   :  { %2487 = vadd.xlane.f32.xlu1 %v2486_v16  ;;  %v2483_v17 = vsel %vm81_vm0, %v2479_v15, 0.0 }
0x1248   :  { %2484 = vadd.xlane.f32.xlu0 %v2483_v17 }
0x12d4   :  { %v2488_v18 = vpop.xlane.xlu1 %2487 }
0x12d5   :  { %v2490_v19 = vmul.f32 0.03125, %v2488_v18  ;;  %v2485_v21 = vpop.xlane.xlu0 %2484 }
0x12d6   :  { %v2489_v23 = vmul.f32 0.03125, %v2485_v21  ;;  %v5279_v21 = vld [vmem:[%s7596_s29 + $0xb0] sm:$0xff] }
0x12d7   :  { %v2492_v24 = vsub.f32 %v2480_v14, %v2490_v19  ;;  %v5277_v14 = vld [vmem:[%s7596_s29 + $0xa0] sm:$0xff] }
0x12d8   :  { %v2491_v25 = vsub.f32 %v2479_v15, %v2489_v23  ;;  %v5278_v15 = vld [vmem:[%s7596_s29 + $0xa8] sm:$0xff]  ;;  %v5280_v23 = vld [vmem:[%s7596_s29 + $0xb8] sm:$0xff] }
0x12d9   :  { %v2494_v26 = vmul.f32 %v2492_v24, %v2492_v24  ;;  %v6362_v18 = vpack.c.bf16 %v5278_v15, %v5277_v14 }
0x12da   :  { %v2493_v27 = vmul.f32 %v2491_v25, %v2491_v25 }
0x12db   :  { %v2498_v20 = vsel %vm81_vm0, %v2494_v26, 0.0  ;;  %v5293_v26 = vld [vmem:[%s7570_s6 + $0xa0] sm:$0xff] }
0x12dc   :  { %2499 = vadd.xlane.f32.xlu1 %v2498_v20  ;;  %v2495_v28 = vsel %vm81_vm0, %v2493_v27, 0.0  ;;  %v5294_v27 = vld [vmem:[%s7570_s6 + $0xa8] sm:$0xff] }
0x12dd   :  { %2496 = vadd.xlane.f32.xlu0 %v2495_v28  ;;  %v6378_v20 = vpack.c.bf16 %v5294_v27, %v5293_v26  ;;  %v5295_v28 = vld [vmem:[%s7570_s6 + $0xb0] sm:$0xff] }
0x12de   :  { %v6382_v30 = vpack.c.bf16 %v5296_v29, %v5295_v28 }
0x1369   :  { %v2500_v44 = vpop.xlane.xlu1 %2499 }
0x136a   :  { %v2502_v45 = vmul.f32 0.03125, %v2500_v44  ;;  %v2497_v46 = vpop.xlane.xlu0 %2496 }
0x136b   :  { %v2501_v47 = vmul.f32 0.03125, %v2497_v46 }
0x136c   :  { %v2504_v48 = vadd.f32 1e-05, %v2502_v45 }
0x136d   :  { %v2503_v49 = vadd.f32 1e-05, %v2501_v47 }
0x136e   :  { %6547 = vrsqrt.f32 %v2504_v48 }
0x136f   :  { %6549 = vrsqrt.f32 %v2503_v49 }
0x1378   :  { %v6548_v50 = vpop.eup %6547 }
0x1379   :  { %v6550_v52 = vpop.eup %6549  ;;  %v2508_v53 = vmul.f32 %v6548_v50, %v2492_v24 }
0x137a   :  { %v2507_v54 = vmul.f32 %v6550_v52, %v2491_v25  ;;  %v6366_v25 = vpack.c.bf16 %v5280_v23, %v5279_v21 }
0x137b   :  { %v2516_v56 = vmul.f32 %v5244_v51, %v2508_v53 }
0x137c   :  { %v2515_v57 = vmul.f32 %v5244_v51, %v2507_v54 }
0x137d   :  { %v7178_v59 = vadd.f32 %v5245_v55, %v2516_v56 }
0x137e   :  { %v7176_v34 = vadd.f32 %v5245_v55, %v2515_v57 }
0x1380   :  { %5927 = vmatprep.mubr.msk.f32.mxu1 %vm81_vm0, %v7176_v34  ;;  %5949 = vmatprep.mubr.msk.f32.mxu0 %vm81_vm0, %v7176_v34 }
0x1381   :  { %5928 = vmatmul.mubr.msk.f32.vlgmr.msra.gmra.mrb[26].mxu1 %vm81_vm0, %v7178_v59  ;;  %5950 = vmatmul.mubr.msk.f32.vlgmr.msra.gmra.mrb[20].mxu0 %vm81_vm0, %v7178_v59 }
0x1382   :  { %6339 = vmatpush3.bf16.msra.mxu1 %v6336_v43  ;;  %5938 = vmatprep.mubr.msk.f32.mxu1 %vm81_vm0, %v7176_v34  ;;  %v5298_v43 = vld [vmem:[%s7571_s7 + $0x5] ss:$0 sm:$0xff] }
0x1383   :  { %6341 = vmatprep.subr.bf16.mxu1 %v6340_v60 }
0x1386   :  { %6343 = vmatpush3.bf16.msra.mxu1 %v6340_v60  ;;  %v5286_v60 = vld [vmem:[%s7595_s23 + $0xa8] sm:$0xff] }
0x1389   :  { %5939 = vmatmul.mubr.msk.f32.vlgmr.msra.gmra.mrb[28].mxu1 %vm81_vm0, %v7178_v59 }
0x1454   :  { %v5929_v63 = vpop.f32.mrb[26].mxu1  ;;  %v5951_v0 = vpop.f32.mrb[20].mxu0 }
0x1455   :  { %v2792_v1 = vadd.f32 %v5951_v0, %v5267_v61  ;;  %v2610_v2 = vpop.f32.mrb[27].mxu1  ;;  %v2786_v3 = vpop.f32.mrb[21].mxu0  ;;  %v2616_v19 = vadd.f32 %v5929_v63, %v5251_v62 }
0x1456   :  { %v2611_v4 = vadd.f32 %v5251_v62, %v2610_v2  ;;  %v2787_v5 = vadd.f32 %v5267_v61, %v2786_v3  ;;  %v6370_v61 = vpack.c.bf16 %v5286_v60, %v5285_v36  ;;  %v5288_v2 = vld [vmem:[%s7595_s23 + $0xb8] sm:$0xff]  ;;  %v5320_v36 = vld [vmem:[%s7595_s23 + $0xc0] sm:$0xff]  ;;  %v5321_v60 = vld [vmem:[%s7595_s23 + $0xc8] sm:$0xff] }
0x1457   :  { %v2796_v24 = vmul.f32 0.35355338, %v2616_v19 }
0x1458   :  { %v2795_v6 = vmul.f32 0.35355338, %v2611_v4  ;;  %v6358_v7 = vpack.c.bf16 %v2792_v1, %v2787_v5  ;;  %v5287_v1 = vld [vmem:[%s7595_s23 + $0xb0] sm:$0xff] }
0x145a   :  { %5956 = vmatprep.mubr.msk.f32.mxu1 %vm337_vm1, %v2795_v6  ;;  %6359 = vmatprep.subr.bf16.mxu0 %v6358_v7  ;;  %v6374_v6 = vpack.c.bf16 %v5288_v2, %v5287_v1  ;;  %v5322_v1 = vld [vmem:[%s7595_s23 + $0xd0] sm:$0xff]  ;;  %v5323_v2 = vld [vmem:[%s7595_s23 + $0xd8] sm:$0xff] }
0x145b   :  { %6361 = vmatpush3.bf16.msra.mxu0 %v6358_v7 }
0x145c   :  { %v5940_v10 = vpop.f32.mrb[28].mxu1  ;;  %6371 = vmatprep.subr.bf16.mxu0 %v6370_v61 }
0x145d   :  { %v2704_v11 = vadd.f32 %v5940_v10, %v5259_v8  ;;  %v2698_v12 = vpop.f32.mrb[29].mxu1 }
0x145e   :  { %v2699_v16 = vadd.f32 %v5259_v8, %v2698_v12  ;;  %v5290_v12 = vld [vmem:[%s7569_s5 + $0x5] ss:$0 sm:$0xff] }
0x1460   :  { %v6352_v17 = vpack.c.bf16 %v2704_v11, %v2699_v16 }
0x1462   :  { %6354 = vmatprep.subr.msk.bf16.mxu1 %vm6785_vm2, %v6352_v17 }
0x1463   :  { %6357 = vmatpush3.bf16.xpose.msk.msra.mxu1 %vm6785_vm2, %v6352_v17 }
0x1464   :  { %6363 = vmatprep.subr.bf16.mxu1 %v6362_v18 }
0x146a   :  { %5957 = vmatmul.mubr.msk.f32.vlgmr.msra.gmra.mrb[30].mxu1 %vm337_vm1, %v2796_v24 }
0x146b   :  { %6365 = vmatpush3.bf16.msra.mxu1 %v6362_v18  ;;  %5974 = vmatprep.mubr.msk.f32.mxu1 %vm81_vm0, %v7176_v34 }
0x146c   :  { %6367 = vmatprep.subr.bf16.mxu1 %v6366_v25 }
0x146f   :  { %6369 = vmatpush3.bf16.msra.mxu1 %v6366_v25 }
0x1470   :  { %6379 = vmatprep.subr.bf16.mxu1 %v6378_v20 }
0x1472   :  { %5975 = vmatmul.mubr.msk.f32.vlgmr.msra.gmra.mrb[32].mxu1 %vm81_vm0, %v7178_v59 }
0x1473   :  { %6381 = vmatpush3.bf16.msra.mxu1 %v6378_v20  ;;  %5996 = vmatprep.mubr.msk.f32.mxu1 %vm81_vm0, %v7176_v34 }
0x1474   :  { %6383 = vmatprep.subr.bf16.mxu1 %v6382_v30 }
0x1477   :  { %6385 = vmatpush3.bf16.msra.mxu1 %v6382_v30 }
0x147a   :  { %5997 = vmatmul.mubr.msk.f32.vlgmr.msra.gmra.mrb[34].mxu1 %vm81_vm0, %v7178_v59 }
0x153d   :  { %v5958_v13 = vpop.f32.mrb[30].mxu1 }
0x153e   :  { %v2881_v31 = vadd.f32 %v7242_v9, %v5958_v13  ;;  %v2875_v32 = vpop.f32.mrb[31].mxu1 }
0x153f   :  { %v2876_v35 = vadd.f32 %v7248_v33, %v2875_v32 }
0x1540   :  { %v2887_v37 = vsel %vm425_vm3, %v2881_v31, -inf }
0x1541   :  { %2888 = vmax.xlane.f32.xlu1 %v2887_v37  ;;  %v2884_v38 = vsel %vm425_vm3, %v2876_v35, -inf }
0x1542   :  { %2885 = vmax.xlane.f32.xlu0 %v2884_v38 }
0x1545   :  { %v5976_v40 = vpop.f32.mrb[32].mxu1 }
0x1546   :  { %v3074_v41 = vadd.f32 %v5976_v40, %v5282_v39  ;;  %v3068_v42 = vpop.f32.mrb[33].mxu1  ;;  %v5313_v40 = vld [vmem:[%s7596_s29 + $0xc8] sm:$0xff] }
0x1547   :  { %v3069_v7 = vadd.f32 %v5282_v39, %v3068_v42  ;;  %v5312_v39 = vld [vmem:[%s7596_s29 + $0xc0] sm:$0xff]  ;;  %v5307_v42 = vld [vmem:[%s7572_s8 + $0x28] sm:$0xff] }
0x1548   :  { %v3254_v19 = vmul.f32 0.35355338, %v3074_v41  ;;  %v6396_v41 = vpack.c.bf16 %v5313_v40, %v5312_v39 }
0x1549   :  { %v3253_v8 = vmul.f32 0.35355338, %v3069_v7 }
0x154d   :  { %v5998_v44 = vpop.f32.mrb[34].mxu1 }
0x154e   :  { %v3250_v45 = vadd.f32 %v5998_v44, %v5298_v43  ;;  %v3244_v46 = vpop.f32.mrb[35].mxu1 }
0x154f   :  { %v3245_v47 = vadd.f32 %v5298_v43, %v3244_v46  ;;  %v5314_v46 = vld [vmem:[%s7596_s29 + $0xd0] sm:$0xff] }
0x1551   :  { %v6392_v48 = vpack.c.bf16 %v3250_v45, %v3245_v47  ;;  %v5315_v47 = vld [vmem:[%s7596_s29 + $0xd8] sm:$0xff] }
0x1553   :  { %6393 = vmatprep.subr.bf16.mxu1 %v6392_v48 }
0x1554   :  { %6395 = vmatpush3.bf16.msra.mxu1 %v6392_v48 }
0x1555   :  { %6397 = vmatprep.subr.bf16.mxu1 %v6396_v41 }
0x15ce   :  { %v2889_v49 = vpop.xlane.xlu1 %2888 }
0x15cf   :  { %v2891_v50 = vsub.f32 %v2881_v31, %v2889_v49  ;;  %v2886_v51 = vpop.xlane.xlu0 %2885 }
0x15d0   :  { %v2890_v52 = vsub.f32 %v2876_v35, %v2886_v51  ;;  %v6400_v51 = vpack.c.bf16 %v5315_v47, %v5314_v46  ;;  %v5342_v46 = vld [vmem:[%s7572_s8 + $0x30] sm:$0xff] }
0x15d1   :  { %v2894_v53 = vmul.f32 1.442695, %v2891_v50 }
0x15d2   :  { %v2892_v54 = vmul.f32 1.442695, %v2890_v52  ;;  %v5328_v52 = vld [vmem:[%s7570_s6 + $0xc0] sm:$0xff] }
0x15d3   :  { %6551 = vpow2.f32 %v2894_v53  ;;  %v5329_v53 = vld [vmem:[%s7570_s6 + $0xc8] sm:$0xff] }
0x15d4   :  { %6553 = vpow2.f32 %v2892_v54  ;;  %v6412_v54 = vpack.c.bf16 %v5329_v53, %v5328_v52 }
0x15dd   :  { %v6552_v55 = vpop.eup %6551 }
0x15de   :  { %v6554_v56 = vpop.eup %6553  ;;  %v2899_v57 = vsel %vm425_vm3, %v6552_v55, 0.0 }
0x15df   :  { %2900 = vadd.xlane.f32.xlu1 %v2899_v57  ;;  %v2896_v58 = vsel %vm425_vm3, %v6554_v56, 0.0 }
0x15e0   :  { %2897 = vadd.xlane.f32.xlu0 %v2896_v58  ;;  %v5276_v58 = vld [vmem:[%s7572_s8 + $0x20] sm:$0xff] }
0x166c   :  { %v2901_v62 = vpop.xlane.xlu1 %2900 }
0x166d   :  { %6555 = vrcp.f32 %v2901_v62  ;;  %v2898_v63 = vpop.xlane.xlu0 %2897 }
0x166e   :  { %6557 = vrcp.f32 %v2898_v63  ;;  %v6404_v63 = vpack.c.bf16 %v5321_v60, %v5320_v36  ;;  %v5363_v36 = vld [vmem:[%s7570_s6 + $0xf0] sm:$0xff]  ;;  %v5364_v60 = vld [vmem:[%s7570_s6 + $0xf8] sm:$0xff] }
0x1677   :  { %v6556_v0 = vpop.eup %6555 }
0x1678   :  { %v6558_v3 = vpop.eup %6557  ;;  %v2905_v5 = vmul.f32 %v6556_v0, %v6552_v55  ;;  %v5330_v55 = vld [vmem:[%s7570_s6 + $0xd0] sm:$0xff]  ;;  %v5317_v0 = vld [vmem:[%s7598_s21 + $0x6] ss:$0 sm:$0xff] }
0x1679   :  { %v2904_v4 = vmul.f32 %v6558_v3, %v6554_v56  ;;  %v5331_v56 = vld [vmem:[%s7570_s6 + $0xd8] sm:$0xff] }
0x167a   :  { %v6416_v57 = vpack.c.bf16 %v5331_v56, %v5330_v55  ;;  %v5361_v56 = vld [vmem:[%s7570_s6 + $0xe0] sm:$0xff] }
0x167b   :  { %5963 = vmatprep.mubr.msk.f32.mxu0 %vm425_vm3, %v2904_v4 }
0x167c   :  { %5964 = vmatmul.mubr.msk.f32.vlgmr.msra.gmra.mrb[22].mxu0 %vm425_vm3, %v2905_v5 }
0x167d   :  { %6373 = vmatpush3.bf16.msra.mxu0 %v6370_v61  ;;  %5985 = vmatprep.mubr.msk.f32.mxu0 %vm81_vm0, %v7176_v34 }
0x167e   :  { %6375 = vmatprep.subr.bf16.mxu0 %v6374_v6 }
0x1681   :  { %6377 = vmatpush3.bf16.msra.mxu0 %v6374_v6  ;;  %v6408_v6 = vpack.c.bf16 %v5323_v2, %v5322_v1  ;;  %v5355_v1 = vld [vmem:[%s7595_s23 + $0xf0] sm:$0xff]  ;;  %v5356_v2 = vld [vmem:[%s7595_s23 + $0xf8] sm:$0xff] }
0x1684   :  { %5986 = vmatmul.mubr.msk.f32.vlgmr.msra.gmra.mrb[24].mxu0 %vm81_vm0, %v7178_v59 }
0x1685   :  { %6003 = vmatprep.mubr.msk.f32.mxu0 %vm337_vm1, %v3253_v8  ;;  %v5333_v8 = vld [vmem:[%s7571_s7 + $0x6] ss:$0 sm:$0xff] }
0x174f   :  { %v7280_v10 = vpop.f32.mrb[22].mxu0 }
0x1750   :  { %v7282_v11 = vpop.f32.mrb[23].mxu0 }
0x1757   :  { %v5987_v14 = vpop.f32.mrb[24].mxu0 }
0x1758   :  { %v3162_v15 = vadd.f32 %v5987_v14, %v5290_v12  ;;  %v3156_v16 = vpop.f32.mrb[25].mxu0 }
0x1759   :  { %v3157_v17 = vadd.f32 %v5290_v12, %v3156_v16 }
0x175b   :  { %v6386_v18 = vpack.c.bf16 %v3162_v15, %v3157_v17  ;;  %v5325_v17 = vld [vmem:[%s7569_s5 + $0x6] ss:$0 sm:$0xff] }
0x175d   :  { %6388 = vmatprep.subr.msk.bf16.mxu0 %vm6785_vm2, %v6386_v18 }
0x175e   :  { %6391 = vmatpush3.bf16.xpose.msk.msra.mxu0 %vm6785_vm2, %v6386_v18 }
0x175f   :  { %6013 = vmatprep.subr.mxu0 %v5307_v42 }
0x1765   :  { %6004 = vmatmul.mubr.msk.f32.vlgmr.msra.gmra.mrb[26].mxu0 %vm337_vm1, %v3254_v19 }
0x1766   :  { %6014 = vmatpush3.msra.mxu0 %v5307_v42 }
0x1767   :  { %6018 = vmatprep.subr.mxu0 %v5276_v58 }
0x1838   :  { %v6005_v21 = vpop.f32.mrb[26].mxu0 }
0x1839   :  { %v3339_v23 = vadd.f32 %v7242_v9, %v6005_v21  ;;  %v3333_v24 = vpop.f32.mrb[27].mxu0 }
0x183a   :  { %v3334_v25 = vadd.f32 %v7248_v33, %v3333_v24 }
0x183b   :  { %v3345_v26 = vsel %vm425_vm3, %v3339_v23, -inf }
0x183c   :  { %3346 = vmax.xlane.f32.xlu1 %v3345_v26  ;;  %v3342_v27 = vsel %vm425_vm3, %v3334_v25, -inf }
0x183d   :  { %3343 = vmax.xlane.f32.xlu0 %v3342_v27 }
0x18c9   :  { %v3347_v20 = vpop.xlane.xlu1 %3346 }
0x18ca   :  { %v3349_v28 = vsub.f32 %v3339_v23, %v3347_v20  ;;  %v3344_v29 = vpop.xlane.xlu0 %3343 }
0x18cb   :  { %v3348_v30 = vsub.f32 %v3334_v25, %v3344_v29 }
0x18cc   :  { %v3352_v13 = vmul.f32 1.442695, %v3349_v28 }
0x18cd   :  { %v3350_v31 = vmul.f32 1.442695, %v3348_v30 }
0x18ce   :  { %6559 = vpow2.f32 %v3352_v13 }
0x18cf   :  { %6561 = vpow2.f32 %v3350_v31 }
0x18d8   :  { %v6560_v32 = vpop.eup %6559 }
0x18d9   :  { %v6562_v35 = vpop.eup %6561  ;;  %v3357_v37 = vsel %vm425_vm3, %v6560_v32, 0.0 }
0x18da   :  { %3358 = vadd.xlane.f32.xlu1 %v3357_v37  ;;  %v3354_v38 = vsel %vm425_vm3, %v6562_v35, 0.0 }
0x18db   :  { %3355 = vadd.xlane.f32.xlu0 %v3354_v38 }
0x1967   :  { %v3359_v43 = vpop.xlane.xlu1 %3358 }
0x1968   :  { %6563 = vrcp.f32 %v3359_v43  ;;  %v3356_v44 = vpop.xlane.xlu0 %3355  ;;  %v5345_v43 = vld [vmem:[%s7596_s29 + $0xe0] sm:$0xff] }
0x1969   :  { %6565 = vrcp.f32 %v3356_v44  ;;  %v5346_v44 = vld [vmem:[%s7596_s29 + $0xe8] sm:$0xff] }
0x1972   :  { %v6564_v45 = vpop.eup %6563 }
0x1973   :  { %v6566_v48 = vpop.eup %6565  ;;  %v3363_v50 = vmul.f32 %v6564_v45, %v6560_v32  ;;  %v6430_v45 = vpack.c.bf16 %v5346_v44, %v5345_v43  ;;  %v5375_v43 = vld [vmem:[%s7572_s8 + $0x38] sm:$0xff] }
0x1974   :  { %v3362_v49 = vmul.f32 %v6566_v48, %v6562_v35 }
0x1976   :  { %6010 = vmatprep.mubr.msk.f32.mxu1 %vm425_vm3, %v3362_v49 }
0x1977   :  { %6011 = vmatmul.mubr.msk.f32.vlgmr.msra.gmra.mrb[36].mxu1 %vm425_vm3, %v3363_v50  ;;  %v5347_v50 = vld [vmem:[%s7596_s29 + $0xf0] sm:$0xff] }
0x1978   :  { %6399 = vmatpush3.bf16.msra.mxu1 %v6396_v41  ;;  %6031 = vmatprep.mubr.msk.f32.mxu1 %vm81_vm0, %v7176_v34 }
0x1979   :  { %6401 = vmatprep.subr.bf16.mxu1 %v6400_v51 }
0x197c   :  { %6403 = vmatpush3.bf16.msra.mxu1 %v6400_v51  ;;  %v5348_v51 = vld [vmem:[%s7596_s29 + $0xf8] sm:$0xff] }
0x197d   :  { %6413 = vmatprep.subr.bf16.mxu1 %v6412_v54  ;;  %v6434_v55 = vpack.c.bf16 %v5348_v51, %v5347_v50 }
0x197f   :  { %6032 = vmatmul.mubr.msk.f32.vlgmr.msra.gmra.mrb[38].mxu1 %vm81_vm0, %v7178_v59 }
0x1980   :  { %6415 = vmatpush3.bf16.msra.mxu1 %v6412_v54  ;;  %6053 = vmatprep.mubr.msk.f32.mxu1 %vm81_vm0, %v7176_v34 }
0x1981   :  { %6417 = vmatprep.subr.bf16.mxu1 %v6416_v57 }
0x1984   :  { %6419 = vmatpush3.bf16.msra.mxu1 %v6416_v57  ;;  %v5362_v57 = vld [vmem:[%s7570_s6 + $0xe8] sm:$0xff] }
0x1987   :  { %6054 = vmatmul.mubr.msk.f32.vlgmr.msra.gmra.mrb[40].mxu1 %vm81_vm0, %v7178_v59 }
0x1a4a   :  { %v6012_v61 = vpop.f32.mrb[36].mxu1 }
0x1a4b   :  { %v3436_v62 = vpop.f32.mrb[37].mxu1 }
0x1a4c   :  { %6015 = vmatprep.mubr.msk.f32.mxu0 %vm337_vm1, %v3436_v62  ;;  %v5353_v62 = vld [vmem:[%s7595_s23 + $0xe0] sm:$0xff] }
0x1a4d   :  { %6016 = vmatmul.mubr.msk.f32.vlgmr.msra.gmra.mrb[28].mxu0 %vm337_vm1, %v6012_v61  ;;  %v6450_v61 = vpack.c.bf16 %v5364_v60, %v5363_v36 }
0x1a4e   :  { %6019 = vmatpush3.msra.mxu0 %v5276_v58  ;;  %6020 = vmatprep.mubr.msk.f32.mxu0 %vm337_vm1, %v7282_v11  ;;  %v6446_v58 = vpack.c.bf16 %v5362_v57, %v5361_v56 }
0x1a4f   :  { %6405 = vmatprep.subr.bf16.mxu0 %v6404_v63 }
0x1a52   :  { %v6033_v3 = vpop.f32.mrb[38].mxu1 }
0x1a53   :  { %v3694_v4 = vadd.f32 %v6033_v3, %v5317_v0  ;;  %v3688_v5 = vpop.f32.mrb[39].mxu1 }
0x1a54   :  { %v3689_v7 = vadd.f32 %v5317_v0, %v3688_v5  ;;  %v6442_v5 = vpack.c.bf16 %v5356_v2, %v5355_v1 }
0x1a55   :  { %6021 = vmatmul.mubr.msk.f32.vlgmr.msra.gmra.mrb[28].mxu0 %vm337_vm1, %v7280_v10  ;;  %v3874_v25 = vmul.f32 0.35355338, %v3694_v4 }
0x1a56   :  { %6407 = vmatpush3.bf16.msra.mxu0 %v6404_v63  ;;  %6042 = vmatprep.mubr.msk.f32.mxu0 %vm81_vm0, %v7176_v34  ;;  %v3873_v15 = vmul.f32 0.35355338, %v3689_v7  ;;  %v5354_v63 = vld [vmem:[%s7595_s23 + $0xe8] sm:$0xff] }
0x1a57   :  { %6409 = vmatprep.subr.bf16.mxu0 %v6408_v6  ;;  %v6438_v0 = vpack.c.bf16 %v5354_v63, %v5353_v62 }
0x1a5a   :  { %6411 = vmatpush3.bf16.msra.mxu0 %v6408_v6  ;;  %v6055_v11 = vpop.f32.mrb[40].mxu1  ;;  %v5350_v6 = vld [vmem:[%s7598_s21 + $0x7] ss:$0 sm:$0xff] }
0x1a5b   :  { %v3870_v12 = vadd.f32 %v6055_v11, %v5333_v8  ;;  %v3864_v14 = vpop.f32.mrb[41].mxu1 }
0x1a5c   :  { %v3865_v16 = vadd.f32 %v5333_v8, %v3864_v14 }
0x1a5d   :  { %6043 = vmatmul.mubr.msk.f32.vlgmr.msra.gmra.mrb[30].mxu0 %vm81_vm0, %v7178_v59 }
0x1a5e   :  { %v6426_v10 = vpack.c.bf16 %v3870_v12, %v3865_v16  ;;  %6060 = vmatprep.mubr.msk.f32.mxu0 %vm337_vm1, %v3873_v15  ;;  %v5366_v15 = vld [vmem:[%s7571_s7 + $0x7] ss:$0 sm:$0xff] }
0x1a60   :  { %6427 = vmatprep.subr.bf16.mxu1 %v6426_v10 }
0x1a61   :  { %6429 = vmatpush3.bf16.msra.mxu1 %v6426_v10 }
0x1a62   :  { %6431 = vmatprep.subr.bf16.mxu1 %v6430_v45 }
0x1b30   :  { %v6044_v18 = vpop.f32.mrb[30].mxu0 }
0x1b31   :  { %v3782_v19 = vadd.f32 %v6044_v18, %v5325_v17  ;;  %v3776_v21 = vpop.f32.mrb[31].mxu0 }
0x1b32   :  { %v3777_v23 = vadd.f32 %v5325_v17, %v3776_v21  ;;  %v5358_v21 = vld [vmem:[%s7569_s5 + $0x7] ss:$0 sm:$0xff] }
0x1b34   :  { %v6420_v24 = vpack.c.bf16 %v3782_v19, %v3777_v23 }
0x1b36   :  { %6422 = vmatprep.subr.msk.bf16.mxu0 %vm6785_vm2, %v6420_v24 }
0x1b37   :  { %6425 = vmatpush3.bf16.xpose.msk.msra.mxu0 %vm6785_vm2, %v6420_v24 }
0x1b38   :  { %6070 = vmatprep.subr.mxu0 %v5342_v46 }
0x1b3e   :  { %6061 = vmatmul.mubr.msk.f32.vlgmr.msra.gmra.mrb[32].mxu0 %vm337_vm1, %v3874_v25 }
0x1b3f   :  { %6071 = vmatpush3.msra.mxu0 %v5342_v46 }
0x1b40   :  { %6439 = vmatprep.subr.bf16.mxu0 %v6438_v0 }
0x1c11   :  { %v6062_v26 = vpop.f32.mrb[32].mxu0 }
0x1c12   :  { %v3959_v27 = vadd.f32 %v7242_v9, %v6062_v26  ;;  %v3953_v20 = vpop.f32.mrb[33].mxu0 }
0x1c13   :  { %v3954_v28 = vadd.f32 %v7248_v33, %v3953_v20 }
0x1c14   :  { %v3965_v29 = vsel %vm425_vm3, %v3959_v27, -inf }
0x1c15   :  { %3966 = vmax.xlane.f32.xlu1 %v3965_v29  ;;  %v3962_v30 = vsel %vm425_vm3, %v3954_v28, -inf }
0x1c16   :  { %3963 = vmax.xlane.f32.xlu0 %v3962_v30 }
0x1ca2   :  { %v3967_v13 = vpop.xlane.xlu1 %3966 }
0x1ca3   :  { %v3969_v31 = vsub.f32 %v3959_v27, %v3967_v13  ;;  %v3964_v32 = vpop.xlane.xlu0 %3963 }
0x1ca4   :  { %v3968_v35 = vsub.f32 %v3954_v28, %v3964_v32 }
0x1ca5   :  { %v3972_v37 = vmul.f32 1.442695, %v3969_v31 }
0x1ca6   :  { %v3970_v38 = vmul.f32 1.442695, %v3968_v35 }
0x1ca7   :  { %6567 = vpow2.f32 %v3972_v37 }
0x1ca8   :  { %6569 = vpow2.f32 %v3970_v38 }
0x1cb1   :  { %v6568_v39 = vpop.eup %6567 }
0x1cb2   :  { %v6570_v40 = vpop.eup %6569  ;;  %v3977_v41 = vsel %vm425_vm3, %v6568_v39, 0.0 }
0x1cb3   :  { %3978 = vadd.xlane.f32.xlu1 %v3977_v41  ;;  %v3974_v42 = vsel %vm425_vm3, %v6570_v40, 0.0 }
0x1cb4   :  { %3975 = vadd.xlane.f32.xlu0 %v3974_v42 }
0x1d40   :  { %v3979_v47 = vpop.xlane.xlu1 %3978 }
0x1d41   :  { %6571 = vrcp.f32 %v3979_v47  ;;  %v3976_v48 = vpop.xlane.xlu0 %3975 }
0x1d42   :  { %6573 = vrcp.f32 %v3976_v48 }
0x1d4b   :  { %v6572_v49 = vpop.eup %6571 }
0x1d4c   :  { %v6574_v52 = vpop.eup %6573  ;;  %v3983_v54 = vmul.f32 %v6572_v49, %v6568_v39 }
0x1d4d   :  { %v3982_v53 = vmul.f32 %v6574_v52, %v6570_v40  ;;  %v5379_v52 = vld [vmem:[%s7573_s9 + $0x1] ss:$0 sm:$0xff] }
0x1d4f   :  { %6067 = vmatprep.mubr.msk.f32.mxu1 %vm425_vm3, %v3982_v53 }
0x1d50   :  { %6068 = vmatmul.mubr.msk.f32.vlgmr.msra.gmra.mrb[42].mxu1 %vm425_vm3, %v3983_v54 }
0x1d51   :  { %6433 = vmatpush3.bf16.msra.mxu1 %v6430_v45  ;;  %6083 = vmatprep.mubr.msk.f32.mxu1 %vm81_vm0, %v7176_v34 }
0x1d52   :  { %6435 = vmatprep.subr.bf16.mxu1 %v6434_v55 }
0x1d55   :  { %6437 = vmatpush3.bf16.msra.mxu1 %v6434_v55 }
0x1d56   :  { %6447 = vmatprep.subr.bf16.mxu1 %v6446_v58 }
0x1d58   :  { %6084 = vmatmul.mubr.msk.f32.vlgmr.msra.gmra.mrb[44].mxu1 %vm81_vm0, %v7178_v59 }
0x1d59   :  { %6449 = vmatpush3.bf16.msra.mxu1 %v6446_v58  ;;  %6105 = vmatprep.mubr.msk.f32.mxu1 %vm81_vm0, %v7176_v34 }
0x1d5a   :  { %6451 = vmatprep.subr.bf16.mxu1 %v6450_v61 }
0x1d5d   :  { %6453 = vmatpush3.bf16.msra.mxu1 %v6450_v61 }
0x1d60   :  { %6106 = vmatmul.mubr.msk.f32.vlgmr.msra.gmra.mrb[46].mxu1 %vm81_vm0, %v7178_v59 }
0x1e23   :  { %v6069_v3 = vpop.f32.mrb[42].mxu1 }
0x1e24   :  { %v4056_v4 = vpop.f32.mrb[43].mxu1 }
0x1e25   :  { %6072 = vmatprep.mubr.msk.f32.mxu0 %vm337_vm1, %v4056_v4 }
0x1e26   :  { %6073 = vmatmul.mubr.msk.f32.vlgmr.msra.gmra.mrb[28].mxu0 %vm337_vm1, %v6069_v3 }
0x1e27   :  { %6441 = vmatpush3.bf16.msra.mxu0 %v6438_v0  ;;  %6094 = vmatprep.mubr.msk.f32.mxu0 %vm81_vm0, %v7176_v34 }
0x1e28   :  { %6443 = vmatprep.subr.bf16.mxu0 %v6442_v5 }
0x1e2b   :  { %v6085_v7 = vpop.f32.mrb[44].mxu1  ;;  %6445 = vmatpush3.bf16.msra.mxu0 %v6442_v5 }
0x1e2c   :  { %v4235_v8 = vadd.f32 %v6085_v7, %v5350_v6  ;;  %v4229_v11 = vpop.f32.mrb[45].mxu1 }
0x1e2d   :  { %v4230_v12 = vadd.f32 %v5350_v6, %v4229_v11  ;;  %v5385_v6 = vld [vmem:[%s7576_s12 + $0x28] sm:$0xff]  ;;  %v5387_v11 = vld [vmem:[%s7576_s12 + $0x38] sm:$0xff] }
0x1e2e   :  { %6095 = vmatmul.mubr.msk.f32.vlgmr.msra.gmra.mrb[34].mxu0 %vm81_vm0, %v7178_v59  ;;  %v4415_v20 = vmul.f32 0.35355338, %v4235_v8  ;;  %v5386_v8 = vld [vmem:[%s7576_s12 + $0x30] sm:$0xff] }
0x1e2f   :  { %v4414_v14 = vmul.f32 0.35355338, %v4230_v12  ;;  %v6468_v12 = vpack.c.bf16 %v5387_v11, %v5386_v8 }
0x1e31   :  { %6112 = vmatprep.mubr.msk.f32.mxu0 %vm337_vm1, %v4414_v14  ;;  %v5392_v14 = vld [vmem:[%s7578_s14 + $0x40] sm:$0xff] }
0x1e33   :  { %v6107_v16 = vpop.f32.mrb[46].mxu1 }
0x1e34   :  { %v4411_v10 = vadd.f32 %v6107_v16, %v5366_v15  ;;  %v4405_v17 = vpop.f32.mrb[47].mxu1  ;;  %v5394_v16 = vld [vmem:[%s7578_s14 + $0x50] sm:$0xff] }
0x1e35   :  { %v4406_v18 = vadd.f32 %v5366_v15, %v4405_v17  ;;  %v5393_v15 = vld [vmem:[%s7578_s14 + $0x48] sm:$0xff]  ;;  %v5395_v17 = vld [vmem:[%s7578_s14 + $0x58] sm:$0xff] }
0x1e37   :  { %v6460_v19 = vpack.c.bf16 %v4411_v10, %v4406_v18  ;;  %v6472_v10 = vpack.c.bf16 %v5393_v15, %v5392_v14  ;;  %v6476_v18 = vpack.c.bf16 %v5395_v17, %v5394_v16 }
0x1e39   :  { %6461 = vmatprep.subr.bf16.mxu1 %v6460_v19 }
0x1e3a   :  { %6463 = vmatpush3.bf16.msra.mxu1 %v6460_v19  ;;  %v5396_v19 = vld [vmem:[%s7578_s14 + $0x60] sm:$0xff] }
0x1f01   :  { %v6096_v23 = vpop.f32.mrb[34].mxu0 }
0x1f02   :  { %v4323_v24 = vadd.f32 %v6096_v23, %v5358_v21  ;;  %v4317_v25 = vpop.f32.mrb[35].mxu0 }
0x1f03   :  { %v4318_v26 = vadd.f32 %v5358_v21, %v4317_v25  ;;  %v5397_v21 = vld [vmem:[%s7578_s14 + $0x68] sm:$0xff] }
0x1f04   :  { %v6480_v23 = vpack.c.bf16 %v5397_v21, %v5396_v19  ;;  %v5407_v21 = vld [vmem:[%s7581_s17 + $0x1] ss:$0 sm:$0xff] }
0x1f05   :  { %v6454_v27 = vpack.c.bf16 %v4323_v24, %v4318_v26 }
0x1f07   :  { %6456 = vmatprep.subr.msk.bf16.mxu0 %vm6785_vm2, %v6454_v27 }
0x1f08   :  { %6459 = vmatpush3.bf16.xpose.msk.msra.mxu0 %vm6785_vm2, %v6454_v27 }
0x1f09   :  { %6122 = vmatprep.subr.mxu0 %v5375_v43 }
0x1f0f   :  { %6113 = vmatmul.mubr.msk.f32.vlgmr.msra.gmra.mrb[36].mxu0 %vm337_vm1, %v4415_v20 }
0x1f10   :  { %6123 = vmatpush3.msra.mxu0 %v5375_v43 }
0x1f11   :  { %6473 = vmatprep.subr.bf16.mxu0 %v6472_v10 }
0x1fe2   :  { %v6114_v28 = vpop.f32.mrb[36].mxu0 }
0x1fe3   :  { %v4500_v29 = vadd.f32 %v7242_v9, %v6114_v28  ;;  %v4494_v30 = vpop.f32.mrb[37].mxu0 }
0x1fe4   :  { %v4495_v13 = vadd.f32 %v7248_v33, %v4494_v30  ;;  %v5382_v30 = vld [vmem:[%s7574_s10 + $0x1] ss:$0 sm:$0xff] }
0x1fe5   :  { %v4506_v31 = vsel %vm425_vm3, %v4500_v29, -inf }
0x1fe6   :  { %4507 = vmax.xlane.f32.xlu1 %v4506_v31  ;;  %v4503_v32 = vsel %vm425_vm3, %v4495_v13, -inf }
0x1fe7   :  { %4504 = vmax.xlane.f32.xlu0 %v4503_v32 }
0x2073   :  { %v4508_v35 = vpop.xlane.xlu1 %4507 }
0x2074   :  { %v4510_v37 = vsub.f32 %v4500_v29, %v4508_v35  ;;  %v4505_v38 = vpop.xlane.xlu0 %4504  ;;  %v5383_v35 = vld [vmem:[%s7575_s11 + $0x1] ss:$0 sm:$0xff] }
0x2075   :  { %v4509_v22 = vsub.f32 %v4495_v13, %v4505_v38 }
0x2076   :  { %v4513_v39 = vmul.f32 1.442695, %v4510_v37 }
0x2077   :  { %v4511_v40 = vmul.f32 1.442695, %v4509_v22 }
0x2078   :  { %6575 = vpow2.f32 %v4513_v39 }
0x2079   :  { %6577 = vpow2.f32 %v4511_v40  ;;  %v5398_v40 = vld [vmem:[%s7578_s14 + $0x70] sm:$0xff] }
0x2082   :  { %v6576_v41 = vpop.eup %6575 }
0x2083   :  { %v6578_v42 = vpop.eup %6577  ;;  %v4518_v9 = vsel %vm425_vm3, %v6576_v41, 0.0 }
0x2084   :  { %4519 = vadd.xlane.f32.xlu1 %v4518_v9  ;;  %v4515_v33 = vsel %vm425_vm3, %v6578_v42, 0.0  ;;  %v5389_v9 = vld [vmem:[%s7577_s13 + $0x1] ss:$0 sm:$0xff] }
0x2085   :  { %4516 = vadd.xlane.f32.xlu0 %v4515_v33 }
0x2111   :  { %v4520_v44 = vpop.xlane.xlu1 %4519 }
0x2112   :  { %6579 = vrcp.f32 %v4520_v44  ;;  %v4517_v45 = vpop.xlane.xlu0 %4516 }
0x2113   :  { %6581 = vrcp.f32 %v4517_v45 }
0x211c   :  { %v6580_v46 = vpop.eup %6579 }
0x211d   :  { %v6582_v47 = vpop.eup %6581  ;;  %v4524_v49 = vmul.f32 %v6580_v46, %v6576_v41  ;;  %v5399_v41 = vld [vmem:[%s7578_s14 + $0x78] sm:$0xff] }
0x211e   :  { %v4523_v48 = vmul.f32 %v6582_v47, %v6578_v42  ;;  %v6484_v42 = vpack.c.bf16 %v5399_v41, %v5398_v40 }
0x2120   :  { %6119 = vmatprep.mubr.msk.f32.mxu1 %vm425_vm3, %v4523_v48  ;;  %v5401_v48 = vld [vmem:[%s7579_s15 + $0x1] ss:$0 sm:$0xff] }
0x2121   :  { %6120 = vmatmul.mubr.msk.f32.vlgmr.msra.gmra.mrb[48].mxu1 %vm425_vm3, %v4524_v49 }
0x21f4   :  { %v6121_v50 = vpop.f32.mrb[48].mxu1 }
0x21f5   :  { %v4597_v51 = vpop.f32.mrb[49].mxu1 }
0x21f6   :  { %6124 = vmatprep.mubr.msk.f32.mxu0 %vm337_vm1, %v4597_v51 }
0x21f7   :  { %6125 = vmatmul.mubr.msk.f32.vlgmr.msra.gmra.mrb[28].mxu0 %vm337_vm1, %v6121_v50 }
0x21f8   :  { %6475 = vmatpush3.bf16.msra.mxu0 %v6472_v10  ;;  %v5406_v10 = vld [vmem:[%s7580_s16 + $0x1] ss:$0 sm:$0xff]  ;;  %s6625_s16 = smov [#allocation2]  }
0x21f9   :  { %6477 = vmatprep.subr.bf16.mxu0 %v6476_v18  ;;  %s5108_s17 = sshll.u32 %s6625_s16, 4  ;;  %s5109_s17 = int_to_ptr.vmem [resolvable:$true] %s5108_s17 }
0x21fa   :  { %p6606_p1 = scmp.lt.s32.totalorder %s5109_s17, %s5109_s17 }
0x21fc   :  { %6479 = vmatpush3.bf16.msra.mxu0 %v6476_v18 }
0x21fd   :  { %6481 = vmatprep.subr.bf16.mxu0 %v6480_v23 }
0x2200   :  { %6483 = vmatpush3.bf16.msra.mxu0 %v6480_v23 }
0x2201   :  { %6485 = vmatprep.subr.bf16.mxu0 %v6484_v42 }
0x2204   :  { %6487 = vmatpush3.bf16.msra.mxu0 %v6484_v42 }
0x22ca   :  { %v6126_v53 = vpop.f32.mrb[28].mxu0 }
0x22cb   :  { %v4700_v54 = vadd.f32 %v6126_v53, %v5379_v52  ;;  %v4680_v55 = vpop.f32.mrb[29].mxu0 }
0x22cc   :  { %v4699_v56 = vadd.f32 %v5379_v52, %v4680_v55 }
0x22cd   :  { %v4702_v57 = vadd.f32 %v4700_v54, %v7178_v59 }
0x22ce   :  { %v4701_v58 = vadd.f32 %v4699_v56, %v7176_v34  ;;  %v5384_v34 = vld [vmem:[%s7576_s12 + $0x20] sm:$0xff] }
0x22cf   :  { %v4710_v36 = vsel %vm81_vm0, %v4702_v57, 0.0  ;;  %v6464_v7 = vpack.c.bf16 %v5385_v6, %v5384_v34  ;;  %v4994_v34 = vld [vmem:[%s7582_s18 + $0x18] sm:$0xff] }
0x22d0   :  { %4711 = vadd.xlane.f32.xlu1 %v4710_v36  ;;  %v4707_v60 = vsel %vm81_vm0, %v4701_v58, 0.0 }
0x22d1   :  { %4708 = vadd.xlane.f32.xlu0 %v4707_v60  ;;  %6465 = vmatprep.subr.bf16.mxu1 %v6464_v7 }
0x22d2   :  { %6467 = vmatpush3.bf16.msra.mxu1 %v6464_v7 }
0x22d3   :  { %6469 = vmatprep.subr.bf16.mxu1 %v6468_v12 }
0x22d6   :  { %6471 = vmatpush3.bf16.msra.mxu1 %v6468_v12 }
0x235d   :  { %v4712_v61 = vpop.xlane.xlu1 %4711 }
0x235e   :  { %v4714_v62 = vmul.f32 0.03125, %v4712_v61  ;;  %v4709_v63 = vpop.xlane.xlu0 %4708 }
0x235f   :  { %v4713_v0 = vmul.f32 0.03125, %v4709_v63 }
0x2360   :  { %v4716_v1 = vsub.f32 %v4702_v57, %v4714_v62 }
0x2361   :  { %v4715_v2 = vsub.f32 %v4701_v58, %v4713_v0 }
0x2362   :  { %v4718_v3 = vmul.f32 %v4716_v1, %v4716_v1 }
0x2363   :  { %v4717_v4 = vmul.f32 %v4715_v2, %v4715_v2 }
0x2364   :  { %v4722_v5 = vsel %vm81_vm0, %v4718_v3, 0.0  ;;  %v4991_v3 = vld [vmem:[%s7582_s18] sm:$0xff] }
0x2365   :  { %4723 = vadd.xlane.f32.xlu1 %v4722_v5  ;;  %v4719_v59 = vsel %vm81_vm0, %v4717_v4, 0.0  ;;  %v4992_v4 = vld [vmem:[%s7582_s18 + $0x8] sm:$0xff] }
0x2366   :  { %4720 = vadd.xlane.f32.xlu0 %v4719_v59  ;;  %v6488_v5 = vpack.c.bf16 %v4992_v4, %v4991_v3  ;;  %v4993_v59 = vld [vmem:[%s7582_s18 + $0x10] sm:$0xff] }
0x2367   :  { %v6492_v6 = vpack.c.bf16 %v4994_v34, %v4993_v59 }
0x2368   :  { %6489 = vmatprep.subr.bf16.mxu1 %v6488_v5 }
0x23f2   :  { %v4724_v24 = vpop.xlane.xlu1 %4723 }
0x23f3   :  { %v4726_v25 = vmul.f32 0.03125, %v4724_v24  ;;  %v4721_v26 = vpop.xlane.xlu0 %4720 }
0x23f4   :  { %v4725_v27 = vmul.f32 0.03125, %v4721_v26 }
0x23f5   :  { %v4728_v20 = vadd.f32 1e-05, %v4726_v25 }
0x23f6   :  { %v4727_v28 = vadd.f32 1e-05, %v4725_v27  ;;  %v5408_v27 = vld [vmem:[%s7583_s19] ss:$0 sm:$0xff]  ;;  %s6601_s19 = scalar_lea.vmem %s5109_s17, 256 }
0x23f7   :  { %6583 = vrsqrt.f32 %v4728_v20  ;;  %p6602_p0 = scmp.ne.s32.totalorder %s5109_s17, %s6601_s19  ;;  %p6607_p2 = scmp.lt.s32.totalorder %s6601_s19, %s6601_s19 }
0x23f8   :  { %6585 = vrsqrt.f32 %v4727_v28 }
0x23f9   :  { %p6608_p3 = por %p6607_p2, %p6606_p1 }
0x23fb   :  { %p6609_p4 = pnand %p6608_p3, %p6602_p0 }
0x2401   :  { %v6584_v29 = vpop.eup %6583 }
0x2402   :  { %v6586_v13 = vpop.eup %6585  ;;  %v4732_v31 = vmul.f32 %v6584_v29, %v4716_v1 }
0x2403   :  { %v4731_v32 = vmul.f32 %v6586_v13, %v4715_v2 }
0x2404   :  { %v4740_v37 = vmul.f32 %v5382_v30, %v4732_v31 }
0x2405   :  { %v4739_v38 = vmul.f32 %v5382_v30, %v4731_v32 }
0x2406   :  { %v4748_v39 = vadd.f32 %v5383_v35, %v4740_v37 }
0x2407   :  { %v4747_v22 = vadd.f32 %v5383_v35, %v4739_v38 }
0x2409   :  { %6135 = vmatprep.mubr.msk.f32.mxu1 %vm81_vm0, %v4747_v22 }
0x240a   :  { %6136 = vmatmul.mubr.msk.f32.vlgmr.msra.gmra.mrb[50].mxu1 %vm81_vm0, %v4748_v39 }
0x240b   :  { %6491 = vmatpush3.bf16.msra.mxu1 %v6488_v5 }
0x240c   :  { %6493 = vmatprep.subr.bf16.mxu1 %v6492_v6 }
0x240f   :  { %6495 = vmatpush3.bf16.msra.mxu1 %v6492_v6 }
0x24dd   :  { %v6137_v33 = vpop.f32.mrb[50].mxu1 }
0x24de   :  { %v4840_v43 = vadd.f32 %v6137_v33, %v5389_v9  ;;  %v4834_v44 = vpop.f32.mrb[51].mxu1 }
0x24df   :  { %v4835_v45 = vadd.f32 %v5389_v9, %v4834_v44 }
0x24e0   :  { %v4844_v47 = vmax.f32 %v4840_v43, 0.0 }
0x24e1   :  { %v4843_v46 = vmax.f32 %v4835_v45, 0.0 }
0x24e3   :  { %6154 = vmatprep.mubr.msk.f32.mxu0 %vm2397_vm4, %v4843_v46 }
0x24e4   :  { %6155 = vmatmul.mubr.msk.f32.vlgmr.msra.gmra.mrb[38].mxu0 %vm2397_vm4, %v4844_v47 }
0x25b7   :  { %v6156_v49 = vpop.f32.mrb[38].mxu0 }
0x25b8   :  { %v4940_v50 = vadd.f32 %v6156_v49, %v5401_v48  ;;  %v4934_v51 = vpop.f32.mrb[39].mxu0 }
0x25b9   :  { %v4935_v52 = vadd.f32 %v5401_v48, %v4934_v51 }
0x25ba   :  { %v4944_v53 = vadd.f32 %v4940_v50, %v4748_v39 }
0x25bb   :  { %v4943_v54 = vadd.f32 %v4935_v52, %v4747_v22 }
0x25bc   :  { %v4952_v55 = vsel %vm81_vm0, %v4944_v53, 0.0 }
0x25bd   :  { %4953 = vadd.xlane.f32.xlu1 %v4952_v55  ;;  %v4949_v56 = vsel %vm81_vm0, %v4943_v54, 0.0 }
0x25be   :  { %4950 = vadd.xlane.f32.xlu0 %v4949_v56 }
0x264a   :  { %v4954_v57 = vpop.xlane.xlu1 %4953 }
0x264b   :  { %v4956_v58 = vmul.f32 0.03125, %v4954_v57  ;;  %v4951_v36 = vpop.xlane.xlu0 %4950 }
0x264c   :  { %v4955_v60 = vmul.f32 0.03125, %v4951_v36 }
0x264d   :  { %v4958_v61 = vsub.f32 %v4944_v53, %v4956_v58 }
0x264e   :  { %v4957_v62 = vsub.f32 %v4943_v54, %v4955_v60 }
0x264f   :  { %v4960_v63 = vmul.f32 %v4958_v61, %v4958_v61 }
0x2650   :  { %v4959_v0 = vmul.f32 %v4957_v62, %v4957_v62 }
0x2651   :  { %v4964_v1 = vsel %vm81_vm0, %v4960_v63, 0.0 }
0x2652   :  { %4965 = vadd.xlane.f32.xlu1 %v4964_v1  ;;  %v4961_v2 = vsel %vm81_vm0, %v4959_v0, 0.0 }
0x2653   :  { %4962 = vadd.xlane.f32.xlu0 %v4961_v2 }
0x26df   :  { %v4966_v7 = vpop.xlane.xlu1 %4965 }
0x26e0   :  { %v4968_v8 = vmul.f32 0.03125, %v4966_v7  ;;  %v4963_v11 = vpop.xlane.xlu0 %4962 }
0x26e1   :  { %v4967_v12 = vmul.f32 0.03125, %v4963_v11 }
0x26e2   :  { %v4970_v14 = vadd.f32 1e-05, %v4968_v8 }
0x26e3   :  { %v4969_v15 = vadd.f32 1e-05, %v4967_v12 }
0x26e4   :  { %6587 = vrsqrt.f32 %v4970_v14 }
0x26e5   :  { %6589 = vrsqrt.f32 %v4969_v15 }
0x26ee   :  { %v6588_v16 = vpop.eup %6587 }
0x26ef   :  { %v6590_v17 = vpop.eup %6589  ;;  %v4974_v18 = vmul.f32 %v6588_v16, %v4958_v61 }
0x26f0   :  { %v4973_v19 = vmul.f32 %v6590_v17, %v4957_v62 }
0x26f1   :  { %v4982_v23 = vmul.f32 %v5406_v10, %v4974_v18 }
0x26f2   :  { %v4981_v24 = vmul.f32 %v5406_v10, %v4973_v19 }
0x26f3   :  { %v4990_v26 = vadd.f32 %v5407_v21, %v4982_v23 }
0x26f4   :  { %v4989_v25 = vadd.f32 %v5407_v21, %v4981_v24 }
0x26f6   :  { %6165 = vmatprep.mubr.msk.f32.mxu1 %vm81_vm0, %v4989_v25 }
0x26f7   :  { %6166 = vmatmul.mubr.msk.f32.vlgmr.msra.gmra.mrb[52].mxu1 %vm81_vm0, %v4990_v26 }
0x27ca   :  { %v6167_v20 = vpop.f32.mrb[52].mxu1 }
0x27cb   :  { %v5080_v28 = vadd.f32 %v6167_v20, %v5408_v27  ;;  %v5074_v29 = vpop.f32.mrb[53].mxu1 }
0x27cc   :  { %v5075_v30 = vadd.f32 %v5408_v27, %v5074_v29 }
0x27cd   :  { %5085 = vmax.xlane.f32.xlu1 %v5080_v28 }
0x27ce   :  { %5083 = vmax.xlane.f32.xlu0 %v5075_v30 }
0x285a   :  { %v5086_v13 = vpop.xlane.xlu1 %5085 }
0x285b   :  { %v5088_v31 = vsub.f32 %v5080_v28, %v5086_v13  ;;  %v5084_v32 = vpop.xlane.xlu0 %5083 }
0x285c   :  { %v5087_v35 = vsub.f32 %v5075_v30, %v5084_v32 }
0x285d   :  { %v5091_v37 = vmul.f32 1.442695, %v5088_v31 }
0x285e   :  { %v5089_v38 = vmul.f32 1.442695, %v5087_v35 }
0x285f   :  { %6591 = vpow2.f32 %v5091_v37 }
0x2860   :  { %6593 = vpow2.f32 %v5089_v38 }
0x2869   :  { %v6592_v22 = vpop.eup %6591 }
0x286a   :  { %v6594_v39 = vpop.eup %6593  ;;  %5095 = vadd.xlane.f32.xlu1 %v6592_v22 }
0x286b   :  { %5093 = vadd.xlane.f32.xlu0 %v6594_v39 }
0x28f7   :  { %v5096_v40 = vpop.xlane.xlu1 %5095 }
0x28f8   :  { %6595 = vrcp.f32 %v5096_v40  ;;  %v5094_v41 = vpop.xlane.xlu0 %5093 }
0x28f9   :  { %6597 = vrcp.f32 %v5094_v41 }
0x2902   :  { %v6596_v42 = vpop.eup %6595 }
0x2903   :  { %v6598_v9 = vpop.eup %6597  ;;  %v5100_v33 = vmul.f32 %v6596_v42, %v6592_v22 }
0x2904   :  { %v5099_v43 = vmul.f32 %v6598_v9, %v6594_v39 }
0x2905   :  { %5102 = vst [vmem:[#allocation2 + $0x8] sm:$0xff] %v5100_v33 }
0x2906   :  { %5101 = vst [vmem:[#allocation2] sm:$0xff] %v5099_v43 }
0x2907   :  { %6612 = shalt.err (!%p6609_p4)
}
0x2908   :  { %s6613_s9 = scalar_lea.hbm %s7584_s20, 256 }
0x2909   :  { %p6614_p5 = scmp.ne.s32.totalorder %s7584_s20, %s6613_s9  ;;  %p6617_p6 = scmp.lt.u32.totalorder %s6613_s9, %s7584_s20 }
0x290b   :  { %p6619_p7 = pnand %p6617_p6, %p6614_p5 }
0x290d   :  { %6622 = shalt.err (!%p6619_p7)
}
0x290e   :  { %s6626_s10 = smov 128   ;;  %s6627_s28 = smov 8  }
0x290f   :  { %5114 = dma.vmem_to_hbm [thread:$0]  %s5109_s17, 256, %s7584_s20, [#allocation3], %s6626_s10, %s6626_s10, %s6627_s28  }
0x2910   :  { %6623 = dma.done.wait [#allocation3], 256  }
0x2911   :  { %6624 = vsyncadd [#allocation3], 4294967040 }
0x2912   :  { %5118 = vsyncpa [#allocation3], 1 }

</bundles_post_ra>
